<compile_context>
chip_gen: v5e
topology: v5e:2x2
jax: 0.10.0
libtpu: 0.0.40
codegen_flags: <defaults>
</compile_context>

<pallas_src>
import jax
import jax.numpy as jnp
from jax.experimental import pallas as pl
from jax.experimental.pallas import tpu as pltpu


def _round_up(v, m):
    return (v + m - 1) // m * m


def _gin_conv_kernel(eps_ref, a_ref, x_ref, wa_ref, ba_ref, wb_ref, out_ref,
                     acc_ref):
    """One GINConv + 2-layer MLP, K-tiled over the contraction (node) dim.

    Grid: (row block i, contraction block k); row tile == contraction tile.

    eps_ref : (1,)      SMEM f32   learned eps
    a_ref   : (TN, TN)  int8       adjacency block A[i-rows, k-cols]
    x_ref   : (TN, Fp)  bf16       node-feature block for contraction index k
    wa_ref  : (Fp, Hp)  bf16       first Linear (BN folded in for conv1)
    ba_ref  : (1, Hp)   f32        bias from folded BN (zeros for conv2)
    wb_ref  : (Hp, Op)  bf16       second Linear
    out_ref : (TN, Op)  bf16/f32   MLP output for row block i
    acc_ref : (TN, Fp)  f32 VMEM   aggregation accumulator
    """
    i = pl.program_id(0)
    k = pl.program_id(1)

    @pl.when(k == 0)
    def _():
        acc_ref[...] = jnp.zeros_like(acc_ref)

    # Neighbor aggregation: int8 adjacency -> bf16 -> MXU, f32 accumulate.
    a_blk = a_ref[...].astype(jnp.bfloat16)
    acc_ref[...] += jnp.dot(a_blk, x_ref[...],
                            preferred_element_type=jnp.float32)

    # Self term: contraction block k == i holds exactly this row block's x.
    @pl.when(k == i)
    def _():
        acc_ref[...] += (1.0 + eps_ref[0]) * x_ref[...].astype(jnp.float32)

    # MLP + store only once per row block, after the reduction finishes.
    @pl.when(k == pl.num_programs(1) - 1)
    def _():
        h = acc_ref[...].astype(jnp.bfloat16)
        z = jnp.dot(h, wa_ref[...], preferred_element_type=jnp.float32)
        z = jnp.maximum(z + ba_ref[...], 0.0).astype(jnp.bfloat16)
        z = jnp.dot(z, wb_ref[...], preferred_element_type=jnp.float32)
        out_ref[...] = jnp.maximum(z, 0.0).astype(out_ref.dtype)


def gin_conv(eps, adj_i8, x_bf16, wa, ba, wb, *, tn, out_dtype):
    np_, fp = x_bf16.shape
    hp = wa.shape[1]
    op = wb.shape[1]
    assert np_ % tn == 0 and adj_i8.shape == (np_, np_)
    nblk = np_ // tn
    return pl.pallas_call(
        _gin_conv_kernel,
        out_shape=jax.ShapeDtypeStruct((np_, op), out_dtype),
        grid=(nblk, nblk),
        in_specs=[
            pl.BlockSpec(memory_space=pltpu.MemorySpace.SMEM),  # eps (scalar)
            pl.BlockSpec((tn, tn), lambda i, k: (i, k)),        # A block
            pl.BlockSpec((tn, fp), lambda i, k: (k, 0)),        # x (contraction)
            pl.BlockSpec((fp, hp), lambda i, k: (0, 0)),        # W_a
            pl.BlockSpec((1, hp), lambda i, k: (0, 0)),         # b_a
            pl.BlockSpec((hp, op), lambda i, k: (0, 0)),        # W_b
        ],
        out_specs=pl.BlockSpec((tn, op), lambda i, k: (i, 0)),
        scratch_shapes=[pltpu.VMEM((tn, fp), jnp.float32)],
        compiler_params=pltpu.CompilerParams(
            dimension_semantics=("parallel", "arbitrary"),
        ),
    )(eps, adj_i8, x_bf16, wa, ba, wb)


def cit_gin_forward(x, edge_index, params, *, tn=512):
    """Full CitGIN forward (eval mode: dropout == identity)."""
    n, f = x.shape
    h_dim = params["w1"].shape[1]
    c = params["w4"].shape[1]

    # Pad node count to the tile and feature dims to 128 lanes.
    np_ = _round_up(max(n, tn), tn)
    fp = _round_up(f, 128)
    hp = _round_up(h_dim, 128)
    cp = _round_up(c, 128)

    # Dense adjacency A[i, j] = #edges j -> i, stored int8 in HBM (exact for
    # edge multiplicities <= 127; citation graphs are 0/1).  int8 halves the
    # dominant HBM stream of the aggregation matmul on every generation.
    # TODO(synk): cache A across forward passes and/or replace the O(N^2)
    # dense aggregation with a CSR / segment-sum gather path (scalar-prefetch
    # row pointers) for real Cit* graph sizes; on v7x an fp8(e4m3) A could
    # feed the MXU directly.
    src, dst = edge_index[0], edge_index[1]
    adj = (jnp.zeros((np_, np_), jnp.int32)
           .at[dst, src].add(1)
           .astype(jnp.int8))

    x_pad = (jnp.zeros((np_, fp), jnp.bfloat16)
             .at[:n, :f].set(x.astype(jnp.bfloat16)))

    # Fold BatchNorm1d (eval mode, running stats) into the first Linear.
    scale = params["bn_gamma"] * jax.lax.rsqrt(params["bn_var"] + 1e-5)  # (1,H)
    w1_folded = params["w1"] * scale                                     # (F,H)
    b1_folded = params["bn_beta"] - params["bn_mean"] * scale            # (1,H)

    def pad_w(w, rows, cols):
        r, cdim = w.shape
        return (jnp.zeros((rows, cols), jnp.bfloat16)
                .at[:r, :cdim].set(w.astype(jnp.bfloat16)))

    w1p = pad_w(w1_folded, fp, hp)
    w2p = pad_w(params["w2"], hp, hp)
    w3p = pad_w(params["w3"], hp, hp)
    w4p = pad_w(params["w4"], hp, cp)
    b1p = jnp.zeros((1, hp), jnp.float32).at[:, :h_dim].set(b1_folded)
    zero_b = jnp.zeros((1, hp), jnp.float32)

    # F.dropout(p=0.5, training=False) -> identity.
    h1 = gin_conv(params["eps1"], adj, x_pad, w1p, b1p, w2p,
                  tn=tn, out_dtype=jnp.bfloat16)          # (Np, Hp) bf16
    # F.dropout(p=0.5, training=False) -> identity.
    out = gin_conv(params["eps2"], adj, h1, w3p, zero_b, w4p,
                   tn=tn, out_dtype=jnp.float32)          # (Np, Cp) f32
    return out[:n, :c]


def _reference_forward(x, edge_index, params):
    """Pure-JAX f32 reference matching the eval-mode PyTorch module."""
    n = x.shape[0]
    src, dst = edge_index[0], edge_index[1]
    adj = jnp.zeros((n, n), jnp.float32).at[dst, src].add(1.0)

    h = adj @ x + (1.0 + params["eps1"][0]) * x
    z = h @ params["w1"]
    z = ((z - params["bn_mean"]) * jax.lax.rsqrt(params["bn_var"] + 1e-5)
         * params["bn_gamma"] + params["bn_beta"])
    z = jnp.maximum(z, 0.0)
    h1 = jnp.maximum(z @ params["w2"], 0.0)

    h = adj @ h1 + (1.0 + params["eps2"][0]) * h1
    z = jnp.maximum(h @ params["w3"], 0.0)
    return jnp.maximum(z @ params["w4"], 0.0)


if __name__ == "__main__":
    # Small synthetic "Cit*" graph: N nodes, F input features, H hidden, C classes.
    N, F, H, C, E = 64, 16, 32, 8, 256

    key = jax.random.PRNGKey(0)
    kx, ke1, ke2, kw1, kw2, kw3, kw4 = jax.random.split(key, 7)

    x = jax.random.normal(kx, (N, F), jnp.float32)
    src = jax.random.randint(ke1, (E,), 0, N)
    dst = jax.random.randint(ke2, (E,), 0, N)
    edge_index = jnp.stack([src, dst], axis=0)            # [2, E]: row0=src, row1=dst

    def kaiming_uniform(k, fan_in, shape):
        bound = (6.0 / fan_in) ** 0.5
        return jax.random.uniform(k, shape, jnp.float32, -bound, bound)

    params = {
        # GINConv train_eps=True, initial eps = 0.0 (PyG default init)
        "eps1": jnp.array([0.0], jnp.float32),
        "eps2": jnp.array([0.0], jnp.float32),
        # conv1 MLP: Linear(F, H) -> BN(H) -> ReLU -> Linear(H, H) -> ReLU
        "w1": kaiming_uniform(kw1, F, (F, H)),
        "bn_gamma": jnp.ones((1, H), jnp.float32),
        "bn_beta": jnp.zeros((1, H), jnp.float32),
        "bn_mean": jnp.zeros((1, H), jnp.float32),
        "bn_var": jnp.ones((1, H), jnp.float32),
        "w2": kaiming_uniform(kw2, H, (H, H)),
        # conv2 MLP: Linear(H, H) -> ReLU -> Linear(H, C) -> ReLU
        "w3": kaiming_uniform(kw3, H, (H, H)),
        "w4": kaiming_uniform(kw4, H, (H, C)),
    }

    out = cit_gin_forward(x, edge_index, params)
    out = jax.block_until_ready(out)
    assert out.shape == (N, C) and out.dtype == jnp.float32

    # Loose tolerance: adjacency/features/weights travel in int8/bf16 with f32
    # accumulation on the MXU.
    ref = _reference_forward(x, edge_index, params)
    rel_err = jnp.linalg.norm(out - ref) / jnp.maximum(jnp.linalg.norm(ref), 1e-6)
    assert float(rel_err) < 5e-2, f"relative error too large: {float(rel_err)}"

    print("KERNEL_OK")
</pallas_src>

<mosaic_0001>
module attributes {stable_mosaic.version = 11 : i64} {
  func.func @_gin_conv_kernel(%arg0: i32, %arg1: i32, %arg2: memref<1xf32, #tpu.memory_space<smem>>, %arg3: memref<512x512xi8, #tpu.memory_space<vmem>>, %arg4: memref<512x128xbf16, #tpu.memory_space<vmem>>, %arg5: memref<128x128xbf16, #tpu.memory_space<vmem>>, %arg6: memref<1x128xf32, #tpu.memory_space<vmem>>, %arg7: memref<128x128xbf16, #tpu.memory_space<vmem>>, %arg8: memref<512x128xbf16, #tpu.memory_space<vmem>>, %arg9: memref<512x128xf32, #tpu.memory_space<vmem>>) attributes {dimension_semantics = [#tpu.dimension_semantics<parallel>, #tpu.dimension_semantics<arbitrary>], iteration_bounds = array<i64: 1, 1>, scalar_prefetch = 0 : i64, scratch_operands = 1 : i64, tpu.core_type = #tpu.core_type<tc>, window_params = [{transform_indices = @transform_0, window_bounds = array<i64: 1>}, {transform_indices = @transform_1, window_bounds = array<i64: 512, 512>}, {transform_indices = @transform_2, window_bounds = array<i64: 512, 128>}, {pipeline_mode = #tpu.pipeline_mode<synchronous>, transform_indices = @transform_3, window_bounds = array<i64: 128, 128>}, {pipeline_mode = #tpu.pipeline_mode<synchronous>, transform_indices = @transform_4, window_bounds = array<i64: 1, 128>}, {pipeline_mode = #tpu.pipeline_mode<synchronous>, transform_indices = @transform_5, window_bounds = array<i64: 128, 128>}, {transform_indices = @transform_6, window_bounds = array<i64: 512, 128>}]} {
    %c0_i32 = arith.constant 0 : i32
    %0 = arith.cmpi eq, %arg1, %c0_i32 : i32
    %1 = arith.extui %0 : i1 to i32
    %c0_i32_0 = arith.constant 0 : i32
    %2 = arith.cmpi ne, %1, %c0_i32_0 : i32
    scf.if %2 {
      %cst_11 = arith.constant 0.000000e+00 : f32
      %16 = vector.broadcast %cst_11 : f32 to vector<512x128xf32>
      %c0_12 = arith.constant 0 : index
      %c0_13 = arith.constant 0 : index
      %17 = vector.load %arg9[%c0_12, %c0_13] : memref<512x128xf32, #tpu.memory_space<vmem>>, vector<512x128xf32>
      tpu.vector_store %arg9[%c0_12, %c0_13], %16 {strides = array<i32>} : memref<512x128xf32, #tpu.memory_space<vmem>>, vector<512x128xf32>,
    } else {
    }
    %c0 = arith.constant 0 : index
    %c0_1 = arith.constant 0 : index
    %3 = vector.load %arg3[%c0, %c0_1] : memref<512x512xi8, #tpu.memory_space<vmem>>, vector<512x512xi8>
    %4 = arith.sitofp %3 : vector<512x512xi8> to vector<512x512xbf16>
    %c0_2 = arith.constant 0 : index
    %c0_3 = arith.constant 0 : index
    %5 = vector.load %arg9[%c0_2, %c0_3] : memref<512x128xf32, #tpu.memory_space<vmem>>, vector<512x128xf32>
    %c0_4 = arith.constant 0 : index
    %c0_5 = arith.constant 0 : index
    %6 = vector.load %arg4[%c0_4, %c0_5] : memref<512x128xbf16, #tpu.memory_space<vmem>>, vector<512x128xbf16>
    %cst = arith.constant dense<0.000000e+00> : vector<512x128xf32>
    %7 = tpu.matmul %4, %6, %cst {dimension_numbers = #tpu.dot_dimension_numbers<[1], [0], [0], [1], [0, 0, 1, 1], [], []>} : vector<512x512xbf16>, vector<512x128xbf16>, vector<512x128xf32> -> vector<512x128xf32>
    %8 = arith.addf %5, %7 : vector<512x128xf32>
    %c0_6 = arith.constant 0 : index
    %c0_7 = arith.constant 0 : index
    %9 = vector.load %arg9[%c0_6, %c0_7] : memref<512x128xf32, #tpu.memory_space<vmem>>, vector<512x128xf32>
    tpu.vector_store %arg9[%c0_6, %c0_7], %8 {strides = array<i32>} : memref<512x128xf32, #tpu.memory_space<vmem>>, vector<512x128xf32>,
    %10 = arith.cmpi eq, %arg1, %arg0 : i32
    %11 = arith.extui %10 : i1 to i32
    %c0_i32_8 = arith.constant 0 : i32
    %12 = arith.cmpi ne, %11, %c0_i32_8 : i32
    scf.if %12 {
      %c0_11 = arith.constant 0 : index
      %c0_12 = arith.constant 0 : index
      %16 = vector.load %arg9[%c0_11, %c0_12] : memref<512x128xf32, #tpu.memory_space<vmem>>, vector<512x128xf32>
      %c0_13 = arith.constant 0 : index
      %17 = memref.load %arg2[%c0_13] : memref<1xf32, #tpu.memory_space<smem>>
      %cst_14 = arith.constant 1.000000e+00 : f32
      %18 = arith.addf %cst_14, %17 : f32
      %c0_15 = arith.constant 0 : index
      %c0_16 = arith.constant 0 : index
      %19 = vector.load %arg4[%c0_15, %c0_16] : memref<512x128xbf16, #tpu.memory_space<vmem>>, vector<512x128xbf16>
      %20 = arith.extf %19 : vector<512x128xbf16> to vector<512x128xf32>
      %21 = vector.broadcast %18 : f32 to vector<512x128xf32>
      %22 = arith.mulf %21, %20 : vector<512x128xf32>
      %23 = arith.addf %16, %22 : vector<512x128xf32>
      %c0_17 = arith.constant 0 : index
      %c0_18 = arith.constant 0 : index
      %24 = vector.load %arg9[%c0_17, %c0_18] : memref<512x128xf32, #tpu.memory_space<vmem>>, vector<512x128xf32>
      tpu.vector_store %arg9[%c0_17, %c0_18], %23 {strides = array<i32>} : memref<512x128xf32, #tpu.memory_space<vmem>>, vector<512x128xf32>,
    } else {
    }
    %c0_i32_9 = arith.constant 0 : i32
    %13 = arith.cmpi eq, %arg1, %c0_i32_9 : i32
    %14 = arith.extui %13 : i1 to i32
    %c0_i32_10 = arith.constant 0 : i32
    %15 = arith.cmpi ne, %14, %c0_i32_10 : i32
    scf.if %15 {
      %c0_11 = arith.constant 0 : index
      %c0_12 = arith.constant 0 : index
      %16 = vector.load %arg9[%c0_11, %c0_12] : memref<512x128xf32, #tpu.memory_space<vmem>>, vector<512x128xf32>
      %17 = arith.truncf %16 : vector<512x128xf32> to vector<512x128xbf16>
      %c0_13 = arith.constant 0 : index
      %c0_14 = arith.constant 0 : index
      %18 = vector.load %arg5[%c0_13, %c0_14] : memref<128x128xbf16, #tpu.memory_space<vmem>>, vector<128x128xbf16>
      %cst_15 = arith.constant dense<0.000000e+00> : vector<512x128xf32>
      %19 = tpu.matmul %17, %18, %cst_15 {dimension_numbers = #tpu.dot_dimension_numbers<[1], [0], [0], [1], [0, 0, 1, 1], [], []>} : vector<512x128xbf16>, vector<128x128xbf16>, vector<512x128xf32> -> vector<512x128xf32>
      %c0_16 = arith.constant 0 : index
      %c0_17 = arith.constant 0 : index
      %20 = vector.load %arg6[%c0_16, %c0_17] : memref<1x128xf32, #tpu.memory_space<vmem>>, vector<1x128xf32>
      %21 = vector.broadcast %20 : vector<1x128xf32> to vector<512x128xf32>
      %22 = arith.addf %19, %21 : vector<512x128xf32>
      %cst_18 = arith.constant 0.000000e+00 : f32
      %23 = vector.broadcast %cst_18 : f32 to vector<512x128xf32>
      %24 = arith.maximumf %22, %23 : vector<512x128xf32>
      %25 = arith.truncf %24 : vector<512x128xf32> to vector<512x128xbf16>
      %c0_19 = arith.constant 0 : index
      %c0_20 = arith.constant 0 : index
      %26 = vector.load %arg7[%c0_19, %c0_20] : memref<128x128xbf16, #tpu.memory_space<vmem>>, vector<128x128xbf16>
      %cst_21 = arith.constant dense<0.000000e+00> : vector<512x128xf32>
      %27 = tpu.matmul %25, %26, %cst_21 {dimension_numbers = #tpu.dot_dimension_numbers<[1], [0], [0], [1], [0, 0, 1, 1], [], []>} : vector<512x128xbf16>, vector<128x128xbf16>, vector<512x128xf32> -> vector<512x128xf32>
      %cst_22 = arith.constant 0.000000e+00 : f32
      %28 = vector.broadcast %cst_22 : f32 to vector<512x128xf32>
      %29 = arith.maximumf %27, %28 : vector<512x128xf32>
      %30 = arith.truncf %29 : vector<512x128xf32> to vector<512x128xbf16>
      %c0_23 = arith.constant 0 : index
      %c0_24 = arith.constant 0 : index
      %31 = vector.load %arg8[%c0_23, %c0_24] : memref<512x128xbf16, #tpu.memory_space<vmem>>, vector<512x128xbf16>
      tpu.vector_store %arg8[%c0_23, %c0_24], %30 {strides = array<i32>} : memref<512x128xbf16, #tpu.memory_space<vmem>>, vector<512x128xbf16>,
    } else {
    }
    return
  }
  func.func @transform_0(%arg0: i32, %arg1: i32) -> i32 {
    %c0_i32 = arith.constant 0 : i32
    %c0_i32_0 = arith.constant 0 : i32
    return %c0_i32 : i32
  }
  func.func @transform_1(%arg0: i32, %arg1: i32) -> (i32, i32) {
    %c0_i32 = arith.constant 0 : i32
    return %arg0, %arg1 : i32, i32
  }
  func.func @transform_2(%arg0: i32, %arg1: i32) -> (i32, i32) {
    %c0_i32 = arith.constant 0 : i32
    %c0_i32_0 = arith.constant 0 : i32
    return %arg1, %c0_i32 : i32, i32
  }
  func.func @transform_3(%arg0: i32, %arg1: i32) -> (i32, i32) {
    %c0_i32 = arith.constant 0 : i32
    %c0_i32_0 = arith.constant 0 : i32
    %c0_i32_1 = arith.constant 0 : i32
    return %c0_i32, %c0_i32_0 : i32, i32
  }
  func.func @transform_4(%arg0: i32, %arg1: i32) -> (i32, i32) {
    %c0_i32 = arith.constant 0 : i32
    %c0_i32_0 = arith.constant 0 : i32
    %c0_i32_1 = arith.constant 0 : i32
    return %c0_i32, %c0_i32_0 : i32, i32
  }
  func.func @transform_5(%arg0: i32, %arg1: i32) -> (i32, i32) {
    %c0_i32 = arith.constant 0 : i32
    %c0_i32_0 = arith.constant 0 : i32
    %c0_i32_1 = arith.constant 0 : i32
    return %c0_i32, %c0_i32_0 : i32, i32
  }
  func.func @transform_6(%arg0: i32, %arg1: i32) -> (i32, i32) {
    %c0_i32 = arith.constant 0 : i32
    %c0_i32_0 = arith.constant 0 : i32
    return %arg0, %c0_i32 : i32, i32
  }
}

</mosaic_0001>

<bundles_post_ra>
// kernel: tpu_custom_call.1
= control target key start
LH: loop header
LB: loop body
LE: loop exit
PB: predicated region body
PF: predicated region fallthrough
CT: control target
= control target key end

     0   :  { %12 = vsyncpa [#allocation5], 0  ;;  %s4470_s0 = inlined_call_operand.<no memory space> [shape: f32[1], index: 0, kind: input, shape index: {}]   ;;  %s4471_s1 = inlined_call_operand.hbm [shape: s8[512,512], index: 1, kind: input, shape index: {}]   ;;  %s4472_s2 = inlined_call_operand.hbm [shape: bf16[512,128], index: 2, kind: input, shape index: {}]   ;;  %s4473_s3 = inlined_call_operand.hbm [shape: bf16[128,128], index: 3, kind: input, shape index: {}]   ;;  %s4474_s4 = inlined_call_operand.vmem [shape: f32[1,128], index: 4, kind: input, shape index: {}]   ;;  %s4475_s5 = inlined_call_operand.hbm [shape: bf16[128,128], index: 5, kind: input, shape index: {}]   ;;  %s4476_s6 = inlined_call_operand.hbm [shape: bf16[512,128], index: 6, kind: output, shape index: {}]  }
   0x1   :  { %13 = vsyncpa [#allocation8], 0 }
   0x2   :  { %14 = vsyncpa [#allocation11], 0  ;;  %s35_s23 = sshll.u32 %s4472_s2, 4  ;;  %s36_s23 = int_to_ptr.hbm [resolvable:$true] %s35_s23 }
   0x3   :  { %15 = vsyncpa [#allocation6], 0  ;;  %s3998_s24 = smov [#allocation7]   ;;  %s22_s28 = sshll.u32 %s4471_s1, 4  ;;  %s23_s28 = int_to_ptr.hbm [resolvable:$true] %s22_s28 }
   0x4   :  { %s37_s25 = sshll.u32 %s3998_s24, 4  ;;  %s3999_s29 = smov 64   ;;  %s38_s25 = int_to_ptr.vmem [resolvable:$true] %s37_s25 }
   0x5   :  { %s4000_s30 = smov 4   ;;  %s4001_s7 = smov [#allocation4]  }
   0x6   :  { %43 = dma.hbm_to_vmem [thread:$0]  %s36_s23, 4096, %s38_s25, [#allocation8], %s3999_s29, %s3999_s29, %s4000_s30  }
   0x7   :  { %s24_s8 = sshll.u32 %s4001_s7, 4  ;;  %s4002_s2 = smov 512   ;;  %s25_s8 = int_to_ptr.vmem [resolvable:$true] %s24_s8 }
   0x8   :  { %s4003_s9 = smov 32   ;;  %s48_s12 = sshll.u32 %s4473_s3, 4  ;;  %s49_s12 = int_to_ptr.hbm [resolvable:$true] %s48_s12 }
   0x9   :  { %30 = dma.hbm_to_vmem [thread:$0]  %s23_s28, 8192, %s25_s8, [#allocation5], %s4002_s2, %s4002_s2, %s4003_s9  }
   0xa   :  { %s4004_s13 = smov [#allocation9]   ;;  %s63_s16 = sshll.u32 %s4475_s5, 4  ;;  %s64_s16 = int_to_ptr.hbm [resolvable:$true] %s63_s16 }
   0xb   :  { %s50_s1 = sshll.u32 %s4004_s13, 4  ;;  %s4005_s17 = smov [#allocation10]   ;;  %s51_s1 = int_to_ptr.vmem [resolvable:$true] %s50_s1 }
   0xc   :  { %56 = dma.hbm_to_vmem [thread:$0]  %s49_s12, 1024, %s51_s1, [#allocation8], %s3999_s29, %s3999_s29, %s4000_s30  }
   0xd   :  { %s65_s18 = sshll.u32 %s4005_s17, 4  ;;  %s66_s18 = int_to_ptr.vmem [resolvable:$true] %s65_s18 }
   0xe   :  { %71 = dma.hbm_to_vmem [thread:$0]  %s64_s16, 1024, %s66_s18, [#allocation11], %s3999_s29, %s3999_s29, %s4000_s30  }
   0xf   :  { %3990 = dma.done.wait [#allocation5], 8192  }
  0x10   :  { %3991 = vsyncadd [#allocation5], 4294959104 }
  0x11   :  { %3992 = dma.done.wait [#allocation8], 5120  }
  0x12   :  { %3993 = vsyncadd [#allocation8], 4294962176 }
  0x13   :  { %3994 = dma.done.wait [#allocation11], 1024  }
  0x14   :  { %3995 = vsyncadd [#allocation11], 4294966272  ;;  %v3452_v0 = vld [vmem:[#allocation7 + $0x38] sm:$0xff]  ;;  %v3451_v2 = vld [vmem:[#allocation7 + $0x30] sm:$0xff]  ;;  %s2053_s19 = sadd.f32 1.0, %s4470_s0  ;;  %s3238_s26 = sshll.u32 %s4476_s6, 4  ;;  %s3239_s26 = int_to_ptr.hbm [resolvable:$true] %s3238_s26 }
  0x15   :  { %v3460_v1 = vld [vmem:[#allocation7 + $0x78] sm:$0xff]  ;;  %3843 = vmatpush.bf16.msra.mxu2 %v3452_v0  ;;  %v3459_v3 = vld [vmem:[#allocation7 + $0x70] sm:$0xff]  ;;  %1180 = vmatpush.bf16.msra.mxu0 %v3452_v0  ;;  %v3450_v4 = vld [vmem:[#allocation7 + $0x28] sm:$0xff] }
  0x16   :  { %3851 = vmatpush.bf16.msra.mxu3 %v3460_v1  ;;  %1349 = vmatpush.bf16.msra.mxu1 %v3460_v1  ;;  %v3458_v5 = vld [vmem:[#allocation7 + $0x68] sm:$0xff]  ;;  %v3449_v6 = vld [vmem:[#allocation7 + $0x20] sm:$0xff]  ;;  %v3448_v8 = vld [vmem:[#allocation7 + $0x18] sm:$0xff] }
  0x17   :  { %v3457_v7 = vld [vmem:[#allocation7 + $0x60] sm:$0xff]  ;;  %v3456_v9 = vld [vmem:[#allocation7 + $0x58] sm:$0xff]  ;;  %v3447_v10 = vld [vmem:[#allocation7 + $0x10] sm:$0xff] }
  0x18   :  { %v3455_v11 = vld [vmem:[#allocation7 + $0x50] sm:$0xff]  ;;  %v188_v12 = vld [vmem:[#allocation4 + $0x100] sm:$0xff]  ;;  %v189_v13 = vld [vmem:[#allocation4 + $0x108] sm:$0xff] }
  0x19   :  { %3844 = vmatpush.bf16.msra.mxu2 %v3451_v2  ;;  %1181 = vmatpush.bf16.msra.mxu0 %v3451_v2  ;;  %v348_v14 = vunpack.c.0.s8 %v188_v12  ;;  %v352_v15 = vunpack.c.1.s8 %v188_v12  ;;  %v349_v16 = vunpack.c.0.s8 %v189_v13  ;;  %v353_v17 = vunpack.c.1.s8 %v189_v13  ;;  %v3446_v18 = vld [vmem:[#allocation7 + $0x8] sm:$0xff]  ;;  %v3445_v24 = vld [vmem:[#allocation7] sm:$0xff]  ;;  %v3468_v26 = vld [vmem:[#allocation7 + $0xb8] sm:$0xff] }
  0x1a   :  { %3852 = vmatpush.bf16.msra.mxu3 %v3459_v3  ;;  %1350 = vmatpush.bf16.msra.mxu1 %v3459_v3  ;;  %v3454_v19 = vld [vmem:[#allocation7 + $0x48] sm:$0xff]  ;;  %v3453_v25 = vld [vmem:[#allocation7 + $0x40] sm:$0xff]  ;;  %v3476_v27 = vld [vmem:[#allocation7 + $0xf8] sm:$0xff]  ;;  %v356_v32 = vunpack.c.2.s8 %v188_v12  ;;  %v360_v33 = vunpack.c.3.s8 %v188_v12  ;;  %v357_v34 = vunpack.c.2.s8 %v189_v13  ;;  %v361_v35 = vunpack.c.3.s8 %v189_v13 }
  0x1b   :  { %v604_v20 = vcvt.s32.f32 %v348_v14  ;;  %v608_v21 = vcvt.s32.f32 %v352_v15  ;;  %v605_v22 = vcvt.s32.f32 %v349_v16  ;;  %v609_v23 = vcvt.s32.f32 %v353_v17  ;;  %v3467_v30 = vld [vmem:[#allocation7 + $0xb0] sm:$0xff]  ;;  %v192_v42 = vld [vmem:[#allocation4 + $0x120] sm:$0xff]  ;;  %v193_v43 = vld [vmem:[#allocation4 + $0x128] sm:$0xff] }
  0x1c   :  { %v3475_v31 = vld [vmem:[#allocation7 + $0xf0] sm:$0xff]  ;;  %v612_v36 = vcvt.s32.f32 %v356_v32  ;;  %v616_v37 = vcvt.s32.f32 %v360_v33  ;;  %v613_v38 = vcvt.s32.f32 %v357_v34  ;;  %v617_v39 = vcvt.s32.f32 %v361_v35  ;;  %v3466_v54 = vld [vmem:[#allocation7 + $0xa8] sm:$0xff]  ;;  %v196_v2 = vld [vmem:[#allocation4 + $0x140] sm:$0xff] }
  0x1d   :  { %3845 = vmatpush.bf16.msra.mxu2 %v3450_v4  ;;  %1182 = vmatpush.bf16.msra.mxu0 %v3450_v4  ;;  %v796_v28 = vpack.c.bf16 %v608_v21, %v604_v20  ;;  %v797_v29 = vpack.c.bf16 %v609_v23, %v605_v22  ;;  %v364_v44 = vunpack.c.0.s8 %v192_v42  ;;  %v368_v45 = vunpack.c.1.s8 %v192_v42  ;;  %v3474_v55 = vld [vmem:[#allocation7 + $0xe8] sm:$0xff]  ;;  %v3465_v14 = vld [vmem:[#allocation7 + $0xa0] sm:$0xff] }
  0x1e   :  { %3853 = vmatpush.bf16.msra.mxu3 %v3458_v5  ;;  %1351 = vmatpush.bf16.msra.mxu1 %v3458_v5  ;;  %v800_v40 = vpack.c.bf16 %v616_v37, %v612_v36  ;;  %v801_v41 = vpack.c.bf16 %v617_v39, %v613_v38  ;;  %v365_v46 = vunpack.c.0.s8 %v193_v43  ;;  %v369_v47 = vunpack.c.1.s8 %v193_v43  ;;  %v197_v3 = vld [vmem:[#allocation4 + $0x148] sm:$0xff]  ;;  %v3473_v15 = vld [vmem:[#allocation7 + $0xe0] sm:$0xff]  ;;  %v3464_v38 = vld [vmem:[#allocation7 + $0x98] sm:$0xff] }
  0x1f   :  { %v620_v48 = vcvt.s32.f32 %v364_v44  ;;  %v624_v49 = vcvt.s32.f32 %v368_v45  ;;  %v372_v56 = vunpack.c.2.s8 %v192_v42  ;;  %v376_v57 = vunpack.c.3.s8 %v192_v42  ;;  %v3472_v39 = vld [vmem:[#allocation7 + $0xd8] sm:$0xff]  ;;  %v156_v44 = vld [vmem:[#allocation4] sm:$0xff]  ;;  %v157_v45 = vld [vmem:[#allocation4 + $0x8] sm:$0xff] }
  0x20   :  { %v621_v50 = vcvt.s32.f32 %v365_v46  ;;  %v625_v51 = vcvt.s32.f32 %v369_v47  ;;  %v373_v58 = vunpack.c.2.s8 %v193_v43  ;;  %v377_v59 = vunpack.c.3.s8 %v193_v43 }
  0x21   :  { %3846 = vmatpush.bf16.msra.mxu2 %v3449_v6  ;;  %1183 = vmatpush.bf16.msra.mxu0 %v3449_v6  ;;  %v804_v52 = vpack.c.bf16 %v624_v49, %v620_v48  ;;  %v628_v60 = vcvt.s32.f32 %v372_v56  ;;  %v632_v61 = vcvt.s32.f32 %v376_v57  ;;  %v380_v4 = vunpack.c.0.s8 %v196_v2 }
  0x22   :  { %3854 = vmatpush.bf16.msra.mxu3 %v3457_v7  ;;  %1352 = vmatpush.bf16.msra.mxu1 %v3457_v7  ;;  %v805_v53 = vpack.c.bf16 %v625_v51, %v621_v50  ;;  %v629_v62 = vcvt.s32.f32 %v373_v58  ;;  %v633_v63 = vcvt.s32.f32 %v377_v59  ;;  %v384_v5 = vunpack.c.1.s8 %v196_v2 }
  0x23   :  { %v808_v0 = vpack.c.bf16 %v632_v61, %v628_v60  ;;  %v381_v6 = vunpack.c.0.s8 %v197_v3  ;;  %v385_v7 = vunpack.c.1.s8 %v197_v3  ;;  %v388_v16 = vunpack.c.2.s8 %v196_v2 }
  0x24   :  { %v809_v1 = vpack.c.bf16 %v633_v63, %v629_v62  ;;  %v392_v17 = vunpack.c.3.s8 %v196_v2  ;;  %v220_v46 = vunpack.c.0.s8 %v156_v44  ;;  %v224_v47 = vunpack.c.1.s8 %v156_v44  ;;  %v204_v62 = vld [vmem:[#allocation4 + $0x180] sm:$0xff]  ;;  %v205_v63 = vld [vmem:[#allocation4 + $0x188] sm:$0xff] }
  0x25   :  { %3847 = vmatpush.bf16.msra.mxu2 %v3448_v8  ;;  %1184 = vmatpush.bf16.msra.mxu0 %v3448_v8  ;;  %v636_v8 = vcvt.s32.f32 %v380_v4  ;;  %v644_v20 = vcvt.s32.f32 %v388_v16  ;;  %v221_v48 = vunpack.c.0.s8 %v157_v45  ;;  %v225_v49 = vunpack.c.1.s8 %v157_v45  ;;  %v3484_v4 = vld [vmem:[#allocation9 + $0x38] sm:$0xff] }
  0x26   :  { %3855 = vmatpush.bf16.msra.mxu3 %v3456_v9  ;;  %1353 = vmatpush.bf16.msra.mxu1 %v3456_v9  ;;  %v640_v9 = vcvt.s32.f32 %v384_v5  ;;  %v648_v21 = vcvt.s32.f32 %v392_v17  ;;  %v413_v2 = vunpack.c.0.s8 %v205_v63  ;;  %v228_v5 = vunpack.c.2.s8 %v156_v44 }
  0x27   :  { %v477_v56 = vcvt.s32.f32 %v221_v48  ;;  %v481_v57 = vcvt.s32.f32 %v225_v49 }
  0x28   :  { %v812_v12 = vpack.c.bf16 %v640_v9, %v636_v8  ;;  %v233_v8 = vunpack.c.3.s8 %v157_v45 }
  0x29   :  { %3848 = vmatpush.bf16.msra.mxu2 %v3447_v10  ;;  %1185 = vmatpush.bf16.msra.mxu0 %v3447_v10  ;;  %v637_v10 = vcvt.s32.f32 %v381_v6  ;;  %v733_v59 = vpack.c.bf16 %v481_v57, %v477_v56  ;;  %v232_v6 = vunpack.c.3.s8 %v156_v44 }
  0x2a   :  { %3856 = vmatpush.bf16.msra.mxu3 %v3455_v11  ;;  %1354 = vmatpush.bf16.msra.mxu1 %v3455_v11  ;;  %v641_v11 = vcvt.s32.f32 %v385_v7  ;;  %v229_v7 = vunpack.c.2.s8 %v157_v45  ;;  %v489_v16 = vcvt.s32.f32 %v233_v8 }
  0x2c   :  { %v813_v13 = vpack.c.bf16 %v641_v11, %v637_v10  ;;  %v669_v11 = vcvt.s32.f32 %v413_v2 }
  0x2d   :  { %3849 = vmatpush.bf16.msra.mxu2 %v3446_v18  ;;  %1186 = vmatpush.bf16.msra.mxu0 %v3446_v18  ;;  %v389_v18 = vunpack.c.2.s8 %v197_v3 }
  0x2e   :  { %3857 = vmatpush.bf16.msra.mxu3 %v3454_v19  ;;  %1355 = vmatpush.bf16.msra.mxu1 %v3454_v19  ;;  %v393_v19 = vunpack.c.3.s8 %v197_v3  ;;  %v417_v3 = vunpack.c.1.s8 %v205_v63 }
  0x2f   :  { %v645_v22 = vcvt.s32.f32 %v389_v18 }
  0x30   :  { %v649_v23 = vcvt.s32.f32 %v393_v19 }
  0x31   :  { %3850 = vmatpush.bf16.msra.mxu2 %v3445_v24  ;;  %1187 = vmatpush.bf16.msra.mxu0 %v3445_v24  ;;  %v816_v24 = vpack.c.bf16 %v648_v21, %v644_v20  ;;  %v3463_v21 = vld [vmem:[#allocation7 + $0x90] sm:$0xff] }
  0x32   :  { %3858 = vmatpush.bf16.msra.mxu3 %v3453_v25  ;;  %1356 = vmatpush.bf16.msra.mxu1 %v3453_v25  ;;  %v817_v25 = vpack.c.bf16 %v649_v23, %v645_v22  ;;  %v3471_v22 = vld [vmem:[#allocation7 + $0xd0] sm:$0xff] }
  0x34   :  { %1268 = vmatmul.bf16.vlgmr.msra.gmra.mxu2 %v796_v28 }
  0x35   :  { %1518 = vmatpush.bf16.msrb.mxu2 %v3468_v26  ;;  %1437 = vmatmul.bf16.vlgmr.msra.gmra.mxu3 %v797_v29  ;;  %v200_v26 = vld [vmem:[#allocation4 + $0x160] sm:$0xff] }
  0x36   :  { %1687 = vmatpush.bf16.msrb.mxu3 %v3476_v27  ;;  %v201_v27 = vld [vmem:[#allocation4 + $0x168] sm:$0xff]  ;;  %v396_v28 = vunpack.c.0.s8 %v200_v26  ;;  %v400_v29 = vunpack.c.1.s8 %v200_v26  ;;  %1357 = vmatmul.bf16.vlgmr.msra.gmra.mxu1 %v733_v59 }
  0x37   :  { %v405_v42 = vunpack.c.2.s8 %v201_v27  ;;  %v409_v43 = vunpack.c.3.s8 %v201_v27  ;;  %2542 = vmatpush.bf16.msrb.mxu0 %v3484_v4 }
  0x38   :  { %v652_v32 = vcvt.s32.f32 %v396_v28  ;;  %v656_v33 = vcvt.s32.f32 %v400_v29  ;;  %v425_v28 = vunpack.c.3.s8 %v205_v63 }
  0x39   :  { %1519 = vmatpush.bf16.msrb.mxu2 %v3467_v30  ;;  %v397_v30 = vunpack.c.0.s8 %v201_v27 }
  0x3a   :  { %1688 = vmatpush.bf16.msrb.mxu3 %v3475_v31  ;;  %v401_v31 = vunpack.c.1.s8 %v201_v27  ;;  %v820_v36 = vpack.c.bf16 %v656_v33, %v652_v32  ;;  %v421_v27 = vunpack.c.2.s8 %v205_v63 }
  0x3b   :  { %v653_v34 = vcvt.s32.f32 %v397_v30  ;;  %v160_v30 = vld [vmem:[#allocation4 + $0x20] sm:$0xff] }
  0x3c   :  { %v657_v35 = vcvt.s32.f32 %v401_v31  ;;  %v161_v31 = vld [vmem:[#allocation4 + $0x28] sm:$0xff]  ;;  %v236_v32 = vunpack.c.0.s8 %v160_v30  ;;  %v240_v33 = vunpack.c.1.s8 %v160_v30 }
  0x3d   :  { %1520 = vmatpush.bf16.msrb.mxu2 %v3466_v54  ;;  %v476_v54 = vcvt.s32.f32 %v220_v46  ;;  %v245_v63 = vunpack.c.2.s8 %v161_v31 }
  0x3e   :  { %1689 = vmatpush.bf16.msrb.mxu3 %v3474_v55  ;;  %v821_v37 = vpack.c.bf16 %v657_v35, %v653_v34  ;;  %v480_v55 = vcvt.s32.f32 %v224_v47  ;;  %v237_v34 = vunpack.c.0.s8 %v161_v31  ;;  %v241_v35 = vunpack.c.1.s8 %v161_v31 }
  0x40   :  { %v732_v58 = vpack.c.bf16 %v480_v55, %v476_v54 }
  0x41   :  { %1521 = vmatpush.bf16.msrb.mxu2 %v3465_v14  ;;  %v488_v14 = vcvt.s32.f32 %v232_v6 }
  0x42   :  { %1690 = vmatpush.bf16.msrb.mxu3 %v3473_v15  ;;  %1188 = vmatmul.bf16.vlgmr.msra.gmra.mxu0 %v732_v58  ;;  %v485_v15 = vcvt.s32.f32 %v229_v7  ;;  %v501_v7 = vcvt.s32.f32 %v245_v63 }
  0x44   :  { %1273 = vmatmul.bf16.gmra.mxu2 %v800_v40  ;;  %v404_v40 = vunpack.c.2.s8 %v200_v26  ;;  %v737_v18 = vpack.c.bf16 %v489_v16, %v485_v15  ;;  %v3462_v16 = vld [vmem:[#allocation7 + $0x88] sm:$0xff] }
  0x45   :  { %1442 = vmatmul.bf16.gmra.mxu3 %v801_v41  ;;  %1522 = vmatpush.bf16.msrb.mxu2 %v3464_v38  ;;  %v408_v41 = vunpack.c.3.s8 %v200_v26  ;;  %v424_v26 = vunpack.c.3.s8 %v204_v62  ;;  %v677_v38 = vcvt.s32.f32 %v421_v27 }
  0x46   :  { %1691 = vmatpush.bf16.msrb.mxu3 %v3472_v39  ;;  %v660_v50 = vcvt.s32.f32 %v404_v40  ;;  %1362 = vmatmul.bf16.gmra.mxu1 %v737_v18  ;;  %v681_v39 = vcvt.s32.f32 %v425_v28  ;;  %v492_v40 = vcvt.s32.f32 %v236_v32 }
  0x47   :  { %v664_v51 = vcvt.s32.f32 %v408_v41  ;;  %v496_v41 = vcvt.s32.f32 %v240_v33 }
  0x49   :  { %v824_v60 = vpack.c.bf16 %v664_v51, %v660_v50  ;;  %1523 = vmatpush.bf16.msrb.mxu2 %v3463_v21  ;;  %v740_v44 = vpack.c.bf16 %v496_v41, %v492_v40  ;;  %v833_v50 = vpack.c.bf16 %v681_v39, %v677_v38  ;;  %v208_v51 = vld [vmem:[#allocation4 + $0x1a0] sm:$0xff] }
  0x4a   :  { %1692 = vmatpush.bf16.msrb.mxu3 %v3471_v22  ;;  %v428_v55 = vunpack.c.0.s8 %v208_v51  ;;  %v432_v56 = vunpack.c.1.s8 %v208_v51  ;;  %v440_v21 = vunpack.c.3.s8 %v208_v51 }
  0x4c   :  { %v688_v2 = vcvt.s32.f32 %v432_v56  ;;  %v696_v33 = vcvt.s32.f32 %v440_v21 }
  0x4d   :  { %1524 = vmatpush.bf16.msrb.mxu2 %v3462_v16  ;;  %v3469_v16 = vld [vmem:[#allocation7 + $0xc0] sm:$0xff] }
  0x54   :  { %1278 = vmatmul.bf16.gmra.mxu2 %v804_v52  ;;  %v661_v52 = vcvt.s32.f32 %v405_v42  ;;  %v493_v42 = vcvt.s32.f32 %v237_v34 }
  0x55   :  { %1447 = vmatmul.bf16.gmra.mxu3 %v805_v53  ;;  %v665_v53 = vcvt.s32.f32 %v409_v43  ;;  %v497_v43 = vcvt.s32.f32 %v241_v35 }
  0x57   :  { %v825_v61 = vpack.c.bf16 %v665_v53, %v661_v52  ;;  %v741_v45 = vpack.c.bf16 %v497_v43, %v493_v42  ;;  %v209_v52 = vld [vmem:[#allocation4 + $0x1a8] sm:$0xff] }
  0x58   :  { %v429_v57 = vunpack.c.0.s8 %v209_v52  ;;  %v433_v58 = vunpack.c.1.s8 %v209_v52  ;;  %v437_v22 = vunpack.c.2.s8 %v209_v52 }
  0x59   :  { %1367 = vmatmul.bf16.gmra.mxu1 %v741_v45 }
  0x5a   :  { %v689_v4 = vcvt.s32.f32 %v433_v58  ;;  %v693_v34 = vcvt.s32.f32 %v437_v22 }
  0x64   :  { %1283 = vmatmul.bf16.gmra.mxu2 %v808_v0  ;;  %v412_v0 = vunpack.c.0.s8 %v204_v62 }
  0x65   :  { %1452 = vmatmul.bf16.gmra.mxu3 %v809_v1  ;;  %v416_v1 = vunpack.c.1.s8 %v204_v62 }
  0x66   :  { %v668_v9 = vcvt.s32.f32 %v412_v0  ;;  %v249_v0 = vunpack.c.3.s8 %v161_v31 }
  0x67   :  { %v672_v10 = vcvt.s32.f32 %v416_v1  ;;  %v684_v1 = vcvt.s32.f32 %v428_v55 }
  0x68   :  { %v505_v8 = vcvt.s32.f32 %v249_v0 }
  0x69   :  { %v828_v19 = vpack.c.bf16 %v672_v10, %v668_v9 }
  0x6a   :  { %v745_v10 = vpack.c.bf16 %v505_v8, %v501_v7 }
  0x6c   :  { %1372 = vmatmul.bf16.gmra.mxu1 %v745_v10 }
  0x74   :  { %1288 = vmatmul.bf16.gmra.mxu2 %v812_v12  ;;  %v673_v12 = vcvt.s32.f32 %v417_v3  ;;  %v685_v3 = vcvt.s32.f32 %v429_v57  ;;  %v3482_v57 = vld [vmem:[#allocation9 + $0x28] sm:$0xff] }
  0x75   :  { %1457 = vmatmul.bf16.gmra.mxu3 %v813_v13  ;;  %v484_v13 = vcvt.s32.f32 %v228_v5 }
  0x76   :  { %v829_v20 = vpack.c.bf16 %v673_v12, %v669_v11  ;;  %v837_v15 = vpack.c.bf16 %v689_v4, %v685_v3 }
  0x77   :  { %v736_v17 = vpack.c.bf16 %v488_v14, %v484_v13  ;;  %v836_v14 = vpack.c.bf16 %v688_v2, %v684_v1 }
  0x79   :  { %1193 = vmatmul.bf16.gmra.mxu0 %v736_v17  ;;  %v3470_v17 = vld [vmem:[#allocation7 + $0xc8] sm:$0xff] }
  0x7a   :  { %1693 = vmatpush.bf16.msrb.mxu3 %v3470_v17 }
  0x7e   :  { %1694 = vmatpush.bf16.msrb.mxu3 %v3469_v16 }
  0x84   :  { %1293 = vmatmul.bf16.gmra.mxu2 %v816_v24 }
  0x85   :  { %1462 = vmatmul.bf16.gmra.mxu3 %v817_v25  ;;  %v420_v25 = vunpack.c.2.s8 %v204_v62  ;;  %v248_v62 = vunpack.c.3.s8 %v160_v30 }
  0x87   :  { %v504_v6 = vcvt.s32.f32 %v248_v62 }
  0x89   :  { %1198 = vmatmul.bf16.gmra.mxu0 %v740_v44 }
  0x94   :  { %1298 = vmatmul.bf16.gmra.mxu2 %v820_v36  ;;  %v676_v36 = vcvt.s32.f32 %v420_v25  ;;  %v164_v25 = vld [vmem:[#allocation4 + $0x40] sm:$0xff] }
  0x95   :  { %1467 = vmatmul.bf16.gmra.mxu3 %v821_v37  ;;  %v680_v37 = vcvt.s32.f32 %v424_v26  ;;  %v165_v26 = vld [vmem:[#allocation4 + $0x48] sm:$0xff]  ;;  %v252_v27 = vunpack.c.0.s8 %v164_v25  ;;  %v256_v28 = vunpack.c.1.s8 %v164_v25  ;;  %v260_v58 = vunpack.c.2.s8 %v164_v25 }
  0x96   :  { %v257_v31 = vunpack.c.1.s8 %v165_v26  ;;  %v265_v62 = vunpack.c.3.s8 %v165_v26 }
  0x97   :  { %v832_v49 = vpack.c.bf16 %v680_v37, %v676_v36  ;;  %v508_v36 = vcvt.s32.f32 %v252_v27  ;;  %v512_v37 = vcvt.s32.f32 %v256_v28  ;;  %v516_v3 = vcvt.s32.f32 %v260_v58 }
  0x98   :  { %v513_v39 = vcvt.s32.f32 %v257_v31 }
  0x99   :  { %v748_v40 = vpack.c.bf16 %v512_v37, %v508_v36 }
  0xa4   :  { %1303 = vmatmul.bf16.gmra.mxu2 %v824_v60  ;;  %v3483_v60 = vld [vmem:[#allocation9 + $0x30] sm:$0xff] }
  0xa5   :  { %1472 = vmatmul.bf16.gmra.mxu3 %v825_v61  ;;  %2543 = vmatpush.bf16.msrb.mxu0 %v3483_v60  ;;  %v244_v61 = vunpack.c.2.s8 %v160_v30  ;;  %v253_v30 = vunpack.c.0.s8 %v165_v26  ;;  %v264_v60 = vunpack.c.3.s8 %v164_v25  ;;  %v168_v25 = vld [vmem:[#allocation4 + $0x60] sm:$0xff] }
  0xa6   :  { %v268_v27 = vunpack.c.0.s8 %v168_v25  ;;  %v272_v28 = vunpack.c.1.s8 %v168_v25 }
  0xa7   :  { %v500_v5 = vcvt.s32.f32 %v244_v61  ;;  %v509_v38 = vcvt.s32.f32 %v253_v30  ;;  %v261_v61 = vunpack.c.2.s8 %v165_v26  ;;  %v520_v4 = vcvt.s32.f32 %v264_v60  ;;  %v169_v26 = vld [vmem:[#allocation4 + $0x68] sm:$0xff]  ;;  %v3481_v60 = vld [vmem:[#allocation9 + $0x20] sm:$0xff] }
  0xa8   :  { %v269_v30 = vunpack.c.0.s8 %v169_v26  ;;  %v273_v31 = vunpack.c.1.s8 %v169_v26  ;;  %v524_v36 = vcvt.s32.f32 %v268_v27  ;;  %v528_v37 = vcvt.s32.f32 %v272_v28  ;;  %v172_v27 = vld [vmem:[#allocation4 + $0x80] sm:$0xff]  ;;  %v173_v28 = vld [vmem:[#allocation4 + $0x88] sm:$0xff] }
  0xa9   :  { %v744_v9 = vpack.c.bf16 %v504_v6, %v500_v5  ;;  %v749_v41 = vpack.c.bf16 %v513_v39, %v509_v38  ;;  %2544 = vmatpush.bf16.msrb.mxu0 %v3482_v57  ;;  %v517_v5 = vcvt.s32.f32 %v261_v61  ;;  %v521_v6 = vcvt.s32.f32 %v265_v62 }
  0xaa   :  { %v752_v7 = vpack.c.bf16 %v520_v4, %v516_v3  ;;  %v525_v38 = vcvt.s32.f32 %v269_v30  ;;  %v529_v39 = vcvt.s32.f32 %v273_v31  ;;  %v276_v61 = vunpack.c.2.s8 %v168_v25 }
  0xab   :  { %1203 = vmatmul.bf16.gmra.mxu0 %v744_v9  ;;  %1377 = vmatmul.bf16.gmra.mxu1 %v749_v41  ;;  %v753_v8 = vpack.c.bf16 %v521_v6, %v517_v5  ;;  %v280_v62 = vunpack.c.3.s8 %v168_v25  ;;  %v284_v30 = vunpack.c.0.s8 %v172_v27  ;;  %v288_v31 = vunpack.c.1.s8 %v172_v27 }
  0xac   :  { %v757_v41 = vpack.c.bf16 %v529_v39, %v525_v38  ;;  %v532_v5 = vcvt.s32.f32 %v276_v61 }
  0xad   :  { %2545 = vmatpush.bf16.msrb.mxu0 %v3481_v60  ;;  %v536_v6 = vcvt.s32.f32 %v280_v62  ;;  %v540_v38 = vcvt.s32.f32 %v284_v30  ;;  %v544_v39 = vcvt.s32.f32 %v288_v31 }
  0xb4   :  { %1308 = vmatmul.bf16.gmra.mxu2 %v828_v19 }
  0xb5   :  { %1477 = vmatmul.bf16.gmra.mxu3 %v829_v20  ;;  %v436_v20 = vunpack.c.2.s8 %v208_v51 }
  0xb7   :  { %v1269_v23 = vpop.f32.mrf.mxu2  ;;  %v692_v32 = vcvt.s32.f32 %v436_v20 }
  0xb8   :  { %v1438_v24 = vpop.f32.mrf.mxu3 }
  0xb9   :  { %v4063_v29 = vadd.f32 %v1438_v24, %v1269_v23  ;;  %v441_v23 = vunpack.c.3.s8 %v209_v52  ;;  %v840_v45 = vpack.c.bf16 %v696_v33, %v692_v32 }
  0xbb   :  { %v697_v35 = vcvt.s32.f32 %v441_v23  ;;  %1208 = vmatmul.bf16.gmra.mxu0 %v748_v40  ;;  %1382 = vmatmul.bf16.gmra.mxu1 %v753_v8  ;;  %v756_v40 = vpack.c.bf16 %v528_v37, %v524_v36 }
  0xbf   :  { %v1271_v46 = vpop.f32.mrf.mxu2 }
  0xc0   :  { %v1440_v47 = vpop.f32.mrf.mxu3 }
  0xc1   :  { %v4065_v48 = vadd.f32 %v1440_v47, %v1271_v46  ;;  %v841_v46 = vpack.c.bf16 %v697_v35, %v693_v34  ;;  %v212_v47 = vld [vmem:[#allocation4 + $0x1c0] sm:$0xff] }
  0xc2   :  { %v444_v52 = vunpack.c.0.s8 %v212_v47  ;;  %v456_v20 = vunpack.c.3.s8 %v212_v47 }
  0xc4   :  { %1313 = vmatmul.bf16.gmra.mxu2 %v832_v49  ;;  %v213_v49 = vld [vmem:[#allocation4 + $0x1c8] sm:$0xff]  ;;  %v700_v63 = vcvt.s32.f32 %v444_v52  ;;  %v712_v33 = vcvt.s32.f32 %v456_v20 }
  0xc5   :  { %1482 = vmatmul.bf16.gmra.mxu3 %v833_v50  ;;  %v449_v55 = vunpack.c.1.s8 %v213_v49  ;;  %v453_v21 = vunpack.c.2.s8 %v213_v49  ;;  %v457_v22 = vunpack.c.3.s8 %v213_v49 }
  0xc7   :  { %v1274_v53 = vpop.f32.mrf.mxu2  ;;  %v705_v2 = vcvt.s32.f32 %v449_v55  ;;  %v709_v34 = vcvt.s32.f32 %v453_v21  ;;  %v713_v35 = vcvt.s32.f32 %v457_v22 }
  0xc8   :  { %v1443_v54 = vpop.f32.mrf.mxu3 }
  0xc9   :  { %v4067_v59 = vadd.f32 %v1443_v54, %v1274_v53  ;;  %v448_v53 = vunpack.c.1.s8 %v212_v47  ;;  %v445_v54 = vunpack.c.0.s8 %v213_v49  ;;  %v216_v49 = vld [vmem:[#allocation4 + $0x1e0] sm:$0xff] }
  0xca   :  { %v468_v20 = vunpack.c.2.s8 %v216_v49  ;;  %v472_v21 = vunpack.c.3.s8 %v216_v49 }
  0xcb   :  { %v704_v0 = vcvt.s32.f32 %v448_v53  ;;  %v701_v1 = vcvt.s32.f32 %v445_v54  ;;  %1213 = vmatmul.bf16.gmra.mxu0 %v752_v7  ;;  %1387 = vmatmul.bf16.gmra.mxu1 %v757_v41  ;;  %v460_v53 = vunpack.c.0.s8 %v216_v49  ;;  %v464_v54 = vunpack.c.1.s8 %v216_v49 }
  0xcf   :  { %v1276_v11 = vpop.f32.mrf.mxu2 }
  0xd0   :  { %v1445_v12 = vpop.f32.mrf.mxu3 }
  0xd1   :  { %v4069_v13 = vadd.f32 %v1445_v12, %v1276_v11  ;;  %v844_v12 = vpack.c.bf16 %v704_v0, %v700_v63  ;;  %v277_v63 = vunpack.c.2.s8 %v169_v26  ;;  %v281_v0 = vunpack.c.3.s8 %v169_v26 }
  0xd3   :  { %v533_v7 = vcvt.s32.f32 %v277_v63  ;;  %v537_v8 = vcvt.s32.f32 %v281_v0 }
  0xd4   :  { %1318 = vmatmul.bf16.gmra.mxu2 %v836_v14  ;;  %v845_v14 = vpack.c.bf16 %v705_v2, %v701_v1  ;;  %v716_v1 = vcvt.s32.f32 %v460_v53  ;;  %v720_v2 = vcvt.s32.f32 %v464_v54 }
  0xd5   :  { %1487 = vmatmul.bf16.gmra.mxu3 %v837_v15  ;;  %v3461_v15 = vld [vmem:[#allocation7 + $0x80] sm:$0xff] }
  0xd6   :  { %1525 = vmatpush.bf16.msrb.mxu2 %v3461_v15  ;;  %v852_v16 = vpack.c.bf16 %v720_v2, %v716_v1 }
  0xd7   :  { %v1279_v18 = vpop.f32.mrf.mxu2 }
  0xd8   :  { %v1448_v19 = vpop.f32.mrf.mxu3 }
  0xd9   :  { %v4071_v24 = vadd.f32 %v1448_v19, %v1279_v18  ;;  %v452_v19 = vunpack.c.2.s8 %v212_v47  ;;  %v849_v47 = vpack.c.bf16 %v713_v35, %v709_v34  ;;  %v724_v34 = vcvt.s32.f32 %v468_v20 }
  0xda   :  { %v728_v35 = vcvt.s32.f32 %v472_v21 }
  0xdb   :  { %v708_v32 = vcvt.s32.f32 %v452_v19  ;;  %1218 = vmatmul.bf16.gmra.mxu0 %v756_v40 }
  0xdc   :  { %v856_v53 = vpack.c.bf16 %v728_v35, %v724_v34 }
  0xdf   :  { %v1281_v42 = vpop.f32.mrf.mxu2 }
  0xe0   :  { %v1450_v43 = vpop.f32.mrf.mxu3 }
  0xe1   :  { %v4073_v44 = vadd.f32 %v1450_v43, %v1281_v42 }
  0xe4   :  { %1323 = vmatmul.bf16.gmra.mxu2 %v840_v45 }
  0xe5   :  { %1492 = vmatmul.bf16.gmra.mxu3 %v841_v46  ;;  %v848_v46 = vpack.c.bf16 %v712_v33, %v708_v32  ;;  %v285_v32 = vunpack.c.0.s8 %v173_v28  ;;  %v289_v33 = vunpack.c.1.s8 %v173_v28 }
  0xe7   :  { %v1284_v50 = vpop.f32.mrf.mxu2  ;;  %v541_v40 = vcvt.s32.f32 %v285_v32  ;;  %v545_v41 = vcvt.s32.f32 %v289_v33 }
  0xe8   :  { %v1453_v51 = vpop.f32.mrf.mxu3 }
  0xe9   :  { %v4075_v56 = vadd.f32 %v1453_v51, %v1284_v50  ;;  %v217_v50 = vld [vmem:[#allocation4 + $0x1e8] sm:$0xff]  ;;  %v765_v49 = vpack.c.bf16 %v545_v41, %v541_v40 }
  0xea   :  { %v461_v55 = vunpack.c.0.s8 %v217_v50  ;;  %v465_v57 = vunpack.c.1.s8 %v217_v50  ;;  %v469_v22 = vunpack.c.2.s8 %v217_v50  ;;  %v473_v25 = vunpack.c.3.s8 %v217_v50 }
  0xec   :  { %v717_v3 = vcvt.s32.f32 %v461_v55  ;;  %v721_v4 = vcvt.s32.f32 %v465_v57  ;;  %v725_v36 = vcvt.s32.f32 %v469_v22  ;;  %v729_v37 = vcvt.s32.f32 %v473_v25  ;;  %v158_v55 = vld [vmem:[#allocation4 + $0x10] sm:$0xff]  ;;  %v159_v57 = vld [vmem:[#allocation4 + $0x18] sm:$0xff] }
  0xed   :  { %v222_v1 = vunpack.c.0.s8 %v158_v55  ;;  %v226_v2 = vunpack.c.1.s8 %v158_v55 }
  0xee   :  { %v857_v54 = vpack.c.bf16 %v729_v37, %v725_v36  ;;  %v3492_v36 = vld [vmem:[#allocation10 + $0x38] sm:$0xff] }
  0xef   :  { %v1286_v9 = vpop.f32.mrf.mxu2  ;;  %2871 = vmatpush.bf16.msrb.mxu1 %v3492_v36 }
  0xf0   :  { %v1455_v10 = vpop.f32.mrf.mxu3 }
  0xf1   :  { %v4077_v11 = vadd.f32 %v1455_v10, %v1286_v9  ;;  %v760_v9 = vpack.c.bf16 %v536_v6, %v532_v5  ;;  %v761_v10 = vpack.c.bf16 %v537_v8, %v533_v7  ;;  %v3480_v6 = vld [vmem:[#allocation9 + $0x18] sm:$0xff]  ;;  %v292_v7 = vunpack.c.2.s8 %v172_v27 }
  0xf2   :  { %2546 = vmatpush.bf16.msrb.mxu0 %v3480_v6  ;;  %v296_v8 = vunpack.c.3.s8 %v172_v27 }
  0xf3   :  { %1223 = vmatmul.bf16.gmra.mxu0 %v760_v9  ;;  %1392 = vmatmul.bf16.gmra.mxu1 %v761_v10  ;;  %v293_v9 = vunpack.c.2.s8 %v173_v28  ;;  %v297_v10 = vunpack.c.3.s8 %v173_v28 }
  0xf4   :  { %1328 = vmatmul.bf16.gmra.mxu2 %v844_v12 }
  0xf5   :  { %1497 = vmatmul.bf16.gmra.mxu3 %v845_v14  ;;  %v549_v20 = vcvt.s32.f32 %v293_v9  ;;  %v553_v21 = vcvt.s32.f32 %v297_v10 }
  0xf7   :  { %v1289_v17 = vpop.f32.mrf.mxu2  ;;  %v769_v32 = vpack.c.bf16 %v553_v21, %v549_v20  ;;  %v162_v20 = vld [vmem:[#allocation4 + $0x30] sm:$0xff]  ;;  %v163_v21 = vld [vmem:[#allocation4 + $0x38] sm:$0xff] }
  0xf8   :  { %v1458_v18 = vpop.f32.mrf.mxu3  ;;  %v243_v36 = vunpack.c.1.s8 %v163_v21 }
  0xf9   :  { %v4079_v23 = vadd.f32 %v1458_v18, %v1289_v17  ;;  %v853_v17 = vpack.c.bf16 %v721_v4, %v717_v3  ;;  %v223_v3 = vunpack.c.0.s8 %v159_v57  ;;  %v227_v4 = vunpack.c.1.s8 %v159_v57 }
  0xff   :  { %v1291_v42 = vpop.f32.mrf.mxu2 }
 0x100   :  { %v1460_v43 = vpop.f32.mrf.mxu3 }
 0x101   :  { %v4081_v45 = vadd.f32 %v1460_v43, %v1291_v42  ;;  %v1189_v42 = vpop.f32.mrf.mxu0  ;;  %v1358_v43 = vpop.f32.mrf.mxu1 }
 0x103   :  { %1397 = vmatmul.bf16.gmra.mxu1 %v765_v49  ;;  %v235_v49 = vunpack.c.3.s8 %v159_v57 }
 0x104   :  { %1333 = vmatmul.bf16.gmra.mxu2 %v848_v46  ;;  %v4089_v46 = vadd.f32 %v1358_v43, %v1189_v42  ;;  %v230_v42 = vunpack.c.2.s8 %v158_v55  ;;  %v234_v43 = vunpack.c.3.s8 %v158_v55 }
 0x105   :  { %1502 = vmatmul.bf16.gmra.mxu3 %v849_v47  ;;  %v764_v47 = vpack.c.bf16 %v544_v39, %v540_v38 }
 0x107   :  { %v1294_v51 = vpop.f32.mrf.mxu2  ;;  %1228 = vmatmul.bf16.gmra.mxu0 %v764_v47  ;;  %v231_v47 = vunpack.c.2.s8 %v159_v57 }
 0x108   :  { %v1463_v52 = vpop.f32.mrf.mxu3 }
 0x109   :  { %v4083_v58 = vadd.f32 %v1463_v52, %v1294_v51  ;;  %v1191_v60 = vpop.f32.mrf.mxu0  ;;  %v1360_v61 = vpop.f32.mrf.mxu1 }
 0x10a   :  { %v4093_v62 = vadd.f32 %v1360_v61, %v1191_v60 }
 0x10f   :  { %v1296_v12 = vpop.f32.mrf.mxu2 }
 0x110   :  { %v1465_v14 = vpop.f32.mrf.mxu3 }
 0x111   :  { %v4085_v15 = vadd.f32 %v1465_v14, %v1296_v12  ;;  %v478_v12 = vcvt.s32.f32 %v222_v1  ;;  %v482_v14 = vcvt.s32.f32 %v226_v2  ;;  %v1194_v22 = vpop.f32.mrf.mxu0  ;;  %v1363_v25 = vpop.f32.mrf.mxu1  ;;  %v490_v1 = vcvt.s32.f32 %v234_v43 }
 0x112   :  { %v4097_v30 = vadd.f32 %v1363_v25, %v1194_v22  ;;  %v487_v2 = vcvt.s32.f32 %v231_v47 }
 0x113   :  { %v734_v27 = vpack.c.bf16 %v482_v14, %v478_v12  ;;  %1402 = vmatmul.bf16.gmra.mxu1 %v769_v32 }
 0x114   :  { %1338 = vmatmul.bf16.gmra.mxu2 %v852_v16  ;;  %v479_v16 = vcvt.s32.f32 %v223_v3  ;;  %v491_v3 = vcvt.s32.f32 %v235_v49 }
 0x115   :  { %1507 = vmatmul.bf16.gmra.mxu3 %v853_v17  ;;  %v483_v17 = vcvt.s32.f32 %v227_v4 }
 0x117   :  { %v1299_v18 = vpop.f32.mrf.mxu2  ;;  %v735_v28 = vpack.c.bf16 %v483_v17, %v479_v16 }
 0x118   :  { %v1468_v19 = vpop.f32.mrf.mxu3 }
 0x119   :  { %v4087_v26 = vadd.f32 %v1468_v19, %v1299_v18  ;;  %v548_v18 = vcvt.s32.f32 %v292_v7  ;;  %v552_v19 = vcvt.s32.f32 %v296_v8  ;;  %v1196_v37 = vpop.f32.mrf.mxu0  ;;  %v1365_v38 = vpop.f32.mrf.mxu1 }
 0x11a   :  { %v4101_v39 = vadd.f32 %v1365_v38, %v1196_v37  ;;  %v3479_v38 = vld [vmem:[#allocation9 + $0x10] sm:$0xff] }
 0x11b   :  { %v768_v31 = vpack.c.bf16 %v552_v19, %v548_v18  ;;  %v739_v19 = vpack.c.bf16 %v491_v3, %v487_v2  ;;  %2547 = vmatpush.bf16.msrb.mxu0 %v3479_v38 }
 0x11d   :  { %1233 = vmatmul.bf16.gmra.mxu0 %v768_v31 }
 0x11f   :  { %v1301_v50 = vpop.f32.mrf.mxu2 }
 0x120   :  { %v1470_v51 = vpop.f32.mrf.mxu3 }
 0x121   :  { %v4091_v52 = vadd.f32 %v1470_v51, %v1301_v50  ;;  %v176_v51 = vld [vmem:[#allocation4 + $0xa0] sm:$0xff]  ;;  %v1199_v9 = vpop.f32.mrf.mxu0  ;;  %v1368_v55 = vpop.f32.mrf.mxu1 }
 0x122   :  { %v304_v60 = vunpack.c.1.s8 %v176_v51  ;;  %v4105_v10 = vadd.f32 %v1368_v55, %v1199_v9 }
 0x124   :  { %1343 = vmatmul.bf16.gmra.mxu2 %v856_v53  ;;  %v177_v53 = vld [vmem:[#allocation4 + $0xa8] sm:$0xff]  ;;  %v560_v6 = vcvt.s32.f32 %v304_v60  ;;  %v499_v60 = vcvt.s32.f32 %v243_v36 }
 0x125   :  { %1512 = vmatmul.bf16.gmra.mxu3 %v857_v54  ;;  %v300_v54 = vunpack.c.0.s8 %v176_v51  ;;  %v301_v61 = vunpack.c.0.s8 %v177_v53  ;;  %v313_v43 = vunpack.c.3.s8 %v177_v53 }
 0x127   :  { %v1304_v63 = vpop.f32.mrf.mxu2  ;;  %v556_v4 = vcvt.s32.f32 %v300_v54  ;;  %v557_v7 = vcvt.s32.f32 %v301_v61 }
 0x128   :  { %v1473_v0 = vpop.f32.mrf.mxu3 }
 0x129   :  { %v4095_v5 = vadd.f32 %v1473_v0, %v1304_v63  ;;  %v305_v63 = vunpack.c.1.s8 %v177_v53  ;;  %v486_v0 = vcvt.s32.f32 %v230_v42  ;;  %v772_v57 = vpack.c.bf16 %v560_v6, %v556_v4  ;;  %v1201_v22 = vpop.f32.mrf.mxu0  ;;  %v1370_v25 = vpop.f32.mrf.mxu1 }
 0x12a   :  { %v4109_v31 = vadd.f32 %v1370_v25, %v1201_v22  ;;  %v309_v42 = vunpack.c.2.s8 %v177_v53  ;;  %v246_v22 = vunpack.c.2.s8 %v162_v20  ;;  %v250_v25 = vunpack.c.3.s8 %v162_v20 }
 0x12b   :  { %v561_v8 = vcvt.s32.f32 %v305_v63  ;;  %v738_v18 = vpack.c.bf16 %v490_v1, %v486_v0  ;;  %v569_v1 = vcvt.s32.f32 %v313_v43 }
 0x12c   :  { %v565_v0 = vcvt.s32.f32 %v309_v42  ;;  %v502_v42 = vcvt.s32.f32 %v246_v22  ;;  %v506_v43 = vcvt.s32.f32 %v250_v25  ;;  %v3478_v25 = vld [vmem:[#allocation9 + $0x8] sm:$0xff] }
 0x12d   :  { %v773_v12 = vpack.c.bf16 %v561_v8, %v557_v7  ;;  %1238 = vmatmul.bf16.gmra.mxu0 %v772_v57  ;;  %v3491_v57 = vld [vmem:[#allocation10 + $0x30] sm:$0xff] }
 0x12e   :  { %v777_v7 = vpack.c.bf16 %v569_v1, %v565_v0  ;;  %2872 = vmatpush.bf16.msrb.mxu1 %v3491_v57  ;;  %2548 = vmatpush.bf16.msrb.mxu0 %v3478_v25 }
 0x12f   :  { %v1306_v33 = vpop.f32.mrf.mxu2  ;;  %1407 = vmatmul.bf16.gmra.mxu1 %v773_v12 }
 0x130   :  { %v1475_v34 = vpop.f32.mrf.mxu3 }
 0x131   :  { %v4099_v35 = vadd.f32 %v1475_v34, %v1306_v33  ;;  %v238_v34 = vunpack.c.0.s8 %v162_v20  ;;  %v1204_v2 = vpop.f32.mrf.mxu0  ;;  %v1373_v3 = vpop.f32.mrf.mxu1 }
 0x132   :  { %v4113_v4 = vadd.f32 %v1373_v3, %v1204_v2 }
 0x133   :  { %4477 = vst [vmem:[#allocation17_spill] sm:$0xff] %v4099_v35  ;;  %v494_v47 = vcvt.s32.f32 %v238_v34 }
 0x134   :  { %1526 = vmatmul.bf16.vlgmr.msrb.gmra.mxu2 %v734_v27  ;;  %v242_v27 = vunpack.c.1.s8 %v162_v20 }
 0x135   :  { %1695 = vmatmul.bf16.vlgmr.msrb.gmra.mxu3 %v735_v28  ;;  %v239_v28 = vunpack.c.0.s8 %v163_v21 }
 0x136   :  { %v498_v49 = vcvt.s32.f32 %v242_v27  ;;  %v180_v27 = vld [vmem:[#allocation4 + $0xc0] sm:$0xff] }
 0x137   :  { %v1309_v40 = vpop.f32.mrf.mxu2  ;;  %v495_v54 = vcvt.s32.f32 %v239_v28  ;;  %v181_v28 = vld [vmem:[#allocation4 + $0xc8] sm:$0xff]  ;;  %v316_v36 = vunpack.c.0.s8 %v180_v27  ;;  %v320_v38 = vunpack.c.1.s8 %v180_v27 }
 0x138   :  { %v1478_v41 = vpop.f32.mrf.mxu3 }
 0x139   :  { %v4103_v50 = vadd.f32 %v1478_v41, %v1309_v40  ;;  %v308_v40 = vunpack.c.2.s8 %v176_v51  ;;  %v312_v41 = vunpack.c.3.s8 %v176_v51  ;;  %v742_v51 = vpack.c.bf16 %v498_v49, %v494_v47  ;;  %v1206_v12 = vpop.f32.mrf.mxu0 }
 0x13a   :  { %v743_v53 = vpack.c.bf16 %v499_v60, %v495_v54  ;;  %v572_v54 = vcvt.s32.f32 %v316_v36  ;;  %v576_v60 = vcvt.s32.f32 %v320_v38  ;;  %v325_v36 = vunpack.c.2.s8 %v181_v28 }
 0x13b   :  { %4478 = vst [vmem:[#allocation18_spill] sm:$0xff] %v4103_v50  ;;  %v564_v61 = vcvt.s32.f32 %v308_v40  ;;  %v568_v63 = vcvt.s32.f32 %v312_v41  ;;  %v317_v40 = vunpack.c.0.s8 %v181_v28  ;;  %v321_v41 = vunpack.c.1.s8 %v181_v28  ;;  %v3782_v50 = vld [vmem:[#allocation7 + $0x10] sm:$0xff]  }
 0x13c   :  { %v780_v20 = vpack.c.bf16 %v576_v60, %v572_v54  ;;  %v329_v38 = vunpack.c.3.s8 %v181_v28  ;;  %v581_v54 = vcvt.s32.f32 %v325_v36  ;;  %v3490_v28 = vld [vmem:[#allocation10 + $0x28] sm:$0xff] }
 0x13d   :  { %v776_v6 = vpack.c.bf16 %v568_v63, %v564_v61  ;;  %v573_v61 = vcvt.s32.f32 %v317_v40  ;;  %v577_v63 = vcvt.s32.f32 %v321_v41  ;;  %2873 = vmatpush.bf16.msrb.mxu1 %v3490_v28 }
 0x13e   :  { %v585_v60 = vcvt.s32.f32 %v329_v38 }
 0x13f   :  { %v1311_v14 = vpop.f32.mrf.mxu2  ;;  %1243 = vmatmul.bf16.gmra.mxu0 %v776_v6  ;;  %1412 = vmatmul.bf16.gmra.mxu1 %v777_v7  ;;  %v746_v6 = vpack.c.bf16 %v506_v43, %v502_v42 }
 0x140   :  { %v1480_v16 = vpop.f32.mrf.mxu3 }
 0x141   :  { %v4107_v17 = vadd.f32 %v1480_v16, %v1311_v14  ;;  %v1375_v14 = vpop.f32.mrf.mxu1  ;;  %v4121_v0 = vpop.f32.mrf.mxu0 }
 0x142   :  { %v4117_v16 = vadd.f32 %v1375_v14, %v1206_v12 }
 0x143   :  { %4479 = vst [vmem:[#allocation19_spill] sm:$0xff] %v4107_v17 }
 0x144   :  { %1531 = vmatmul.bf16.gmra.mxu2 %v738_v18 }
 0x145   :  { %1700 = vmatmul.bf16.gmra.mxu3 %v739_v19 }
 0x147   :  { %v1314_v32 = vpop.f32.mrf.mxu2 }
 0x148   :  { %v1483_v33 = vpop.f32.mrf.mxu3 }
 0x149   :  { %v4111_v37 = vadd.f32 %v1483_v33, %v1314_v32  ;;  %v247_v32 = vunpack.c.2.s8 %v163_v21  ;;  %v251_v33 = vunpack.c.3.s8 %v163_v21  ;;  %v781_v21 = vpack.c.bf16 %v577_v63, %v573_v61 }
 0x14b   :  { %4480 = vst [vmem:[#allocation20_spill] sm:$0xff] %v4111_v37  ;;  %v503_v47 = vcvt.s32.f32 %v247_v32  ;;  %v507_v49 = vcvt.s32.f32 %v251_v33  ;;  %v324_v32 = vunpack.c.2.s8 %v180_v27  ;;  %v328_v33 = vunpack.c.3.s8 %v180_v27 }
 0x14d   :  { %v747_v7 = vpack.c.bf16 %v507_v49, %v503_v47  ;;  %v580_v47 = vcvt.s32.f32 %v324_v32  ;;  %v584_v49 = vcvt.s32.f32 %v328_v33  ;;  %v184_v32 = vld [vmem:[#allocation4 + $0xe0] sm:$0xff]  ;;  %v185_v33 = vld [vmem:[#allocation4 + $0xe8] sm:$0xff] }
 0x14e   :  { %v332_v36 = vunpack.c.0.s8 %v184_v32  ;;  %v336_v38 = vunpack.c.1.s8 %v184_v32 }
 0x14f   :  { %v1316_v8 = vpop.f32.mrf.mxu2  ;;  %1248 = vmatmul.bf16.gmra.mxu0 %v780_v20  ;;  %1417 = vmatmul.bf16.gmra.mxu1 %v781_v21  ;;  %v784_v63 = vpack.c.bf16 %v584_v49, %v580_v47  ;;  %v785_v20 = vpack.c.bf16 %v585_v60, %v581_v54 }
 0x150   :  { %v1485_v9 = vpop.f32.mrf.mxu3  ;;  %v588_v54 = vcvt.s32.f32 %v332_v36  ;;  %v592_v60 = vcvt.s32.f32 %v336_v38 }
 0x151   :  { %v4115_v55 = vadd.f32 %v1485_v9, %v1316_v8  ;;  %v166_v8 = vld [vmem:[#allocation4 + $0x50] sm:$0xff]  ;;  %v167_v9 = vld [vmem:[#allocation4 + $0x58] sm:$0xff] }
 0x152   :  { %v254_v12 = vunpack.c.0.s8 %v166_v8  ;;  %v258_v14 = vunpack.c.1.s8 %v166_v8 }
 0x153   :  { %4481 = vst [vmem:[#allocation21_spill] sm:$0xff] %v4115_v55 }
 0x154   :  { %1536 = vmatmul.bf16.gmra.mxu2 %v742_v51  ;;  %v4125_v51 = vpop.f32.mrf.mxu0  ;;  %v510_v40 = vcvt.s32.f32 %v254_v12  ;;  %v514_v41 = vcvt.s32.f32 %v258_v14  ;;  %v262_v12 = vunpack.c.2.s8 %v166_v8  ;;  %v266_v14 = vunpack.c.3.s8 %v166_v8 }
 0x155   :  { %1705 = vmatmul.bf16.gmra.mxu3 %v743_v53  ;;  %v788_v8 = vpack.c.bf16 %v592_v60, %v588_v54  ;;  %v3477_v60 = vld [vmem:[#allocation9] sm:$0xff] }
 0x156   :  { %2549 = vmatpush.bf16.msrb.mxu0 %v3477_v60 }
 0x157   :  { %v1319_v18 = vpop.f32.mrf.mxu2 }
 0x158   :  { %v1488_v19 = vpop.f32.mrf.mxu3 }
 0x159   :  { %v4119_v34 = vadd.f32 %v1488_v19, %v1319_v18  ;;  %v255_v18 = vunpack.c.0.s8 %v167_v9  ;;  %v259_v19 = vunpack.c.1.s8 %v167_v9 }
 0x15b   :  { %4482 = vst [vmem:[#allocation22_spill] sm:$0xff] %v4119_v34  ;;  %v511_v42 = vcvt.s32.f32 %v255_v18  ;;  %v515_v43 = vcvt.s32.f32 %v259_v19  ;;  %v263_v18 = vunpack.c.2.s8 %v167_v9  ;;  %v267_v19 = vunpack.c.3.s8 %v167_v9  ;;  %v4174_v34 = vpop.f32.mrf.mxu1 }
 0x15c   :  { %v4129_v61 = vpop.f32.mrf.mxu0 }
 0x15d   :  { %v751_v27 = vpack.c.bf16 %v515_v43, %v511_v42  ;;  %v518_v42 = vcvt.s32.f32 %v262_v12  ;;  %v522_v43 = vcvt.s32.f32 %v266_v14  ;;  %v519_v47 = vcvt.s32.f32 %v263_v18  ;;  %v171_v12 = vld [vmem:[#allocation4 + $0x78] sm:$0xff] }
 0x15e   :  { %v523_v49 = vcvt.s32.f32 %v267_v19  ;;  %v271_v38 = vunpack.c.0.s8 %v171_v12 }
 0x15f   :  { %v1321_v1 = vpop.f32.mrf.mxu2  ;;  %1253 = vmatmul.bf16.gmra.mxu0 %v784_v63  ;;  %1422 = vmatmul.bf16.gmra.mxu1 %v785_v20  ;;  %v754_v28 = vpack.c.bf16 %v522_v43, %v518_v42  ;;  %v340_v42 = vunpack.c.2.s8 %v184_v32  ;;  %v344_v43 = vunpack.c.3.s8 %v184_v32 }
 0x160   :  { %v1490_v2 = vpop.f32.mrf.mxu3 }
 0x161   :  { %v4123_v3 = vadd.f32 %v1490_v2, %v1321_v1 }
 0x163   :  { %4483 = vst [vmem:[#allocation23_spill] sm:$0xff] %v4123_v3 }
 0x164   :  { %1541 = vmatmul.bf16.gmra.mxu2 %v746_v6  ;;  %v750_v6 = vpack.c.bf16 %v514_v41, %v510_v40  ;;  %v333_v40 = vunpack.c.0.s8 %v185_v33  ;;  %v337_v41 = vunpack.c.1.s8 %v185_v33 }
 0x165   :  { %1710 = vmatmul.bf16.gmra.mxu3 %v747_v7  ;;  %v4133_v7 = vpop.f32.mrf.mxu0 }
 0x166   :  { %v589_v63 = vcvt.s32.f32 %v333_v40  ;;  %v593_v20 = vcvt.s32.f32 %v337_v41  ;;  %v275_v40 = vunpack.c.1.s8 %v171_v12 }
 0x167   :  { %v1324_v53 = vpop.f32.mrf.mxu2 }
 0x168   :  { %v1493_v57 = vpop.f32.mrf.mxu3  ;;  %v789_v9 = vpack.c.bf16 %v593_v20, %v589_v63 }
 0x169   :  { %v4127_v22 = vadd.f32 %v1493_v57, %v1324_v53 }
 0x16b   :  { %4484 = vst [vmem:[#allocation24_spill] sm:$0xff] %v4127_v22 }
 0x16f   :  { %v1326_v21 = vpop.f32.mrf.mxu2  ;;  %1258 = vmatmul.bf16.gmra.mxu0 %v788_v8  ;;  %1427 = vmatmul.bf16.gmra.mxu1 %v789_v9  ;;  %v527_v8 = vcvt.s32.f32 %v271_v38  ;;  %v531_v9 = vcvt.s32.f32 %v275_v40 }
 0x170   :  { %v1495_v1 = vpop.f32.mrf.mxu3 }
 0x171   :  { %v4131_v2 = vadd.f32 %v1495_v1, %v1326_v21  ;;  %v4137_v21 = vpop.f32.mrf.mxu0  ;;  %v759_v60 = vpack.c.bf16 %v531_v9, %v527_v8 }
 0x173   :  { %4485 = vst [vmem:[#allocation25_spill] sm:$0xff] %v4131_v2 }
 0x174   :  { %1546 = vmatmul.bf16.gmra.mxu2 %v750_v6 }
 0x175   :  { %1715 = vmatmul.bf16.gmra.mxu3 %v751_v27 }
 0x177   :  { %v1329_v53 = vpop.f32.mrf.mxu2 }
 0x178   :  { %v1498_v57 = vpop.f32.mrf.mxu3 }
 0x179   :  { %v4135_v25 = vadd.f32 %v1498_v57, %v1329_v53  ;;  %v755_v53 = vpack.c.bf16 %v523_v49, %v519_v47  ;;  %v170_v57 = vld [vmem:[#allocation4 + $0x70] sm:$0xff]  ;;  %v4143_v54 = vpop.f32.mrf.mxu0  ;;  %v341_v47 = vunpack.c.2.s8 %v185_v33  ;;  %v345_v49 = vunpack.c.3.s8 %v185_v33  ;;  %v3489_v33 = vld [vmem:[#allocation10 + $0x20] sm:$0xff] }
 0x17a   :  { %v270_v19 = vunpack.c.0.s8 %v170_v57  ;;  %v274_v36 = vunpack.c.1.s8 %v170_v57  ;;  %2874 = vmatpush.bf16.msrb.mxu1 %v3489_v33  ;;  %v278_v38 = vunpack.c.2.s8 %v170_v57 }
 0x17b   :  { %4486 = vst [vmem:[#allocation26_spill] sm:$0xff] %v4135_v25 }
 0x17c   :  { %v526_v63 = vcvt.s32.f32 %v270_v19  ;;  %v530_v20 = vcvt.s32.f32 %v274_v36 }
 0x17e   :  { %v758_v2 = vpack.c.bf16 %v530_v20, %v526_v63 }
 0x17f   :  { %v1331_v1 = vpop.f32.mrf.mxu2 }
 0x180   :  { %v1500_v6 = vpop.f32.mrf.mxu3 }
 0x181   :  { %v4139_v27 = vadd.f32 %v1500_v6, %v1331_v1  ;;  %v596_v1 = vcvt.s32.f32 %v340_v42  ;;  %v600_v6 = vcvt.s32.f32 %v344_v43  ;;  %v4147_v32 = vpop.f32.mrf.mxu0  ;;  %v282_v42 = vunpack.c.3.s8 %v170_v57 }
 0x182   :  { %v279_v43 = vunpack.c.2.s8 %v171_v12 }
 0x183   :  { %4487 = vst [vmem:[#allocation27_spill] sm:$0xff] %v4139_v27  ;;  %v792_v27 = vpack.c.bf16 %v600_v6, %v596_v1  ;;  %v538_v1 = vcvt.s32.f32 %v282_v42 }
 0x184   :  { %1551 = vmatmul.bf16.gmra.mxu2 %v754_v28  ;;  %v597_v28 = vcvt.s32.f32 %v341_v47  ;;  %v283_v47 = vunpack.c.3.s8 %v171_v12  ;;  %v535_v63 = vcvt.s32.f32 %v279_v43 }
 0x185   :  { %1720 = vmatmul.bf16.gmra.mxu3 %v755_v53  ;;  %v601_v53 = vcvt.s32.f32 %v345_v49  ;;  %1263 = vmatmul.bf16.gmra.mxu0 %v792_v27  ;;  %v534_v49 = vcvt.s32.f32 %v278_v38 }
 0x186   :  { %v539_v20 = vcvt.s32.f32 %v283_v47 }
 0x187   :  { %v1334_v14 = vpop.f32.mrf.mxu2  ;;  %v793_v25 = vpack.c.bf16 %v601_v53, %v597_v28  ;;  %v762_v9 = vpack.c.bf16 %v538_v1, %v534_v49  ;;  %v174_v28 = vld [vmem:[#allocation4 + $0x90] sm:$0xff]  ;;  %v175_v53 = vld [vmem:[#allocation4 + $0x98] sm:$0xff] }
 0x188   :  { %v1503_v18 = vpop.f32.mrf.mxu3  ;;  %v763_v6 = vpack.c.bf16 %v539_v20, %v535_v63  ;;  %v290_v33 = vunpack.c.1.s8 %v174_v28 }
 0x189   :  { %v4141_v41 = vadd.f32 %v1503_v18, %v1334_v14  ;;  %1432 = vmatmul.bf16.gmra.mxu1 %v793_v25  ;;  %v4151_v27 = vpop.f32.mrf.mxu0 }
 0x18a   :  { %v546_v42 = vcvt.s32.f32 %v290_v33  ;;  %v298_v33 = vunpack.c.3.s8 %v174_v28 }
 0x18b   :  { %4488 = vst [vmem:[#allocation28_spill] sm:$0xff] %v4141_v41 }
 0x18f   :  { %v1336_v14 = vpop.f32.mrf.mxu2 }
 0x190   :  { %v1505_v18 = vpop.f32.mrf.mxu3 }
 0x191   :  { %v4145_v41 = vadd.f32 %v1505_v18, %v1336_v14  ;;  %v4155_v14 = vpop.f32.mrf.mxu0  ;;  %v286_v18 = vunpack.c.0.s8 %v174_v28 }
 0x193   :  { %4489 = vst [vmem:[#allocation29_spill] sm:$0xff] %v4145_v41  ;;  %v542_v38 = vcvt.s32.f32 %v286_v18  ;;  %v3494_v18 = vld [vmem:[#allocation7] sm:$0xff]  }
 0x194   :  { %1556 = vmatmul.bf16.gmra.mxu2 %v758_v2 }
 0x195   :  { %1725 = vmatmul.bf16.gmra.mxu3 %v759_v60  ;;  %v766_v20 = vpack.c.bf16 %v546_v42, %v542_v38  ;;  %v3495_v38 = vunpack.c.l.bf16 %v3494_v18  ;;  %v4168_v42 = vstv %s2053_s19 }
 0x197   :  { %v1339_v19 = vpop.f32.mrf.mxu2 }
 0x198   :  { %v1508_v36 = vpop.f32.mrf.mxu3 }
 0x199   :  { %v4149_v40 = vadd.f32 %v1508_v36, %v1339_v19  ;;  %v287_v19 = vunpack.c.0.s8 %v175_v53  ;;  %v291_v36 = vunpack.c.1.s8 %v175_v53 }
 0x19b   :  { %4490 = vst [vmem:[#allocation30_spill] sm:$0xff] %v4149_v40  ;;  %v543_v43 = vcvt.s32.f32 %v287_v19  ;;  %v547_v47 = vcvt.s32.f32 %v291_v36  ;;  %v295_v19 = vunpack.c.2.s8 %v175_v53  ;;  %v299_v36 = vunpack.c.3.s8 %v175_v53 }
 0x19f   :  { %v1341_v25 = vpop.f32.mrf.mxu2 }
 0x1a0   :  { %v1510_v8 = vpop.f32.mrf.mxu3 }
 0x1a1   :  { %v4153_v2 = vadd.f32 %v1510_v8, %v1341_v25  ;;  %v767_v25 = vpack.c.bf16 %v547_v47, %v543_v43  ;;  %v4161_v8 = vpop.f32.mrf.mxu0  ;;  %v3496_v43 = vunpack.c.h.bf16 %v3494_v18 }
 0x1a3   :  { %4491 = vst [vmem:[#allocation31_spill] sm:$0xff] %v4153_v2 }
 0x1a4   :  { %1561 = vmatmul.bf16.gmra.mxu2 %v762_v9  ;;  %v3488_v9 = vld [vmem:[#allocation10 + $0x18] sm:$0xff] }
 0x1a5   :  { %1730 = vmatmul.bf16.gmra.mxu3 %v763_v6  ;;  %2875 = vmatpush.bf16.msrb.mxu1 %v3488_v9  ;;  %v555_v9 = vcvt.s32.f32 %v299_v36 }
 0x1a7   :  { %v1344_v57 = vpop.f32.mrf.mxu2 }
 0x1a8   :  { %v1513_v12 = vpop.f32.mrf.mxu3 }
 0x1a9   :  { %v4157_v60 = vadd.f32 %v1513_v12, %v1344_v57  ;;  %v294_v12 = vunpack.c.2.s8 %v174_v28  ;;  %v2184_v28 = vmul.f32 %v3496_v43, %v4168_v42 }
 0x1ab   :  { %4492 = vst [vmem:[#allocation32_spill] sm:$0xff] %v4157_v60  ;;  %v550_v47 = vcvt.s32.f32 %v294_v12 }
 0x1af   :  { %v1346_v49 = vpop.f32.mrf.mxu2 }
 0x1b0   :  { %v1515_v1 = vpop.f32.mrf.mxu3 }
 0x1b1   :  { %v4159_v63 = vadd.f32 %v1515_v1, %v1346_v49  ;;  %v4166_v49 = vpop.f32.mrf.mxu0 }
 0x1b3   :  { %4493 = vst [vmem:[#allocation33_spill] sm:$0xff] %v4159_v63  ;;  %v2183_v63 = vmul.f32 %v3495_v38, %v4168_v42 }
 0x1b4   :  { %1566 = vmatmul.bf16.gmra.mxu2 %v766_v20  ;;  %v554_v20 = vcvt.s32.f32 %v298_v33  ;;  %v179_v33 = vld [vmem:[#allocation4 + $0xb8] sm:$0xff] }
 0x1b5   :  { %1735 = vmatmul.bf16.gmra.mxu3 %v767_v25  ;;  %v551_v25 = vcvt.s32.f32 %v295_v19 }
 0x1b6   :  { %v770_v41 = vpack.c.bf16 %v554_v20, %v550_v47  ;;  %v307_v47 = vunpack.c.1.s8 %v179_v33 }
 0x1b7   :  { %v1527_v6 = vpop.f32.mrf.mxu2  ;;  %v771_v22 = vpack.c.bf16 %v555_v9, %v551_v25 }
 0x1b8   :  { %v1696_v57 = vpop.f32.mrf.mxu3  ;;  %v1528_v1 = vadd.f32 %v1527_v6, %v4089_v46  ;;  %v178_v46 = vld [vmem:[#allocation4 + $0xb0] sm:$0xff] }
 0x1b9   :  { %v4176_v6 = vpop.f32.mrf.mxu0  ;;  %v302_v43 = vunpack.c.0.s8 %v178_v46 }
 0x1ba   :  { %v1697_v40 = vadd.f32 %v1696_v57, %v1528_v1  ;;  %v3781_v57 = vld [vmem:[#allocation7 + $0x8] sm:$0xff]  }
 0x1bb   :  { %v3500_v1 = vunpack.c.h.bf16 %v3781_v57  ;;  %v558_v20 = vcvt.s32.f32 %v302_v43 }
 0x1bc   :  { %v2247_v12 = vadd.f32 %v2183_v63, %v1697_v40  ;;  %v563_v40 = vcvt.s32.f32 %v307_v47  ;;  %v4179_v63 = vpop.f32.mrf.mxu1 }
 0x1bf   :  { %v1529_v60 = vpop.f32.mrf.mxu2 }
 0x1c0   :  { %v1698_v2 = vpop.f32.mrf.mxu3  ;;  %v1530_v53 = vadd.f32 %v1529_v60, %v4093_v62  ;;  %v306_v62 = vunpack.c.1.s8 %v178_v46  ;;  %v303_v60 = vunpack.c.0.s8 %v179_v33 }
 0x1c1   :  { %v4181_v25 = vpop.f32.mrf.mxu0 }
 0x1c2   :  { %v1699_v3 = vadd.f32 %v1698_v2, %v1530_v53  ;;  %v3499_v2 = vunpack.c.l.bf16 %v3781_v57 }
 0x1c4   :  { %v2248_v18 = vadd.f32 %v2184_v28, %v1699_v3  ;;  %1571 = vmatmul.bf16.gmra.mxu2 %v770_v41  ;;  %v562_v41 = vcvt.s32.f32 %v306_v62  ;;  %v2185_v9 = vmul.f32 %v3499_v2, %v4168_v42  ;;  %v3487_v62 = vld [vmem:[#allocation10 + $0x10] sm:$0xff]  ;;  %v310_v2 = vunpack.c.2.s8 %v178_v46  ;;  %v4186_v17 = vpop.f32.mrf.mxu1 }
 0x1c5   :  { %1740 = vmatmul.bf16.gmra.mxu3 %v771_v22  ;;  %v559_v22 = vcvt.s32.f32 %v303_v60  ;;  %2876 = vmatpush.bf16.msrb.mxu1 %v3487_v62 }
 0x1c6   :  { %v2442_v19 = vpack.c.bf16 %v2248_v18, %v2247_v12  ;;  %v2186_v12 = vmul.f32 %v3500_v1, %v4168_v42  ;;  %v774_v57 = vpack.c.bf16 %v562_v41, %v558_v20  ;;  %v311_v1 = vunpack.c.2.s8 %v179_v33 }
 0x1c7   :  { %v1532_v36 = vpop.f32.mrf.mxu2  ;;  %v775_v43 = vpack.c.bf16 %v563_v40, %v559_v22  ;;  %v3504_v41 = vunpack.c.h.bf16 %v3782_v50 }
 0x1c8   :  { %v1701_v38 = vpop.f32.mrf.mxu3  ;;  %2550 = vmatmul.bf16.vlgmr.msrb.gmra.mxu0 %v2442_v19  ;;  %v1533_v3 = vadd.f32 %v1532_v36, %v4097_v30 }
 0x1c9   :  { %v4188_v20 = vpop.f32.mrf.mxu0 }
 0x1ca   :  { %v1702_v18 = vadd.f32 %v1701_v38, %v1533_v3  ;;  %v314_v38 = vunpack.c.3.s8 %v178_v46  ;;  %v3503_v3 = vunpack.c.l.bf16 %v3782_v50 }
 0x1cc   :  { %v2249_v30 = vadd.f32 %v2185_v9, %v1702_v18  ;;  %v570_v40 = vcvt.s32.f32 %v314_v38  ;;  %v567_v9 = vcvt.s32.f32 %v311_v1 }
 0x1cf   :  { %v1534_v28 = vpop.f32.mrf.mxu2 }
 0x1d0   :  { %v1703_v53 = vpop.f32.mrf.mxu3  ;;  %v1535_v19 = vadd.f32 %v1534_v28, %v4101_v39  ;;  %v315_v39 = vunpack.c.3.s8 %v179_v33 }
 0x1d2   :  { %v1704_v55 = vadd.f32 %v1703_v53, %v1535_v19  ;;  %v571_v28 = vcvt.s32.f32 %v315_v39  ;;  %v2187_v53 = vmul.f32 %v3503_v3, %v4168_v42  ;;  %v2188_v19 = vmul.f32 %v3504_v41, %v4168_v42 }
 0x1d4   :  { %v2250_v36 = vadd.f32 %v2186_v12, %v1704_v55  ;;  %1576 = vmatmul.bf16.gmra.mxu2 %v774_v57  ;;  %v566_v55 = vcvt.s32.f32 %v310_v2 }
 0x1d5   :  { %1745 = vmatmul.bf16.gmra.mxu3 %v775_v43  ;;  %v779_v43 = vpack.c.bf16 %v571_v28, %v567_v9 }
 0x1d6   :  { %v2443_v60 = vpack.c.bf16 %v2250_v36, %v2249_v30  ;;  %v778_v33 = vpack.c.bf16 %v570_v40, %v566_v55  ;;  %v4194_v30 = vpop.f32.mrf.mxu1  ;;  %v4196_v36 = vpop.f32.mrf.mxu0 }
 0x1d7   :  { %v1537_v47 = vpop.f32.mrf.mxu2 }
 0x1d8   :  { %v1706_v37 = vpop.f32.mrf.mxu3  ;;  %2555 = vmatmul.bf16.gmra.mxu0 %v2443_v60  ;;  %v1538_v22 = vadd.f32 %v1537_v47, %v4105_v10  ;;  %v182_v60 = vld [vmem:[#allocation4 + $0xd0] sm:$0xff]  ;;  %v183_v47 = vld [vmem:[#allocation4 + $0xd8] sm:$0xff] }
 0x1d9   :  { %v318_v39 = vunpack.c.0.s8 %v182_v60  ;;  %v319_v3 = vunpack.c.0.s8 %v183_v47  ;;  %v323_v41 = vunpack.c.1.s8 %v183_v47 }
 0x1da   :  { %v1707_v57 = vadd.f32 %v1706_v37, %v1538_v22  ;;  %v3783_v37 = vld [vmem:[#allocation7 + $0x18] sm:$0xff]  }
 0x1db   :  { %v3507_v55 = vunpack.c.l.bf16 %v3783_v37  ;;  %v3508_v22 = vunpack.c.h.bf16 %v3783_v37  ;;  %v574_v40 = vcvt.s32.f32 %v318_v39 }
 0x1dc   :  { %v2251_v10 = vadd.f32 %v2187_v53, %v1707_v57 }
 0x1dd   :  { %v2189_v57 = vmul.f32 %v3507_v55, %v4168_v42 }
 0x1de   :  { %v4198_v9 = vpop.f32.mrf.mxu1 }
 0x1df   :  { %v1539_v12 = vpop.f32.mrf.mxu2 }
 0x1e0   :  { %v1708_v18 = vpop.f32.mrf.mxu3  ;;  %v1540_v46 = vadd.f32 %v1539_v12, %v4109_v31  ;;  %v322_v31 = vunpack.c.1.s8 %v182_v60  ;;  %v575_v12 = vcvt.s32.f32 %v319_v3 }
 0x1e2   :  { %v1709_v50 = vadd.f32 %v1708_v18, %v1540_v46  ;;  %v578_v53 = vcvt.s32.f32 %v322_v31  ;;  %v579_v18 = vcvt.s32.f32 %v323_v41 }
 0x1e4   :  { %v2252_v62 = vadd.f32 %v2188_v19, %v1709_v50  ;;  %1581 = vmatmul.bf16.gmra.mxu2 %v778_v33  ;;  %v4201_v19 = vpop.f32.mrf.mxu0 }
 0x1e5   :  { %1750 = vmatmul.bf16.gmra.mxu3 %v779_v43  ;;  %v2190_v43 = vmul.f32 %v3508_v22, %v4168_v42  ;;  %v326_v22 = vunpack.c.2.s8 %v182_v60 }
 0x1e6   :  { %v2444_v2 = vpack.c.bf16 %v2252_v62, %v2251_v10  ;;  %v782_v62 = vpack.c.bf16 %v578_v53, %v574_v40  ;;  %v327_v40 = vunpack.c.2.s8 %v183_v47  ;;  %v1379_v53 = vadd.f32 %v4174_v34, %v4121_v0 }
 0x1e7   :  { %v1542_v38 = vpop.f32.mrf.mxu2 }
 0x1e8   :  { %v1711_v1 = vpop.f32.mrf.mxu3  ;;  %2560 = vmatmul.bf16.gmra.mxu0 %v2444_v2  ;;  %v1543_v28 = vadd.f32 %v1542_v38, %v4113_v4  ;;  %v783_v2 = vpack.c.bf16 %v579_v18, %v575_v12  ;;  %v3486_v4 = vld [vmem:[#allocation10 + $0x8] sm:$0xff]  ;;  %v4206_v38 = vpop.f32.mrf.mxu1 }
 0x1e9   :  { %2877 = vmatpush.bf16.msrb.mxu1 %v3486_v4 }
 0x1ea   :  { %v1712_v50 = vadd.f32 %v1711_v1, %v1543_v28  ;;  %v3784_v1 = vld [vmem:[#allocation7 + $0x20] sm:$0xff]   ;;  %v331_v28 = vunpack.c.3.s8 %v183_v47 }
 0x1eb   :  { %v3511_v12 = vunpack.c.l.bf16 %v3784_v1  ;;  %v3512_v18 = vunpack.c.h.bf16 %v3784_v1 }
 0x1ec   :  { %v2253_v37 = vadd.f32 %v2189_v57, %v1712_v50  ;;  %v4208_v3 = vpop.f32.mrf.mxu0  ;;  %v582_v57 = vcvt.s32.f32 %v326_v22  ;;  %v1381_v50 = vadd.f32 %v4179_v63, %v4125_v51  ;;  %v186_v51 = vld [vmem:[#allocation4 + $0xf0] sm:$0xff]  ;;  %v187_v63 = vld [vmem:[#allocation4 + $0xf8] sm:$0xff] }
 0x1ef   :  { %v1544_v46 = vpop.f32.mrf.mxu2 }
 0x1f0   :  { %v1713_v33 = vpop.f32.mrf.mxu3  ;;  %v1545_v10 = vadd.f32 %v1544_v46, %v4117_v16  ;;  %v330_v16 = vunpack.c.3.s8 %v182_v60  ;;  %v2192_v60 = vmul.f32 %v3512_v18, %v4168_v42  ;;  %v4216_v47 = vpop.f32.mrf.mxu1  ;;  %v339_v18 = vunpack.c.1.s8 %v187_v63 }
 0x1f2   :  { %v1714_v39 = vadd.f32 %v1713_v33, %v1545_v10  ;;  %v586_v33 = vcvt.s32.f32 %v330_v16  ;;  %v2191_v10 = vmul.f32 %v3511_v12, %v4168_v42  ;;  %v338_v12 = vunpack.c.1.s8 %v186_v51 }
 0x1f4   :  { %v2254_v35 = vadd.f32 %v2190_v43, %v1714_v39  ;;  %1586 = vmatmul.bf16.gmra.mxu2 %v782_v62  ;;  %v587_v43 = vcvt.s32.f32 %v331_v28  ;;  %v786_v0 = vpack.c.bf16 %v586_v33, %v582_v57  ;;  %v4218_v4 = vpop.f32.mrf.mxu0  ;;  %v334_v28 = vunpack.c.0.s8 %v186_v51 }
 0x1f5   :  { %1755 = vmatmul.bf16.gmra.mxu3 %v783_v2  ;;  %v1384_v57 = vadd.f32 %v4186_v17, %v4129_v61 }
 0x1f6   :  { %v2445_v31 = vpack.c.bf16 %v2254_v35, %v2253_v37  ;;  %v583_v35 = vcvt.s32.f32 %v327_v40 }
 0x1f7   :  { %v1547_v41 = vpop.f32.mrf.mxu2 }
 0x1f8   :  { %v1716_v55 = vpop.f32.mrf.mxu3  ;;  %2565 = vmatmul.bf16.gmra.mxu0 %v2445_v31  ;;  %v1548_v46 = vadd.f32 %v1547_v41, %v1379_v53  ;;  %v787_v37 = vpack.c.bf16 %v587_v43, %v583_v35  ;;  %v3785_v53 = vld [vmem:[#allocation7 + $0x28] sm:$0xff]  }
 0x1f9   :  { %v3515_v35 = vunpack.c.l.bf16 %v3785_v53  ;;  %v3516_v43 = vunpack.c.h.bf16 %v3785_v53 }
 0x1fa   :  { %v1717_v39 = vadd.f32 %v1716_v55, %v1548_v46  ;;  %v335_v55 = vunpack.c.0.s8 %v187_v63  ;;  %v4222_v46 = vpop.f32.mrf.mxu1 }
 0x1fb   :  { %v2194_v17 = vmul.f32 %v3516_v43, %v4168_v42  ;;  %v343_v43 = vunpack.c.2.s8 %v187_v63 }
 0x1fc   :  { %v2255_v41 = vadd.f32 %v2191_v10, %v1717_v39  ;;  %v4224_v33 = vpop.f32.mrf.mxu0  ;;  %v1386_v39 = vadd.f32 %v4194_v30, %v4133_v7  ;;  %v3485_v7 = vld [vmem:[#allocation10] sm:$0xff] }
 0x1fd   :  { %2878 = vmatpush.bf16.msrb.mxu1 %v3485_v7 }
 0x1ff   :  { %v1549_v62 = vpop.f32.mrf.mxu2 }
 0x200   :  { %v1718_v2 = vpop.f32.mrf.mxu3  ;;  %v1550_v34 = vadd.f32 %v1549_v62, %v1381_v50  ;;  %v590_v50 = vcvt.s32.f32 %v334_v28  ;;  %v594_v62 = vcvt.s32.f32 %v338_v12 }
 0x202   :  { %v1719_v31 = vadd.f32 %v1718_v2, %v1550_v34  ;;  %v591_v2 = vcvt.s32.f32 %v335_v55  ;;  %v2193_v34 = vmul.f32 %v3515_v35, %v4168_v42  ;;  %v4230_v53 = vpop.f32.mrf.mxu1  ;;  %v3786_v35 = vld [vmem:[#allocation7 + $0x30] sm:$0xff]  }
 0x204   :  { %v2256_v22 = vadd.f32 %v2192_v60, %v1719_v31  ;;  %1591 = vmatmul.bf16.gmra.mxu2 %v786_v0  ;;  %v595_v60 = vcvt.s32.f32 %v339_v18  ;;  %v4232_v12 = vpop.f32.mrf.mxu0 }
 0x205   :  { %1760 = vmatmul.bf16.gmra.mxu3 %v787_v37 }
 0x206   :  { %v2446_v1 = vpack.c.bf16 %v2256_v22, %v2255_v41  ;;  %v790_v41 = vpack.c.bf16 %v594_v62, %v590_v50  ;;  %v791_v22 = vpack.c.bf16 %v595_v60, %v591_v2  ;;  %v347_v50 = vunpack.c.3.s8 %v187_v63 }
 0x207   :  { %v1552_v16 = vpop.f32.mrf.mxu2  ;;  %v3519_v62 = vunpack.c.l.bf16 %v3786_v35  ;;  %v3520_v2 = vunpack.c.h.bf16 %v3786_v35 }
 0x208   :  { %v1721_v40 = vpop.f32.mrf.mxu3  ;;  %2570 = vmatmul.bf16.gmra.mxu0 %v2446_v1  ;;  %v1553_v10 = vadd.f32 %v1552_v16, %v1384_v57  ;;  %v342_v57 = vunpack.c.2.s8 %v186_v51 }
 0x20a   :  { %v1722_v61 = vadd.f32 %v1721_v40, %v1553_v10  ;;  %v346_v40 = vunpack.c.3.s8 %v186_v51  ;;  %v1389_v10 = vadd.f32 %v4198_v9, %v4137_v21  ;;  %v598_v60 = vcvt.s32.f32 %v342_v57 }
 0x20b   :  { %v2195_v51 = vmul.f32 %v3519_v62, %v4168_v42  ;;  %v2196_v21 = vmul.f32 %v3520_v2, %v4168_v42 }
 0x20c   :  { %v2257_v16 = vadd.f32 %v2193_v34, %v1722_v61  ;;  %v602_v34 = vcvt.s32.f32 %v346_v40  ;;  %v4238_v61 = vpop.f32.mrf.mxu1 }
 0x20f   :  { %v1554_v0 = vpop.f32.mrf.mxu2 }
 0x210   :  { %v1723_v37 = vpop.f32.mrf.mxu3  ;;  %v1555_v31 = vadd.f32 %v1554_v0, %v1386_v39  ;;  %v599_v0 = vcvt.s32.f32 %v343_v43 }
 0x212   :  { %v1724_v1 = vadd.f32 %v1723_v37, %v1555_v31  ;;  %v603_v37 = vcvt.s32.f32 %v347_v50  ;;  %v4240_v31 = vpop.f32.mrf.mxu0  ;;  %v3787_v50 = vld [vmem:[#allocation7 + $0x38] sm:$0xff]  }
 0x214   :  { %v2258_v28 = vadd.f32 %v2194_v17, %v1724_v1  ;;  %1596 = vmatmul.bf16.gmra.mxu2 %v790_v41  ;;  %v1391_v17 = vadd.f32 %v4206_v38, %v4143_v54  ;;  %v794_v1 = vpack.c.bf16 %v602_v34, %v598_v60  ;;  %v190_v54 = vld [vmem:[#allocation4 + $0x110] sm:$0xff]  ;;  %v191_v38 = vld [vmem:[#allocation4 + $0x118] sm:$0xff]  ;;  %v4244_v43 = vpop.f32.mrf.mxu1  ;;  %v1394_v60 = vadd.f32 %v4216_v47, %v4147_v32 }
 0x215   :  { %1765 = vmatmul.bf16.gmra.mxu3 %v791_v22  ;;  %v350_v40 = vunpack.c.0.s8 %v190_v54  ;;  %v355_v62 = vunpack.c.1.s8 %v191_v38  ;;  %v3524_v34 = vunpack.c.h.bf16 %v3787_v50 }
 0x216   :  { %v2447_v30 = vpack.c.bf16 %v2258_v28, %v2257_v16  ;;  %v795_v16 = vpack.c.bf16 %v603_v37, %v599_v0 }
 0x217   :  { %v1557_v55 = vpop.f32.mrf.mxu2  ;;  %v606_v0 = vcvt.s32.f32 %v350_v40 }
 0x218   :  { %v1726_v18 = vpop.f32.mrf.mxu3  ;;  %2575 = vmatmul.bf16.gmra.mxu0 %v2447_v30  ;;  %v1558_v39 = vadd.f32 %v1557_v55, %v1389_v10  ;;  %v354_v10 = vunpack.c.1.s8 %v190_v54 }
 0x21a   :  { %v1727_v9 = vadd.f32 %v1726_v18, %v1558_v39  ;;  %v351_v18 = vunpack.c.0.s8 %v191_v38  ;;  %v4246_v2 = vpop.f32.mrf.mxu0  ;;  %v3523_v39 = vunpack.c.l.bf16 %v3787_v50 }
 0x21c   :  { %v2259_v7 = vadd.f32 %v2195_v51, %v1727_v9  ;;  %v607_v51 = vcvt.s32.f32 %v351_v18  ;;  %v4254_v47 = vpop.f32.mrf.mxu1  ;;  %v3788_v18 = vld [vmem:[#allocation7 + $0x40] sm:$0xff]  }
 0x21f   :  { %v1559_v63 = vpop.f32.mrf.mxu2 }
 0x220   :  { %v1728_v41 = vpop.f32.mrf.mxu3  ;;  %v1560_v22 = vadd.f32 %v1559_v63, %v1391_v17  ;;  %v610_v17 = vcvt.s32.f32 %v354_v10  ;;  %v611_v63 = vcvt.s32.f32 %v355_v62  ;;  %v358_v10 = vunpack.c.2.s8 %v190_v54 }
 0x221   :  { %v362_v62 = vunpack.c.3.s8 %v190_v54 }
 0x222   :  { %v1729_v28 = vadd.f32 %v1728_v41, %v1560_v22  ;;  %v1396_v41 = vadd.f32 %v4222_v46, %v4151_v27  ;;  %v799_v32 = vpack.c.bf16 %v611_v63, %v607_v51 }
 0x223   :  { %v618_v63 = vcvt.s32.f32 %v362_v62  ;;  %v3789_v62 = vld [vmem:[#allocation7 + $0x48] sm:$0xff]  }
 0x224   :  { %v2260_v30 = vadd.f32 %v2196_v21, %v1729_v28  ;;  %1601 = vmatmul.bf16.gmra.mxu2 %v794_v1  ;;  %v2197_v21 = vmul.f32 %v3523_v39, %v4168_v42  ;;  %v2198_v1 = vmul.f32 %v3524_v34, %v4168_v42  ;;  %v1399_v39 = vadd.f32 %v4230_v53, %v4155_v14 }
 0x225   :  { %1770 = vmatmul.bf16.gmra.mxu3 %v795_v16  ;;  %v3527_v34 = vunpack.c.l.bf16 %v3788_v18 }
 0x226   :  { %v2448_v55 = vpack.c.bf16 %v2260_v30, %v2259_v7  ;;  %v798_v7 = vpack.c.bf16 %v610_v17, %v606_v0  ;;  %v3528_v0 = vunpack.c.h.bf16 %v3788_v18  ;;  %v4260_v17 = vpop.f32.mrf.mxu1 }
 0x227   :  { %v1562_v57 = vpop.f32.mrf.mxu2  ;;  %v2199_v54 = vmul.f32 %v3527_v34, %v4168_v42  ;;  %v4271_v34 = vld [vmem:[%s4474_s4] ss:$0 sm:$0xff] }
 0x228   :  { %v1731_v35 = vpop.f32.mrf.mxu3  ;;  %2580 = vmatmul.bf16.gmra.mxu0 %v2448_v55  ;;  %v1563_v37 = vadd.f32 %v1562_v57, %v1394_v60  ;;  %v4256_v55 = vpop.f32.mrf.mxu0  ;;  %v363_v60 = vunpack.c.3.s8 %v191_v38  ;;  %v2200_v14 = vmul.f32 %v3528_v0, %v4168_v42  ;;  %v1404_v0 = vadd.f32 %v4244_v43, %v4166_v49 }
 0x22a   :  { %v1732_v16 = vadd.f32 %v1731_v35, %v1563_v37  ;;  %v359_v35 = vunpack.c.2.s8 %v191_v38  ;;  %v614_v37 = vcvt.s32.f32 %v358_v10 }
 0x22c   :  { %v2261_v57 = vadd.f32 %v2197_v21, %v1732_v16  ;;  %v619_v21 = vcvt.s32.f32 %v363_v60 }
 0x22e   :  { %v1410_v10 = vpop.f32.mrf.mxu1 }
 0x22f   :  { %v1564_v9 = vpop.f32.mrf.mxu2 }
 0x230   :  { %v1733_v22 = vpop.f32.mrf.mxu3  ;;  %v1565_v28 = vadd.f32 %v1564_v9, %v1396_v41  ;;  %v615_v41 = vcvt.s32.f32 %v359_v35  ;;  %v4262_v9 = vpop.f32.mrf.mxu0 }
 0x232   :  { %v1734_v30 = vadd.f32 %v1733_v22, %v1565_v28  ;;  %v1401_v22 = vadd.f32 %v4238_v61, %v4161_v8  ;;  %v802_v28 = vpack.c.bf16 %v618_v63, %v614_v37  ;;  %v3531_v37 = vunpack.c.l.bf16 %v3789_v62 }
 0x234   :  { %v2262_v40 = vadd.f32 %v2198_v1, %v1734_v30  ;;  %1606 = vmatmul.bf16.gmra.mxu2 %v798_v7  ;;  %v803_v7 = vpack.c.bf16 %v619_v21, %v615_v41 }
 0x235   :  { %1775 = vmatmul.bf16.gmra.mxu3 %v799_v32 }
 0x236   :  { %v2449_v27 = vpack.c.bf16 %v2262_v40, %v2261_v57  ;;  %v194_v40 = vld [vmem:[#allocation4 + $0x130] sm:$0xff] }
 0x237   :  { %v1567_v46 = vpop.f32.mrf.mxu2  ;;  %v366_v35 = vunpack.c.0.s8 %v194_v40  ;;  %v370_v60 = vunpack.c.1.s8 %v194_v40 }
 0x238   :  { %v1736_v50 = vpop.f32.mrf.mxu3  ;;  %2585 = vmatmul.bf16.gmra.mxu0 %v2449_v27  ;;  %v1568_v51 = vadd.f32 %v1567_v46, %v1399_v39  ;;  %v195_v27 = vld [vmem:[#allocation4 + $0x138] sm:$0xff] }
 0x239   :  { %v367_v39 = vunpack.c.0.s8 %v195_v27  ;;  %v622_v63 = vcvt.s32.f32 %v366_v35  ;;  %v626_v41 = vcvt.s32.f32 %v370_v60 }
 0x23a   :  { %v1737_v53 = vadd.f32 %v1736_v50, %v1568_v51  ;;  %v371_v50 = vunpack.c.1.s8 %v195_v27  ;;  %v3532_v51 = vunpack.c.h.bf16 %v3789_v62 }
 0x23b   :  { %v623_v21 = vcvt.s32.f32 %v367_v39  ;;  %v806_v43 = vpack.c.bf16 %v626_v41, %v622_v63  ;;  %v378_v63 = vunpack.c.3.s8 %v194_v40  ;;  %v375_v41 = vunpack.c.2.s8 %v195_v27 }
 0x23c   :  { %v2263_v30 = vadd.f32 %v2199_v54, %v1737_v53  ;;  %v2202_v49 = vmul.f32 %v3532_v51, %v4168_v42  ;;  %v374_v51 = vunpack.c.2.s8 %v194_v40 }
 0x23f   :  { %v1569_v38 = vpop.f32.mrf.mxu2 }
 0x240   :  { %v1738_v1 = vpop.f32.mrf.mxu3  ;;  %v1570_v16 = vadd.f32 %v1569_v38, %v1401_v22  ;;  %v627_v22 = vcvt.s32.f32 %v371_v50 }
 0x242   :  { %v1739_v32 = vadd.f32 %v1738_v1, %v1570_v16  ;;  %v2201_v16 = vmul.f32 %v3531_v37, %v4168_v42  ;;  %v3790_v37 = vld [vmem:[#allocation7 + $0x50] sm:$0xff]  }
 0x244   :  { %v2264_v57 = vadd.f32 %v2200_v14, %v1739_v32  ;;  %1611 = vmatmul.bf16.gmra.mxu2 %v802_v28  ;;  %v1406_v14 = vadd.f32 %v4254_v47, %v4176_v6  ;;  %v807_v32 = vpack.c.bf16 %v627_v22, %v623_v21  ;;  %v379_v21 = vunpack.c.3.s8 %v195_v27 }
 0x245   :  { %1780 = vmatmul.bf16.gmra.mxu3 %v803_v7  ;;  %v2551_v46 = vpop.f32.mrf.mxu0 }
 0x246   :  { %v2450_v8 = vpack.c.bf16 %v2264_v57, %v2263_v30  ;;  %v2552_v54 = vadd.f32 %v4271_v34, %v2551_v46  ;;  %v4281_v30 = vpop.f32.mrf.mxu1 }
 0x247   :  { %v1572_v61 = vpop.f32.mrf.mxu2 }
 0x248   :  { %v1741_v18 = vpop.f32.mrf.mxu3  ;;  %2590 = vmatmul.bf16.gmra.mxu0 %v2450_v8  ;;  %v1573_v38 = vadd.f32 %v1572_v61, %v1404_v0  ;;  %v2711_v57 = vmax.f32 %v2552_v54, 0.0  ;;  %v3535_v54 = vunpack.c.l.bf16 %v3790_v37 }
 0x24a   :  { %v1742_v8 = vadd.f32 %v1741_v18, %v1573_v38  ;;  %v1409_v18 = vadd.f32 %v4260_v17, %v4181_v25  ;;  %v3536_v38 = vunpack.c.h.bf16 %v3790_v37  ;;  %v2203_v27 = vmul.f32 %v3535_v54, %v4168_v42 }
 0x24c   :  { %v2265_v60 = vadd.f32 %v2201_v16, %v1742_v8  ;;  %v635_v16 = vcvt.s32.f32 %v379_v21  ;;  %v2204_v25 = vmul.f32 %v3536_v38, %v4168_v42  ;;  %v3791_v21 = vld [vmem:[#allocation7 + $0x58] sm:$0xff]  }
 0x24d   :  { %v2553_v1 = vpop.f32.mrf.mxu0 }
 0x24e   :  { %v2554_v53 = vadd.f32 %v4271_v34, %v2553_v1  ;;  %v1415_v22 = vpop.f32.mrf.mxu1  ;;  %v630_v1 = vcvt.s32.f32 %v374_v51 }
 0x24f   :  { %v1574_v28 = vpop.f32.mrf.mxu2 }
 0x250   :  { %v1743_v7 = vpop.f32.mrf.mxu3  ;;  %v2712_v46 = vmax.f32 %v2554_v53, 0.0  ;;  %v1575_v61 = vadd.f32 %v1574_v28, %v1406_v14  ;;  %v634_v14 = vcvt.s32.f32 %v378_v63  ;;  %v631_v53 = vcvt.s32.f32 %v375_v41 }
 0x252   :  { %v2775_v62 = vpack.c.bf16 %v2712_v46, %v2711_v57  ;;  %v1744_v35 = vadd.f32 %v1743_v7, %v1575_v61  ;;  %v810_v17 = vpack.c.bf16 %v634_v14, %v630_v1  ;;  %v811_v8 = vpack.c.bf16 %v635_v16, %v631_v53 }
 0x253   :  { %v1414_v1 = vadd.f32 %v4281_v30, %v4196_v36  ;;  %v3539_v14 = vunpack.c.l.bf16 %v3791_v21  ;;  %v3540_v53 = vunpack.c.h.bf16 %v3791_v21 }
 0x254   :  { %v2266_v6 = vadd.f32 %v2202_v49, %v1744_v35  ;;  %1616 = vmatmul.bf16.gmra.mxu2 %v806_v43  ;;  %2879 = vmatmul.bf16.vlgmr.msrb.gmra.mxu1 %v2775_v62  ;;  %v1411_v43 = vadd.f32 %v1410_v10, %v4188_v20  ;;  %v198_v20 = vld [vmem:[#allocation4 + $0x150] sm:$0xff]  ;;  %v199_v10 = vld [vmem:[#allocation4 + $0x158] sm:$0xff] }
 0x255   :  { %1785 = vmatmul.bf16.gmra.mxu3 %v807_v32  ;;  %v2556_v47 = vpop.f32.mrf.mxu0  ;;  %v386_v54 = vunpack.c.1.s8 %v198_v20  ;;  %v387_v38 = vunpack.c.1.s8 %v199_v10  ;;  %v2206_v36 = vmul.f32 %v3540_v53, %v4168_v42 }
 0x256   :  { %v2451_v39 = vpack.c.bf16 %v2266_v6, %v2265_v60  ;;  %v2557_v28 = vadd.f32 %v4271_v34, %v2556_v47  ;;  %v1418_v47 = vpop.f32.mrf.mxu1 }
 0x257   :  { %v1577_v50 = vpop.f32.mrf.mxu2 }
 0x258   :  { %v1746_v0 = vpop.f32.mrf.mxu3  ;;  %2595 = vmatmul.bf16.gmra.mxu0 %v2451_v39  ;;  %v1578_v7 = vadd.f32 %v1577_v50, %v1409_v18  ;;  %v2713_v46 = vmax.f32 %v2557_v28, 0.0  ;;  %v382_v18 = vunpack.c.0.s8 %v198_v20  ;;  %v642_v28 = vcvt.s32.f32 %v386_v54 }
 0x259   :  { %v390_v54 = vunpack.c.2.s8 %v198_v20 }
 0x25a   :  { %v1747_v61 = vadd.f32 %v1746_v0, %v1578_v7  ;;  %v383_v0 = vunpack.c.0.s8 %v199_v10  ;;  %v638_v16 = vcvt.s32.f32 %v382_v18  ;;  %v3792_v18 = vld [vmem:[#allocation7 + $0x60] sm:$0xff]  }
 0x25b   :  { %v3543_v53 = vunpack.c.l.bf16 %v3792_v18 }
 0x25c   :  { %v2267_v39 = vadd.f32 %v2203_v27, %v1747_v61  ;;  %v639_v7 = vcvt.s32.f32 %v383_v0  ;;  %v814_v30 = vpack.c.bf16 %v642_v28, %v638_v16  ;;  %v394_v0 = vunpack.c.3.s8 %v198_v20 }
 0x25d   :  { %v2558_v49 = vpop.f32.mrf.mxu0  ;;  %v3544_v16 = vunpack.c.h.bf16 %v3792_v18  ;;  %v646_v28 = vcvt.s32.f32 %v390_v54 }
 0x25e   :  { %v2559_v40 = vadd.f32 %v4271_v34, %v2558_v49  ;;  %v643_v49 = vcvt.s32.f32 %v387_v38  ;;  %v391_v38 = vunpack.c.2.s8 %v199_v10 }
 0x25f   :  { %v1579_v32 = vpop.f32.mrf.mxu2 }
 0x260   :  { %v1748_v57 = vpop.f32.mrf.mxu3  ;;  %v2714_v62 = vmax.f32 %v2559_v40, 0.0  ;;  %v1580_v35 = vadd.f32 %v1579_v32, %v1411_v43  ;;  %v1416_v32 = vadd.f32 %v1415_v22, %v4201_v19  ;;  %v815_v61 = vpack.c.bf16 %v643_v49, %v639_v7 }
 0x261   :  { %v650_v7 = vcvt.s32.f32 %v394_v0  ;;  %v647_v49 = vcvt.s32.f32 %v391_v38 }
 0x262   :  { %v1749_v60 = vadd.f32 %v1748_v57, %v1580_v35  ;;  %v2776_v6 = vpack.c.bf16 %v2714_v62, %v2713_v46  ;;  %v1420_v57 = vpop.f32.mrf.mxu1 }
 0x264   :  { %v2268_v50 = vadd.f32 %v2204_v25, %v1749_v60  ;;  %1621 = vmatmul.bf16.gmra.mxu2 %v810_v17  ;;  %2884 = vmatmul.bf16.gmra.mxu1 %v2776_v6  ;;  %v2205_v17 = vmul.f32 %v3539_v14, %v4168_v42 }
 0x265   :  { %1790 = vmatmul.bf16.gmra.mxu3 %v811_v8  ;;  %v2561_v37 = vpop.f32.mrf.mxu0 }
 0x266   :  { %v2452_v51 = vpack.c.bf16 %v2268_v50, %v2267_v39  ;;  %v2562_v43 = vadd.f32 %v4271_v34, %v2561_v37 }
 0x267   :  { %v1582_v63 = vpop.f32.mrf.mxu2 }
 0x268   :  { %v1751_v41 = vpop.f32.mrf.mxu3  ;;  %2600 = vmatmul.bf16.gmra.mxu0 %v2452_v51  ;;  %v1583_v40 = vadd.f32 %v1582_v63, %v1414_v1  ;;  %v2715_v62 = vmax.f32 %v2562_v43, 0.0  ;;  %v395_v1 = vunpack.c.3.s8 %v199_v10  ;;  %v2207_v10 = vmul.f32 %v3543_v53, %v4168_v42 }
 0x26a   :  { %v1752_v35 = vadd.f32 %v1751_v41, %v1583_v40  ;;  %v1423_v14 = vpop.f32.mrf.mxu1  ;;  %v1419_v41 = vadd.f32 %v1418_v47, %v4208_v3  ;;  %v651_v43 = vcvt.s32.f32 %v395_v1  ;;  %v2208_v3 = vmul.f32 %v3544_v16, %v4168_v42 }
 0x26b   :  { %v818_v47 = vpack.c.bf16 %v650_v7, %v646_v28  ;;  %v1424_v38 = vadd.f32 %v1423_v14, %v4224_v33 }
 0x26c   :  { %v2269_v37 = vadd.f32 %v2205_v17, %v1752_v35 }
 0x26d   :  { %v2563_v27 = vpop.f32.mrf.mxu0 }
 0x26e   :  { %v2564_v25 = vadd.f32 %v4271_v34, %v2563_v27 }
 0x26f   :  { %v1584_v8 = vpop.f32.mrf.mxu2 }
 0x270   :  { %v1753_v46 = vpop.f32.mrf.mxu3  ;;  %v2716_v60 = vmax.f32 %v2564_v25, 0.0  ;;  %v1585_v6 = vadd.f32 %v1584_v8, %v1416_v32  ;;  %v1421_v25 = vadd.f32 %v1420_v57, %v4218_v4  ;;  %v202_v4 = vld [vmem:[#allocation4 + $0x170] sm:$0xff]  ;;  %v203_v57 = vld [vmem:[#allocation4 + $0x178] sm:$0xff] }
 0x271   :  { %v398_v18 = vunpack.c.0.s8 %v202_v4  ;;  %v402_v54 = vunpack.c.1.s8 %v202_v4  ;;  %v403_v0 = vunpack.c.1.s8 %v203_v57 }
 0x272   :  { %v1754_v39 = vadd.f32 %v1753_v46, %v1585_v6  ;;  %v2777_v50 = vpack.c.bf16 %v2716_v60, %v2715_v62  ;;  %v819_v46 = vpack.c.bf16 %v651_v43, %v647_v49  ;;  %v1425_v35 = vpop.f32.mrf.mxu1 }
 0x273   :  { %v654_v53 = vcvt.s32.f32 %v398_v18  ;;  %v658_v16 = vcvt.s32.f32 %v402_v54  ;;  %v659_v7 = vcvt.s32.f32 %v403_v0  ;;  %v411_v18 = vunpack.c.3.s8 %v203_v57 }
 0x274   :  { %v2270_v51 = vadd.f32 %v2206_v36, %v1754_v39  ;;  %1626 = vmatmul.bf16.gmra.mxu2 %v814_v30  ;;  %2889 = vmatmul.bf16.gmra.mxu1 %v2777_v50 }
 0x275   :  { %1795 = vmatmul.bf16.gmra.mxu3 %v815_v61  ;;  %v2566_v19 = vpop.f32.mrf.mxu0  ;;  %v822_v14 = vpack.c.bf16 %v658_v16, %v654_v53 }
 0x276   :  { %v2453_v22 = vpack.c.bf16 %v2270_v51, %v2269_v37  ;;  %v2567_v40 = vadd.f32 %v4271_v34, %v2566_v19 }
 0x277   :  { %v1587_v63 = vpop.f32.mrf.mxu2 }
 0x278   :  { %v1756_v21 = vpop.f32.mrf.mxu3  ;;  %2605 = vmatmul.bf16.gmra.mxu0 %v2453_v22  ;;  %v1588_v27 = vadd.f32 %v1587_v63, %v1419_v41  ;;  %v2717_v36 = vmax.f32 %v2567_v40, 0.0  ;;  %v3793_v63 = vld [vmem:[#allocation7 + $0x68] sm:$0xff]  }
 0x279   :  { %v3547_v1 = vunpack.c.l.bf16 %v3793_v63  ;;  %v3548_v41 = vunpack.c.h.bf16 %v3793_v63  ;;  %v407_v63 = vunpack.c.2.s8 %v203_v57 }
 0x27a   :  { %v1757_v30 = vadd.f32 %v1756_v21, %v1588_v27  ;;  %v399_v21 = vunpack.c.0.s8 %v203_v57  ;;  %v1428_v49 = vpop.f32.mrf.mxu1 }
 0x27b   :  { %v2210_v33 = vmul.f32 %v3548_v41, %v4168_v42  ;;  %v667_v41 = vcvt.s32.f32 %v411_v18 }
 0x27c   :  { %v2271_v39 = vadd.f32 %v2207_v10, %v1757_v30  ;;  %v655_v28 = vcvt.s32.f32 %v399_v21 }
 0x27d   :  { %v2568_v32 = vpop.f32.mrf.mxu0 }
 0x27e   :  { %v2569_v20 = vadd.f32 %v4271_v34, %v2568_v32  ;;  %v1426_v32 = vadd.f32 %v1425_v35, %v4232_v12 }
 0x27f   :  { %v1589_v17 = vpop.f32.mrf.mxu2 }
 0x280   :  { %v1758_v8 = vpop.f32.mrf.mxu3  ;;  %v2718_v61 = vmax.f32 %v2569_v20, 0.0  ;;  %v1590_v62 = vadd.f32 %v1589_v17, %v1421_v25  ;;  %v2209_v20 = vmul.f32 %v3547_v1, %v4168_v42  ;;  %v663_v1 = vcvt.s32.f32 %v407_v63 }
 0x282   :  { %v1759_v60 = vadd.f32 %v1758_v8, %v1590_v62  ;;  %v2778_v6 = vpack.c.bf16 %v2718_v61, %v2717_v36  ;;  %v823_v8 = vpack.c.bf16 %v659_v7, %v655_v28  ;;  %v1430_v35 = vpop.f32.mrf.mxu1 }
 0x283   :  { %v1431_v7 = vadd.f32 %v1430_v35, %v4246_v2  ;;  %v206_v2 = vld [vmem:[#allocation4 + $0x190] sm:$0xff] }
 0x284   :  { %v2272_v50 = vadd.f32 %v2208_v3, %v1759_v60  ;;  %1631 = vmatmul.bf16.gmra.mxu2 %v818_v47  ;;  %2894 = vmatmul.bf16.gmra.mxu1 %v2778_v6 }
 0x285   :  { %1800 = vmatmul.bf16.gmra.mxu3 %v819_v46  ;;  %v2571_v37 = vpop.f32.mrf.mxu0 }
 0x286   :  { %v2454_v51 = vpack.c.bf16 %v2272_v50, %v2271_v39  ;;  %v2572_v43 = vadd.f32 %v4271_v34, %v2571_v37  ;;  %v3794_v37 = vld [vmem:[#allocation7 + $0x70] sm:$0xff]  }
 0x287   :  { %v1592_v19 = vpop.f32.mrf.mxu2  ;;  %v3551_v54 = vunpack.c.l.bf16 %v3794_v37  ;;  %v3552_v21 = vunpack.c.h.bf16 %v3794_v37 }
 0x288   :  { %v1761_v22 = vpop.f32.mrf.mxu3  ;;  %2610 = vmatmul.bf16.gmra.mxu0 %v2454_v51  ;;  %v1593_v40 = vadd.f32 %v1592_v19, %v1424_v38  ;;  %v2719_v3 = vmax.f32 %v2572_v43, 0.0  ;;  %v406_v51 = vunpack.c.2.s8 %v202_v4  ;;  %v410_v19 = vunpack.c.3.s8 %v202_v4 }
 0x289   :  { %v2211_v4 = vmul.f32 %v3551_v54, %v4168_v42 }
 0x28a   :  { %v1762_v47 = vadd.f32 %v1761_v22, %v1593_v40  ;;  %v1429_v22 = vadd.f32 %v1428_v49, %v4240_v31  ;;  %v662_v0 = vcvt.s32.f32 %v406_v51  ;;  %v666_v38 = vcvt.s32.f32 %v410_v19 }
 0x28b   :  { %v2212_v31 = vmul.f32 %v3552_v21, %v4168_v42 }
 0x28c   :  { %v2273_v62 = vadd.f32 %v2209_v20, %v1762_v47  ;;  %v826_v49 = vpack.c.bf16 %v666_v38, %v662_v0  ;;  %v207_v47 = vld [vmem:[#allocation4 + $0x198] sm:$0xff] }
 0x28d   :  { %v2573_v27 = vpop.f32.mrf.mxu0  ;;  %v415_v35 = vunpack.c.0.s8 %v207_v47 }
 0x28e   :  { %v2574_v25 = vadd.f32 %v4271_v34, %v2573_v27  ;;  %v827_v27 = vpack.c.bf16 %v667_v41, %v663_v1 }
 0x28f   :  { %v1594_v10 = vpop.f32.mrf.mxu2  ;;  %v671_v18 = vcvt.s32.f32 %v415_v35 }
 0x290   :  { %v1763_v17 = vpop.f32.mrf.mxu3  ;;  %v2720_v46 = vmax.f32 %v2574_v25, 0.0  ;;  %v1595_v36 = vadd.f32 %v1594_v10, %v1426_v32 }
 0x292   :  { %v1764_v30 = vadd.f32 %v1763_v17, %v1595_v36  ;;  %v2779_v61 = vpack.c.bf16 %v2720_v46, %v2719_v3  ;;  %v1433_v17 = vpop.f32.mrf.mxu1 }
 0x294   :  { %v2274_v60 = vadd.f32 %v2210_v33, %v1764_v30  ;;  %1636 = vmatmul.bf16.gmra.mxu2 %v822_v14  ;;  %2899 = vmatmul.bf16.gmra.mxu1 %v2779_v61 }
 0x295   :  { %1805 = vmatmul.bf16.gmra.mxu3 %v823_v8  ;;  %v2576_v12 = vpop.f32.mrf.mxu0 }
 0x296   :  { %v2455_v6 = vpack.c.bf16 %v2274_v60, %v2273_v62  ;;  %v2577_v53 = vadd.f32 %v4271_v34, %v2576_v12  ;;  %v3795_v62 = vld [vmem:[#allocation7 + $0x78] sm:$0xff]   ;;  %v414_v60 = vunpack.c.0.s8 %v206_v2  ;;  %v418_v12 = vunpack.c.1.s8 %v206_v2 }
 0x297   :  { %v1597_v39 = vpop.f32.mrf.mxu2  ;;  %v3556_v37 = vunpack.c.h.bf16 %v3795_v62 }
 0x298   :  { %v1766_v50 = vpop.f32.mrf.mxu3  ;;  %2615 = vmatmul.bf16.gmra.mxu0 %v2455_v6  ;;  %v1598_v16 = vadd.f32 %v1597_v39, %v1429_v22  ;;  %v2721_v32 = vmax.f32 %v2577_v53, 0.0  ;;  %v419_v6 = vunpack.c.1.s8 %v207_v47  ;;  %v1434_v39 = vadd.f32 %v1433_v17, %v4256_v55  ;;  %v3796_v17 = vld [vmem:[#allocation7 + $0x80] sm:$0xff]  }
 0x299   :  { %v670_v19 = vcvt.s32.f32 %v414_v60  ;;  %v674_v63 = vcvt.s32.f32 %v418_v12  ;;  %v2214_v55 = vmul.f32 %v3556_v37, %v4168_v42 }
 0x29a   :  { %v1767_v25 = vadd.f32 %v1766_v50, %v1598_v16  ;;  %v3555_v50 = vunpack.c.l.bf16 %v3795_v62  ;;  %v1435_v51 = vpop.f32.mrf.mxu1  ;;  %v675_v22 = vcvt.s32.f32 %v419_v6 }
 0x29b   :  { %v1436_v38 = vadd.f32 %v1435_v51, %v4262_v9 }
 0x29c   :  { %v2275_v8 = vadd.f32 %v2211_v4, %v1767_v25  ;;  %v2213_v41 = vmul.f32 %v3555_v50, %v4168_v42 }
 0x29d   :  { %v2578_v28 = vpop.f32.mrf.mxu0 }
 0x29e   :  { %v2579_v43 = vadd.f32 %v4271_v34, %v2578_v28  ;;  %v830_v28 = vpack.c.bf16 %v674_v63, %v670_v19 }
 0x29f   :  { %v1599_v57 = vpop.f32.mrf.mxu2 }
 0x2a0   :  { %v1768_v40 = vpop.f32.mrf.mxu3  ;;  %v2722_v20 = vmax.f32 %v2579_v43, 0.0  ;;  %v1600_v10 = vadd.f32 %v1599_v57, %v1431_v7  ;;  %v831_v7 = vpack.c.bf16 %v675_v22, %v671_v18 }
 0x2a2   :  { %v1769_v33 = vadd.f32 %v1768_v40, %v1600_v10  ;;  %v2780_v14 = vpack.c.bf16 %v2722_v20, %v2721_v32 }
 0x2a4   :  { %v2276_v3 = vadd.f32 %v2212_v31, %v1769_v33  ;;  %1641 = vmatmul.bf16.gmra.mxu2 %v826_v49  ;;  %2904 = vmatmul.bf16.gmra.mxu1 %v2780_v14  ;;  %v422_v33 = vunpack.c.2.s8 %v206_v2  ;;  %v426_v14 = vunpack.c.3.s8 %v206_v2 }
 0x2a5   :  { %1810 = vmatmul.bf16.gmra.mxu3 %v827_v27  ;;  %v2581_v46 = vpop.f32.mrf.mxu0 }
 0x2a6   :  { %v2456_v36 = vpack.c.bf16 %v2276_v3, %v2275_v8  ;;  %v2582_v54 = vadd.f32 %v4271_v34, %v2581_v46  ;;  %v423_v8 = vunpack.c.2.s8 %v207_v47  ;;  %v427_v3 = vunpack.c.3.s8 %v207_v47 }
 0x2a7   :  { %v1602_v30 = vpop.f32.mrf.mxu2  ;;  %v3559_v46 = vunpack.c.l.bf16 %v3796_v17 }
 0x2a8   :  { %v1771_v61 = vpop.f32.mrf.mxu3  ;;  %2620 = vmatmul.bf16.gmra.mxu0 %v2456_v36  ;;  %v1603_v21 = vadd.f32 %v1602_v30, %v1434_v39  ;;  %v2723_v43 = vmax.f32 %v2582_v54, 0.0  ;;  %v3560_v36 = vunpack.c.h.bf16 %v3796_v17  ;;  %v678_v30 = vcvt.s32.f32 %v422_v33 }
 0x2a9   :  { %v679_v62 = vcvt.s32.f32 %v423_v8  ;;  %v683_v60 = vcvt.s32.f32 %v427_v3  ;;  %v2215_v50 = vmul.f32 %v3559_v46, %v4168_v42 }
 0x2aa   :  { %v1772_v4 = vadd.f32 %v1771_v61, %v1603_v21  ;;  %v682_v61 = vcvt.s32.f32 %v426_v14  ;;  %v2216_v47 = vmul.f32 %v3560_v36, %v4168_v42 }
 0x2ab   :  { %v835_v19 = vpack.c.bf16 %v683_v60, %v679_v62 }
 0x2ac   :  { %v2277_v27 = vadd.f32 %v2213_v41, %v1772_v4  ;;  %v834_v51 = vpack.c.bf16 %v682_v61, %v678_v30  ;;  %v211_v41 = vld [vmem:[#allocation4 + $0x1b8] sm:$0xff] }
 0x2ad   :  { %v2583_v0 = vpop.f32.mrf.mxu0 }
 0x2ae   :  { %v2584_v1 = vadd.f32 %v4271_v34, %v2583_v0 }
 0x2af   :  { %v1604_v53 = vpop.f32.mrf.mxu2 }
 0x2b0   :  { %v1773_v16 = vpop.f32.mrf.mxu3  ;;  %v2724_v57 = vmax.f32 %v2584_v1, 0.0  ;;  %v1605_v40 = vadd.f32 %v1604_v53, %v1436_v38  ;;  %v210_v1 = vld [vmem:[#allocation4 + $0x1b0] sm:$0xff] }
 0x2b1   :  { %v434_v4 = vunpack.c.1.s8 %v210_v1 }
 0x2b2   :  { %v1774_v31 = vadd.f32 %v1773_v16, %v1605_v40  ;;  %v2781_v49 = vpack.c.bf16 %v2724_v57, %v2723_v43  ;;  %v430_v43 = vunpack.c.0.s8 %v210_v1  ;;  %v431_v57 = vunpack.c.0.s8 %v211_v41 }
 0x2b3   :  { %v435_v40 = vunpack.c.1.s8 %v211_v41 }
 0x2b4   :  { %v2278_v32 = vadd.f32 %v2214_v55, %v1774_v31  ;;  %1646 = vmatmul.bf16.gmra.mxu2 %v830_v28  ;;  %2909 = vmatmul.bf16.gmra.mxu1 %v2781_v49  ;;  %v686_v49 = vcvt.s32.f32 %v430_v43 }
 0x2b5   :  { %1815 = vmatmul.bf16.gmra.mxu3 %v831_v7  ;;  %v2586_v9 = vpop.f32.mrf.mxu0  ;;  %v3797_v7 = vld [vmem:[#allocation7 + $0x88] sm:$0xff]  }
 0x2b6   :  { %v2457_v25 = vpack.c.bf16 %v2278_v32, %v2277_v27  ;;  %v2587_v12 = vadd.f32 %v4271_v34, %v2586_v9  ;;  %v3564_v31 = vunpack.c.h.bf16 %v3797_v7  ;;  %v690_v27 = vcvt.s32.f32 %v434_v4 }
 0x2b7   :  { %v1607_v20 = vpop.f32.mrf.mxu2  ;;  %v687_v32 = vcvt.s32.f32 %v431_v57  ;;  %v691_v9 = vcvt.s32.f32 %v435_v40 }
 0x2b8   :  { %v1776_v10 = vpop.f32.mrf.mxu3  ;;  %2625 = vmatmul.bf16.gmra.mxu0 %v2457_v25  ;;  %v1608_v35 = vadd.f32 %v1607_v20, %v4063_v29  ;;  %v2725_v63 = vmax.f32 %v2587_v12, 0.0  ;;  %v2218_v3 = vmul.f32 %v3564_v31, %v4168_v42  ;;  %v838_v46 = vpack.c.bf16 %v690_v27, %v686_v49 }
 0x2b9   :  { %v839_v36 = vpack.c.bf16 %v691_v9, %v687_v32 }
 0x2ba   :  { %v1777_v18 = vadd.f32 %v1776_v10, %v1608_v35 }
 0x2bc   :  { %v2279_v38 = vadd.f32 %v2215_v50, %v1777_v18  ;;  %v439_v18 = vunpack.c.2.s8 %v211_v41 }
 0x2bd   :  { %v2588_v6 = vpop.f32.mrf.mxu0 }
 0x2be   :  { %v2589_v39 = vadd.f32 %v4271_v34, %v2588_v6 }
 0x2bf   :  { %v1609_v37 = vpop.f32.mrf.mxu2 }
 0x2c0   :  { %v1778_v2 = vpop.f32.mrf.mxu3  ;;  %v2726_v22 = vmax.f32 %v2589_v39, 0.0  ;;  %v1610_v54 = vadd.f32 %v1609_v37, %v4065_v48  ;;  %v3563_v48 = vunpack.c.l.bf16 %v3797_v7 }
 0x2c2   :  { %v1779_v21 = vadd.f32 %v1778_v2, %v1610_v54  ;;  %v2782_v0 = vpack.c.bf16 %v2726_v22, %v2725_v63  ;;  %v2217_v33 = vmul.f32 %v3563_v48, %v4168_v42  ;;  %v438_v2 = vunpack.c.2.s8 %v210_v1  ;;  %v3798_v63 = vld [vmem:[#allocation7 + $0x90] sm:$0xff]  }
 0x2c3   :  { %v443_v22 = vunpack.c.3.s8 %v211_v41  ;;  %v3567_v54 = vunpack.c.l.bf16 %v3798_v63 }
 0x2c4   :  { %v2280_v29 = vadd.f32 %v2216_v47, %v1779_v21  ;;  %1651 = vmatmul.bf16.gmra.mxu2 %v834_v51  ;;  %2914 = vmatmul.bf16.gmra.mxu1 %v2782_v0  ;;  %v442_v47 = vunpack.c.3.s8 %v210_v1  ;;  %v3568_v21 = vunpack.c.h.bf16 %v3798_v63  ;;  %v694_v0 = vcvt.s32.f32 %v438_v2 }
 0x2c5   :  { %1820 = vmatmul.bf16.gmra.mxu3 %v835_v19  ;;  %v2591_v53 = vpop.f32.mrf.mxu0  ;;  %v2219_v41 = vmul.f32 %v3567_v54, %v4168_v42 }
 0x2c6   :  { %v2458_v16 = vpack.c.bf16 %v2280_v29, %v2279_v38  ;;  %v2592_v25 = vadd.f32 %v4271_v34, %v2591_v53  ;;  %v698_v38 = vcvt.s32.f32 %v442_v47  ;;  %v2220_v48 = vmul.f32 %v3568_v21, %v4168_v42 }
 0x2c7   :  { %v1612_v55 = vpop.f32.mrf.mxu2 }
 0x2c8   :  { %v1781_v28 = vpop.f32.mrf.mxu3  ;;  %2630 = vmatmul.bf16.gmra.mxu0 %v2458_v16  ;;  %v1613_v20 = vadd.f32 %v1612_v55, %v4067_v59  ;;  %v2727_v30 = vmax.f32 %v2592_v25, 0.0  ;;  %v695_v16 = vcvt.s32.f32 %v439_v18  ;;  %v699_v55 = vcvt.s32.f32 %v443_v22 }
 0x2c9   :  { %v842_v31 = vpack.c.bf16 %v698_v38, %v694_v0 }
 0x2ca   :  { %v1782_v61 = vadd.f32 %v1781_v28, %v1613_v20  ;;  %v843_v49 = vpack.c.bf16 %v699_v55, %v695_v16 }
 0x2cc   :  { %v2281_v59 = vadd.f32 %v2217_v33, %v1782_v61 }
 0x2cd   :  { %v2593_v10 = vpop.f32.mrf.mxu0 }
 0x2ce   :  { %v2594_v17 = vadd.f32 %v4271_v34, %v2593_v10 }
 0x2cf   :  { %v1614_v14 = vpop.f32.mrf.mxu2 }
 0x2d0   :  { %v1783_v8 = vpop.f32.mrf.mxu3  ;;  %v2728_v62 = vmax.f32 %v2594_v17, 0.0  ;;  %v1615_v60 = vadd.f32 %v1614_v14, %v4069_v13  ;;  %v4339_v17 = vld [vmem:[#allocation4 + $0x1d0] sm:$0xff] }
 0x2d1   :  { %v2880_v35 = vpop.f32.mrf.mxu1 }
 0x2d2   :  { %v1784_v12 = vadd.f32 %v1783_v8, %v1615_v60  ;;  %v2783_v6 = vpack.c.bf16 %v2728_v62, %v2727_v30  ;;  %v3040_v29 = vmax.f32 %v2880_v35, 0.0  ;;  %v4341_v8 = vld [vmem:[#allocation4 + $0x1d8] sm:$0xff]  ;;  %v450_v30 = vunpack.c.1.s8 %v4339_v17 }
 0x2d3   :  { %v3799_v62 = vld [vmem:[#allocation7 + $0x98] sm:$0xff]   ;;  %v447_v60 = vunpack.c.0.s8 %v4341_v8 }
 0x2d4   :  { %v2282_v39 = vadd.f32 %v2218_v3, %v1784_v12  ;;  %1656 = vmatmul.bf16.gmra.mxu2 %v838_v46  ;;  %2919 = vmatmul.bf16.gmra.mxu1 %v2783_v6  ;;  %v451_v12 = vunpack.c.1.s8 %v4341_v8  ;;  %v3571_v35 = vunpack.c.l.bf16 %v3799_v62 }
 0x2d5   :  { %1825 = vmatmul.bf16.gmra.mxu3 %v839_v36  ;;  %v2596_v50 = vpop.f32.mrf.mxu0  ;;  %v446_v36 = vunpack.c.0.s8 %v4339_v17  ;;  %v703_v47 = vcvt.s32.f32 %v447_v60 }
 0x2d6   :  { %v2459_v37 = vpack.c.bf16 %v2282_v39, %v2281_v59  ;;  %v2597_v28 = vadd.f32 %v4271_v34, %v2596_v50  ;;  %v3572_v59 = vunpack.c.h.bf16 %v3799_v62  ;;  %v706_v50 = vcvt.s32.f32 %v450_v30 }
 0x2d7   :  { %v1617_v51 = vpop.f32.mrf.mxu2  ;;  %v702_v39 = vcvt.s32.f32 %v446_v36 }
 0x2d8   :  { %v1786_v19 = vpop.f32.mrf.mxu3  ;;  %2635 = vmatmul.bf16.gmra.mxu0 %v2459_v37  ;;  %v1618_v7 = vadd.f32 %v1617_v51, %v4071_v24  ;;  %v2729_v27 = vmax.f32 %v2597_v28, 0.0  ;;  %v707_v51 = vcvt.s32.f32 %v451_v12  ;;  %v2222_v38 = vmul.f32 %v3572_v59, %v4168_v42 }
 0x2d9   :  { %v2882_v13 = vpop.f32.mrf.mxu1 }
 0x2da   :  { %v3041_v53 = vmax.f32 %v2882_v13, 0.0  ;;  %v1787_v32 = vadd.f32 %v1786_v19, %v1618_v7  ;;  %v2221_v13 = vmul.f32 %v3571_v35, %v4168_v42 }
 0x2dc   :  { %v3624_v1 = vpack.c.bf16 %v3041_v53, %v3040_v29  ;;  %v2283_v33 = vadd.f32 %v2219_v41, %v1787_v32  ;;  %v846_v29 = vpack.c.bf16 %v706_v50, %v702_v39  ;;  %v847_v53 = vpack.c.bf16 %v707_v51, %v703_v47  ;;  %v3800_v32 = vld [vmem:[#allocation7 + $0xa0] sm:$0xff]  }
 0x2dd   :  { %v2598_v43 = vpop.f32.mrf.mxu0 }
 0x2de   :  { %v2599_v4 = vadd.f32 %v4271_v34, %v2598_v43  ;;  %3625 = vst [vmem:[#allocation12] sm:$0xff] %v3624_v1  }
 0x2df   :  { %v1619_v57 = vpop.f32.mrf.mxu2 }
 0x2e0   :  { %v1788_v40 = vpop.f32.mrf.mxu3  ;;  %v2730_v9 = vmax.f32 %v2599_v4, 0.0  ;;  %v1620_v25 = vadd.f32 %v1619_v57, %v4073_v44 }
 0x2e1   :  { %v2885_v24 = vpop.f32.mrf.mxu1 }
 0x2e2   :  { %v1789_v20 = vadd.f32 %v1788_v40, %v1620_v25  ;;  %v2784_v10 = vpack.c.bf16 %v2730_v9, %v2729_v27  ;;  %v3042_v37 = vmax.f32 %v2885_v24, 0.0  ;;  %v455_v9 = vunpack.c.2.s8 %v4341_v8 }
 0x2e3   :  { %v3575_v25 = vunpack.c.l.bf16 %v3800_v32  ;;  %v3576_v24 = vunpack.c.h.bf16 %v3800_v32 }
 0x2e4   :  { %v2284_v14 = vadd.f32 %v2220_v48, %v1789_v20  ;;  %1661 = vmatmul.bf16.gmra.mxu2 %v842_v31  ;;  %2924 = vmatmul.bf16.gmra.mxu1 %v2784_v10  ;;  %v454_v48 = vunpack.c.2.s8 %v4339_v17  ;;  %v458_v31 = vunpack.c.3.s8 %v4339_v17 }
 0x2e5   :  { %1830 = vmatmul.bf16.gmra.mxu3 %v843_v49  ;;  %v2601_v3 = vpop.f32.mrf.mxu0  ;;  %v2224_v35 = vmul.f32 %v3576_v24, %v4168_v42 }
 0x2e6   :  { %v2460_v46 = vpack.c.bf16 %v2284_v14, %v2283_v33  ;;  %v2602_v19 = vadd.f32 %v4271_v34, %v2601_v3  ;;  %v710_v10 = vcvt.s32.f32 %v454_v48  ;;  %v714_v33 = vcvt.s32.f32 %v458_v31 }
 0x2e7   :  { %v1622_v61 = vpop.f32.mrf.mxu2 }
 0x2e8   :  { %v1791_v44 = vpop.f32.mrf.mxu3  ;;  %2640 = vmatmul.bf16.gmra.mxu0 %v2460_v46  ;;  %v1623_v63 = vadd.f32 %v1622_v61, %v4075_v56  ;;  %v2731_v16 = vmax.f32 %v2602_v19, 0.0  ;;  %v711_v46 = vcvt.s32.f32 %v455_v9  ;;  %v4363_v19 = vld [vmem:[#allocation4 + $0x1f0] sm:$0xff] }
 0x2e9   :  { %v2887_v6 = vpop.f32.mrf.mxu1 }
 0x2ea   :  { %v3043_v2 = vmax.f32 %v2887_v6, 0.0  ;;  %v1792_v55 = vadd.f32 %v1791_v44, %v1623_v63  ;;  %v850_v6 = vpack.c.bf16 %v714_v33, %v710_v10 }
 0x2ec   :  { %v3629_v18 = vpack.c.bf16 %v3043_v2, %v3042_v37  ;;  %v2285_v4 = vadd.f32 %v2221_v13, %v1792_v55 }
 0x2ed   :  { %v2603_v22 = vpop.f32.mrf.mxu0 }
 0x2ee   :  { %v2604_v54 = vadd.f32 %v4271_v34, %v2603_v22  ;;  %3812 = vst [vmem:[#allocation12 + $0x8] sm:$0xff] %v3629_v18   ;;  %v4365_v22 = vld [vmem:[#allocation4 + $0x1f8] sm:$0xff] }
 0x2ef   :  { %v1624_v21 = vpop.f32.mrf.mxu2 }
 0x2f0   :  { %v1793_v0 = vpop.f32.mrf.mxu3  ;;  %v2732_v28 = vmax.f32 %v2604_v54, 0.0  ;;  %v1625_v7 = vadd.f32 %v1624_v21, %v4077_v11  ;;  %v459_v11 = vunpack.c.3.s8 %v4341_v8  ;;  %v2223_v8 = vmul.f32 %v3575_v25, %v4168_v42 }
 0x2f1   :  { %v2890_v56 = vpop.f32.mrf.mxu1  ;;  %v462_v21 = vunpack.c.0.s8 %v4363_v19 }
 0x2f2   :  { %v1794_v1 = vadd.f32 %v1793_v0, %v1625_v7  ;;  %v2785_v43 = vpack.c.bf16 %v2732_v28, %v2731_v16  ;;  %v3044_v14 = vmax.f32 %v2890_v56, 0.0  ;;  %v715_v36 = vcvt.s32.f32 %v459_v11 }
 0x2f3   :  { %v466_v0 = vunpack.c.1.s8 %v4363_v19  ;;  %v467_v16 = vunpack.c.1.s8 %v4365_v22 }
 0x2f4   :  { %v2286_v41 = vadd.f32 %v2222_v38, %v1794_v1  ;;  %1666 = vmatmul.bf16.gmra.mxu2 %v846_v29  ;;  %2929 = vmatmul.bf16.gmra.mxu1 %v2785_v43  ;;  %v851_v59 = vpack.c.bf16 %v715_v36, %v711_v46  ;;  %v3801_v29 = vld [vmem:[#allocation7 + $0xa8] sm:$0xff]   ;;  %v718_v1 = vcvt.s32.f32 %v462_v21 }
 0x2f5   :  { %1835 = vmatmul.bf16.gmra.mxu3 %v847_v53  ;;  %v2606_v57 = vpop.f32.mrf.mxu0  ;;  %v463_v53 = vunpack.c.0.s8 %v4365_v22  ;;  %v3579_v55 = vunpack.c.l.bf16 %v3801_v29  ;;  %v3580_v7 = vunpack.c.h.bf16 %v3801_v29  ;;  %v722_v56 = vcvt.s32.f32 %v466_v0 }
 0x2f6   :  { %v2461_v40 = vpack.c.bf16 %v2286_v41, %v2285_v4  ;;  %v2607_v30 = vadd.f32 %v4271_v34, %v2606_v57  ;;  %v723_v57 = vcvt.s32.f32 %v467_v16 }
 0x2f7   :  { %v1627_v49 = vpop.f32.mrf.mxu2  ;;  %v719_v41 = vcvt.s32.f32 %v463_v53  ;;  %v2225_v9 = vmul.f32 %v3579_v55, %v4168_v42  ;;  %v854_v24 = vpack.c.bf16 %v722_v56, %v718_v1 }
 0x2f8   :  { %v1796_v27 = vpop.f32.mrf.mxu3  ;;  %2645 = vmatmul.bf16.gmra.mxu0 %v2461_v40  ;;  %v1628_v17 = vadd.f32 %v1627_v49, %v4079_v23  ;;  %v2733_v39 = vmax.f32 %v2607_v30, 0.0 }
 0x2f9   :  { %v2892_v20 = vpop.f32.mrf.mxu1 }
 0x2fa   :  { %v3045_v3 = vmax.f32 %v2892_v20, 0.0  ;;  %v1797_v50 = vadd.f32 %v1796_v27, %v1628_v17  ;;  %v4376_v27 = vld [vmem:[%s4474_s4] ss:$0 sm:$0xff]  ;;  %v2226_v20 = vmul.f32 %v3580_v7, %v4168_v42  ;;  %s4006_s4 = smov [#allocation12]  }
 0x2fb   :  { %s3236_s23 = sshll.u32 %s4006_s4, 4  ;;  %s3237_s23 = int_to_ptr.vmem [resolvable:$true] %s3236_s23 }
 0x2fc   :  { %v3634_v61 = vpack.c.bf16 %v3045_v3, %v3044_v14  ;;  %v2287_v63 = vadd.f32 %v2223_v8, %v1797_v50  ;;  %v474_v8 = vunpack.c.3.s8 %v4363_v19 }
 0x2fd   :  { %v2608_v44 = vpop.f32.mrf.mxu0 }
 0x2fe   :  { %v2609_v62 = vadd.f32 %v4271_v34, %v2608_v44  ;;  %3813 = vst [vmem:[#allocation12 + $0x10] sm:$0xff] %v3634_v61  }
 0x2ff   :  { %v1629_v60 = vpop.f32.mrf.mxu2 }
 0x300   :  { %v1798_v12 = vpop.f32.mrf.mxu3  ;;  %v2734_v37 = vmax.f32 %v2609_v62, 0.0  ;;  %v1630_v2 = vadd.f32 %v1629_v60, %v4081_v45  ;;  %v470_v62 = vunpack.c.2.s8 %v4363_v19 }
 0x301   :  { %v2895_v23 = vpop.f32.mrf.mxu1 }
 0x302   :  { %v1799_v47 = vadd.f32 %v1798_v12, %v1630_v2  ;;  %v2786_v51 = vpack.c.bf16 %v2734_v37, %v2733_v39  ;;  %v3046_v43 = vmax.f32 %v2895_v23, 0.0  ;;  %v726_v37 = vcvt.s32.f32 %v470_v62 }
 0x303   :  { %v730_v2 = vcvt.s32.f32 %v474_v8 }
 0x304   :  { %v2288_v18 = vadd.f32 %v2224_v35, %v1799_v47  ;;  %1671 = vmatmul.bf16.gmra.mxu2 %v850_v6  ;;  %2934 = vmatmul.bf16.gmra.mxu1 %v2786_v51  ;;  %v3802_v35 = vld [vmem:[#allocation7 + $0xb0] sm:$0xff]   ;;  %v471_v6 = vunpack.c.2.s8 %v4365_v22 }
 0x305   :  { %1840 = vmatmul.bf16.gmra.mxu3 %v851_v59  ;;  %v2611_v54 = vpop.f32.mrf.mxu0  ;;  %v3583_v59 = vunpack.c.l.bf16 %v3802_v35  ;;  %v3584_v50 = vunpack.c.h.bf16 %v3802_v35  ;;  %v858_v29 = vpack.c.bf16 %v730_v2, %v726_v37 }
 0x306   :  { %v2462_v13 = vpack.c.bf16 %v2288_v18, %v2287_v63  ;;  %v2612_v40 = vadd.f32 %v4271_v34, %v2611_v54  ;;  %v855_v34 = vpack.c.bf16 %v723_v57, %v719_v41  ;;  %v727_v51 = vcvt.s32.f32 %v471_v6 }
 0x307   :  { %v1632_v38 = vpop.f32.mrf.mxu2 }
 0x308   :  { %v1801_v45 = vpop.f32.mrf.mxu3  ;;  %2650 = vmatmul.bf16.gmra.mxu0 %v2462_v13  ;;  %v1633_v48 = vadd.f32 %v1632_v38, %v4083_v58  ;;  %v2735_v10 = vmax.f32 %v2612_v40, 0.0 }
 0x309   :  { %v2897_v28 = vpop.f32.mrf.mxu1 }
 0x30a   :  { %v3047_v4 = vmax.f32 %v2897_v28, 0.0  ;;  %v1802_v58 = vadd.f32 %v1801_v45, %v1633_v48  ;;  %v2228_v45 = vmul.f32 %v3584_v50, %v4168_v42 }
 0x30c   :  { %v3639_v31 = vpack.c.bf16 %v3047_v4, %v3046_v43  ;;  %v2289_v30 = vadd.f32 %v2225_v9, %v1802_v58 }
 0x30d   :  { %v2613_v49 = vpop.f32.mrf.mxu0 }
 0x30e   :  { %v2614_v32 = vadd.f32 %v4376_v27, %v2613_v49  ;;  %3814 = vst [vmem:[#allocation12 + $0x18] sm:$0xff] %v3639_v31   ;;  %v3803_v31 = vld [vmem:[#allocation7 + $0xb8] sm:$0xff]  }
 0x30f   :  { %v1634_v11 = vpop.f32.mrf.mxu2  ;;  %v3587_v9 = vunpack.c.l.bf16 %v3803_v31 }
 0x310   :  { %v1803_v25 = vpop.f32.mrf.mxu3  ;;  %v2736_v33 = vmax.f32 %v2614_v32, 0.0  ;;  %v1635_v14 = vadd.f32 %v1634_v11, %v4085_v15  ;;  %v475_v15 = vunpack.c.3.s8 %v4365_v22  ;;  %v2227_v22 = vmul.f32 %v3583_v59, %v4168_v42  ;;  %v3804_v59 = vld [vmem:[#allocation7 + $0xc0] sm:$0xff]  }
 0x311   :  { %v2900_v46 = vpop.f32.mrf.mxu1  ;;  %v2229_v58 = vmul.f32 %v3587_v9, %v4168_v42  ;;  %v3591_v37 = vunpack.c.l.bf16 %v3804_v59 }
 0x312   :  { %v1804_v3 = vadd.f32 %v1803_v25, %v1635_v14  ;;  %v2787_v36 = vpack.c.bf16 %v2736_v33, %v2735_v10  ;;  %v3048_v47 = vmax.f32 %v2900_v46, 0.0  ;;  %v731_v63 = vcvt.s32.f32 %v475_v15 }
 0x313   :  { %v3588_v25 = vunpack.c.h.bf16 %v3803_v31 }
 0x314   :  { %v2290_v17 = vadd.f32 %v2226_v20, %v1804_v3  ;;  %1676 = vmatmul.bf16.gmra.mxu2 %v854_v24  ;;  %2939 = vmatmul.bf16.gmra.mxu1 %v2787_v36  ;;  %v859_v53 = vpack.c.bf16 %v731_v63, %v727_v51  ;;  %v4495_v51 = vld [vmem:[#allocation18_spill] sm:$0xff] }
 0x315   :  { %1845 = vmatmul.bf16.gmra.mxu3 %v855_v34  ;;  %v2616_v61 = vpop.f32.mrf.mxu0  ;;  %v2230_v3 = vmul.f32 %v3588_v25, %v4168_v42 }
 0x316   :  { %v2463_v44 = vpack.c.bf16 %v2290_v17, %v2289_v30  ;;  %v2617_v18 = vadd.f32 %v4376_v27, %v2616_v61  ;;  %v4494_v17 = vld [vmem:[#allocation17_spill] sm:$0xff] }
 0x317   :  { %v1637_v60 = vpop.f32.mrf.mxu2 }
 0x318   :  { %v1806_v12 = vpop.f32.mrf.mxu3  ;;  %2655 = vmatmul.bf16.gmra.mxu0 %v2463_v44  ;;  %v1638_v19 = vadd.f32 %v1637_v60, %v4087_v26  ;;  %v2737_v16 = vmax.f32 %v2617_v18, 0.0 }
 0x319   :  { %v2902_v39 = vpop.f32.mrf.mxu1 }
 0x31a   :  { %v3049_v23 = vmax.f32 %v2902_v39, 0.0  ;;  %v1807_v55 = vadd.f32 %v1806_v12, %v1638_v19 }
 0x31c   :  { %v3644_v54 = vpack.c.bf16 %v3049_v23, %v3048_v47  ;;  %v2291_v43 = vadd.f32 %v2227_v22, %v1807_v55  ;;  %v3592_v47 = vunpack.c.h.bf16 %v3804_v59 }
 0x31d   :  { %v2618_v13 = vpop.f32.mrf.mxu0 }
 0x31e   :  { %v2619_v21 = vadd.f32 %v4376_v27, %v2618_v13  ;;  %3815 = vst [vmem:[#allocation12 + $0x20] sm:$0xff] %v3644_v54   ;;  %v2231_v13 = vmul.f32 %v3591_v37, %v4168_v42 }
 0x31f   :  { %v1639_v0 = vpop.f32.mrf.mxu2 }
 0x320   :  { %v1808_v38 = vpop.f32.mrf.mxu3  ;;  %v2738_v28 = vmax.f32 %v2619_v21, 0.0  ;;  %v1640_v7 = vadd.f32 %v1639_v0, %v4091_v52  ;;  %v2232_v0 = vmul.f32 %v3592_v47, %v4168_v42  ;;  %v4499_v47 = vld [vmem:[#allocation22_spill] sm:$0xff] }
 0x321   :  { %v2905_v26 = vpop.f32.mrf.mxu1 }
 0x322   :  { %v1809_v1 = vadd.f32 %v1808_v38, %v1640_v7  ;;  %v2788_v56 = vpack.c.bf16 %v2738_v28, %v2737_v16  ;;  %v3050_v32 = vmax.f32 %v2905_v26, 0.0 }
 0x324   :  { %v2292_v4 = vadd.f32 %v2228_v45, %v1809_v1  ;;  %1681 = vmatmul.bf16.gmra.mxu2 %v858_v29  ;;  %2944 = vmatmul.bf16.gmra.mxu1 %v2788_v56 }
 0x325   :  { %1850 = vmatmul.bf16.gmra.mxu3 %v859_v53  ;;  %v2621_v41 = vpop.f32.mrf.mxu0  ;;  %v4496_v53 = vld [vmem:[#allocation19_spill] sm:$0xff] }
 0x326   :  { %v2464_v57 = vpack.c.bf16 %v2292_v4, %v2291_v43  ;;  %v2622_v52 = vadd.f32 %v4376_v27, %v2621_v41 }
 0x327   :  { %v1642_v40 = vpop.f32.mrf.mxu2 }
 0x328   :  { %v1811_v48 = vpop.f32.mrf.mxu3  ;;  %2660 = vmatmul.bf16.gmra.mxu0 %v2464_v57  ;;  %v1643_v20 = vadd.f32 %v1642_v40, %v4095_v5  ;;  %v2739_v46 = vmax.f32 %v2622_v52, 0.0  ;;  %v3805_v57 = vld [vmem:[#allocation7 + $0xc8] sm:$0xff]  }
 0x329   :  { %v2907_v49 = vpop.f32.mrf.mxu1  ;;  %v3595_v31 = vunpack.c.l.bf16 %v3805_v57 }
 0x32a   :  { %v3051_v11 = vmax.f32 %v2907_v49, 0.0  ;;  %v1812_v36 = vadd.f32 %v1811_v48, %v1643_v20 }
 0x32c   :  { %v3649_v24 = vpack.c.bf16 %v3051_v11, %v3050_v32  ;;  %v2293_v5 = vadd.f32 %v2229_v58, %v1812_v36  ;;  %v3596_v32 = vunpack.c.h.bf16 %v3805_v57  ;;  %v4497_v11 = vld [vmem:[#allocation20_spill] sm:$0xff]  ;;  %v4498_v36 = vld [vmem:[#allocation21_spill] sm:$0xff] }
 0x32d   :  { %v2623_v34 = vpop.f32.mrf.mxu0 }
 0x32e   :  { %v2624_v10 = vadd.f32 %v4376_v27, %v2623_v34  ;;  %3816 = vst [vmem:[#allocation12 + $0x28] sm:$0xff] %v3649_v24   ;;  %v2233_v34 = vmul.f32 %v3595_v31, %v4168_v42 }
 0x32f   :  { %v1644_v33 = vpop.f32.mrf.mxu2 }
 0x330   :  { %v1813_v14 = vpop.f32.mrf.mxu3  ;;  %v2740_v30 = vmax.f32 %v2624_v10, 0.0  ;;  %v1645_v61 = vadd.f32 %v1644_v33, %v4494_v17  ;;  %v2234_v33 = vmul.f32 %v3596_v32, %v4168_v42  ;;  %v4501_v32 = vld [vmem:[#allocation24_spill] sm:$0xff] }
 0x331   :  { %v2910_v62 = vpop.f32.mrf.mxu1 }
 0x332   :  { %v1814_v44 = vadd.f32 %v1813_v14, %v1645_v61  ;;  %v2789_v8 = vpack.c.bf16 %v2740_v30, %v2739_v46  ;;  %v3052_v50 = vmax.f32 %v2910_v62, 0.0 }
 0x334   :  { %v2294_v60 = vadd.f32 %v2230_v3, %v1814_v44  ;;  %2949 = vmatmul.bf16.gmra.mxu1 %v2789_v8 }
 0x335   :  { %v2626_v12 = vpop.f32.mrf.mxu0 }
 0x336   :  { %v2465_v35 = vpack.c.bf16 %v2294_v60, %v2293_v5  ;;  %v2627_v23 = vadd.f32 %v4376_v27, %v2626_v12 }
 0x337   :  { %v1647_v6 = vpop.f32.mrf.mxu2 }
 0x338   :  { %v1816_v15 = vpop.f32.mrf.mxu3  ;;  %2665 = vmatmul.bf16.gmra.mxu0 %v2465_v35  ;;  %v1648_v63 = vadd.f32 %v1647_v6, %v4495_v51  ;;  %v2741_v38 = vmax.f32 %v2627_v23, 0.0  ;;  %v3806_v6 = vld [vmem:[#allocation7 + $0xd0] sm:$0xff]  }
 0x339   :  { %v2912_v39 = vpop.f32.mrf.mxu1  ;;  %v3600_v37 = vunpack.c.h.bf16 %v3806_v6 }
 0x33a   :  { %v3053_v2 = vmax.f32 %v2912_v39, 0.0  ;;  %v1817_v45 = vadd.f32 %v1816_v15, %v1648_v63  ;;  %v3599_v39 = vunpack.c.l.bf16 %v3806_v6 }
 0x33c   :  { %v3654_v18 = vpack.c.bf16 %v3053_v2, %v3052_v50  ;;  %v2295_v1 = vadd.f32 %v2231_v13, %v1817_v45  ;;  %v4500_v45 = vld [vmem:[#allocation23_spill] sm:$0xff] }
 0x33d   :  { %v2628_v19 = vpop.f32.mrf.mxu0 }
 0x33e   :  { %v2629_v54 = vadd.f32 %v4376_v27, %v2628_v19  ;;  %3817 = vst [vmem:[#allocation12 + $0x30] sm:$0xff] %v3654_v18   ;;  %v2235_v19 = vmul.f32 %v3599_v39, %v4168_v42 }
 0x33f   :  { %v1649_v21 = vpop.f32.mrf.mxu2 }
 0x340   :  { %v1818_v22 = vpop.f32.mrf.mxu3  ;;  %v2742_v29 = vmax.f32 %v2629_v54, 0.0  ;;  %v1650_v16 = vadd.f32 %v1649_v21, %v4496_v53  ;;  %v2236_v21 = vmul.f32 %v3600_v37, %v4168_v42  ;;  %v4503_v37 = vld [vmem:[#allocation26_spill] sm:$0xff] }
 0x341   :  { %v2915_v28 = vpop.f32.mrf.mxu1 }
 0x342   :  { %v1819_v55 = vadd.f32 %v1818_v22, %v1650_v16  ;;  %v2790_v7 = vpack.c.bf16 %v2742_v29, %v2741_v38  ;;  %v3054_v48 = vmax.f32 %v2915_v28, 0.0 }
 0x344   :  { %v2296_v26 = vadd.f32 %v2232_v0, %v1819_v55  ;;  %2954 = vmatmul.bf16.gmra.mxu1 %v2790_v7 }
 0x345   :  { %v2631_v56 = vpop.f32.mrf.mxu0 }
 0x346   :  { %v2466_v43 = vpack.c.bf16 %v2296_v26, %v2295_v1  ;;  %v2632_v9 = vadd.f32 %v4376_v27, %v2631_v56 }
 0x347   :  { %v1652_v4 = vpop.f32.mrf.mxu2 }
 0x348   :  { %v1821_v41 = vpop.f32.mrf.mxu3  ;;  %2670 = vmatmul.bf16.gmra.mxu0 %v2466_v43  ;;  %v1653_v25 = vadd.f32 %v1652_v4, %v4497_v11  ;;  %v2743_v14 = vmax.f32 %v2632_v9, 0.0  ;;  %v3807_v4 = vld [vmem:[#allocation7 + $0xd8] sm:$0xff]  }
 0x349   :  { %v2917_v40 = vpop.f32.mrf.mxu1  ;;  %v3604_v31 = vunpack.c.h.bf16 %v3807_v4 }
 0x34a   :  { %v3055_v49 = vmax.f32 %v2917_v40, 0.0  ;;  %v1822_v3 = vadd.f32 %v1821_v41, %v1653_v25  ;;  %v3603_v40 = vunpack.c.l.bf16 %v3807_v4 }
 0x34c   :  { %v3659_v52 = vpack.c.bf16 %v3055_v49, %v3054_v48  ;;  %v2297_v62 = vadd.f32 %v2233_v34, %v1822_v3  ;;  %v4502_v3 = vld [vmem:[#allocation25_spill] sm:$0xff] }
 0x34d   :  { %v2633_v20 = vpop.f32.mrf.mxu0 }
 0x34e   :  { %v2634_v24 = vadd.f32 %v4376_v27, %v2633_v20  ;;  %3818 = vst [vmem:[#allocation12 + $0x38] sm:$0xff] %v3659_v52   ;;  %v2237_v20 = vmul.f32 %v3603_v40, %v4168_v42 }
 0x34f   :  { %v1654_v10 = vpop.f32.mrf.mxu2 }
 0x350   :  { %v1823_v58 = vpop.f32.mrf.mxu3  ;;  %v2744_v46 = vmax.f32 %v2634_v24, 0.0  ;;  %v1655_v30 = vadd.f32 %v1654_v10, %v4498_v36  ;;  %v2238_v10 = vmul.f32 %v3604_v31, %v4168_v42  ;;  %v4505_v31 = vld [vmem:[#allocation28_spill] sm:$0xff] }
 0x351   :  { %v2920_v61 = vpop.f32.mrf.mxu1 }
 0x352   :  { %v1824_v17 = vadd.f32 %v1823_v58, %v1655_v30  ;;  %v2791_v44 = vpack.c.bf16 %v2744_v46, %v2743_v14  ;;  %v3056_v59 = vmax.f32 %v2920_v61, 0.0 }
 0x354   :  { %v2298_v8 = vadd.f32 %v2234_v33, %v1824_v17  ;;  %2959 = vmatmul.bf16.gmra.mxu1 %v2791_v44 }
 0x355   :  { %v2636_v5 = vpop.f32.mrf.mxu0 }
 0x356   :  { %v2467_v60 = vpack.c.bf16 %v2298_v8, %v2297_v62  ;;  %v2637_v2 = vadd.f32 %v4376_v27, %v2636_v5 }
 0x357   :  { %v1657_v12 = vpop.f32.mrf.mxu2 }
 0x358   :  { %v1826_v35 = vpop.f32.mrf.mxu3  ;;  %2675 = vmatmul.bf16.gmra.mxu0 %v2467_v60  ;;  %v1658_v23 = vadd.f32 %v1657_v12, %v4499_v47  ;;  %v2745_v22 = vmax.f32 %v2637_v2, 0.0  ;;  %v3808_v12 = vld [vmem:[#allocation7 + $0xe0] sm:$0xff]  }
 0x359   :  { %v2922_v15 = vpop.f32.mrf.mxu1  ;;  %v3608_v39 = vunpack.c.h.bf16 %v3808_v12 }
 0x35a   :  { %v3057_v50 = vmax.f32 %v2922_v15, 0.0  ;;  %v1827_v0 = vadd.f32 %v1826_v35, %v1658_v23  ;;  %v3607_v15 = vunpack.c.l.bf16 %v3808_v12 }
 0x35c   :  { %v3664_v51 = vpack.c.bf16 %v3057_v50, %v3056_v59  ;;  %v2299_v28 = vadd.f32 %v2235_v19, %v1827_v0  ;;  %v4504_v0 = vld [vmem:[#allocation27_spill] sm:$0xff] }
 0x35d   :  { %v2638_v63 = vpop.f32.mrf.mxu0 }
 0x35e   :  { %v2639_v18 = vadd.f32 %v4376_v27, %v2638_v63  ;;  %3819 = vst [vmem:[#allocation12 + $0x40] sm:$0xff] %v3664_v51   ;;  %v2239_v63 = vmul.f32 %v3607_v15, %v4168_v42 }
 0x35f   :  { %v1659_v54 = vpop.f32.mrf.mxu2 }
 0x360   :  { %v1828_v13 = vpop.f32.mrf.mxu3  ;;  %v2746_v38 = vmax.f32 %v2639_v18, 0.0  ;;  %v1660_v29 = vadd.f32 %v1659_v54, %v4500_v45  ;;  %v2240_v54 = vmul.f32 %v3608_v39, %v4168_v42  ;;  %v4507_v39 = vld [vmem:[#allocation30_spill] sm:$0xff] }
 0x361   :  { %v2925_v16 = vpop.f32.mrf.mxu1 }
 0x362   :  { %v1829_v53 = vadd.f32 %v1828_v13, %v1660_v29  ;;  %v2792_v55 = vpack.c.bf16 %v2746_v38, %v2745_v22  ;;  %v3058_v57 = vmax.f32 %v2925_v16, 0.0 }
 0x364   :  { %v2300_v7 = vadd.f32 %v2236_v21, %v1829_v53  ;;  %2964 = vmatmul.bf16.gmra.mxu1 %v2792_v55 }
 0x365   :  { %v2641_v1 = vpop.f32.mrf.mxu0 }
 0x366   :  { %v2468_v26 = vpack.c.bf16 %v2300_v7, %v2299_v28  ;;  %v2642_v49 = vadd.f32 %v4376_v27, %v2641_v1 }
 0x367   :  { %v1662_v56 = vpop.f32.mrf.mxu2 }
 0x368   :  { %v1831_v43 = vpop.f32.mrf.mxu3  ;;  %2680 = vmatmul.bf16.gmra.mxu0 %v2468_v26  ;;  %v1663_v9 = vadd.f32 %v1662_v56, %v4501_v32  ;;  %v2747_v58 = vmax.f32 %v2642_v49, 0.0  ;;  %v3809_v56 = vld [vmem:[#allocation7 + $0xe8] sm:$0xff]  }
 0x369   :  { %v2927_v41 = vpop.f32.mrf.mxu1  ;;  %v3612_v40 = vunpack.c.h.bf16 %v3809_v56 }
 0x36a   :  { %v3059_v48 = vmax.f32 %v2927_v41, 0.0  ;;  %v1832_v33 = vadd.f32 %v1831_v43, %v1663_v9  ;;  %v3611_v41 = vunpack.c.l.bf16 %v3809_v56 }
 0x36c   :  { %v3669_v11 = vpack.c.bf16 %v3059_v48, %v3058_v57  ;;  %v2301_v61 = vadd.f32 %v2237_v20, %v1832_v33  ;;  %v4506_v33 = vld [vmem:[#allocation29_spill] sm:$0xff] }
 0x36d   :  { %v2643_v25 = vpop.f32.mrf.mxu0 }
 0x36e   :  { %v2644_v52 = vadd.f32 %v4376_v27, %v2643_v25  ;;  %3820 = vst [vmem:[#allocation12 + $0x48] sm:$0xff] %v3669_v11   ;;  %v2241_v25 = vmul.f32 %v3611_v41, %v4168_v42 }
 0x36f   :  { %v1664_v24 = vpop.f32.mrf.mxu2 }
 0x370   :  { %v1833_v34 = vpop.f32.mrf.mxu3  ;;  %v2748_v14 = vmax.f32 %v2644_v52, 0.0  ;;  %v1665_v46 = vadd.f32 %v1664_v24, %v4502_v3  ;;  %v2242_v24 = vmul.f32 %v3612_v40, %v4168_v42  ;;  %v4509_v40 = vld [vmem:[#allocation32_spill] sm:$0xff] }
 0x371   :  { %v2930_v30 = vpop.f32.mrf.mxu1 }
 0x372   :  { %v1834_v36 = vadd.f32 %v1833_v34, %v1665_v46  ;;  %v2793_v17 = vpack.c.bf16 %v2748_v14, %v2747_v58  ;;  %v3060_v6 = vmax.f32 %v2930_v30, 0.0 }
 0x374   :  { %v2302_v44 = vadd.f32 %v2238_v10, %v1834_v36  ;;  %2969 = vmatmul.bf16.gmra.mxu1 %v2793_v17 }
 0x375   :  { %v2646_v62 = vpop.f32.mrf.mxu0 }
 0x376   :  { %v2469_v8 = vpack.c.bf16 %v2302_v44, %v2301_v61  ;;  %v2647_v50 = vadd.f32 %v4376_v27, %v2646_v62 }
 0x377   :  { %v1667_v5 = vpop.f32.mrf.mxu2 }
 0x378   :  { %v1836_v60 = vpop.f32.mrf.mxu3  ;;  %2685 = vmatmul.bf16.gmra.mxu0 %v2469_v8  ;;  %v1668_v2 = vadd.f32 %v1667_v5, %v4503_v37  ;;  %v2749_v13 = vmax.f32 %v2647_v50, 0.0  ;;  %v3810_v5 = vld [vmem:[#allocation7 + $0xf0] sm:$0xff]  }
 0x379   :  { %v2932_v35 = vpop.f32.mrf.mxu1  ;;  %v3616_v15 = vunpack.c.h.bf16 %v3810_v5 }
 0x37a   :  { %v3061_v59 = vmax.f32 %v2932_v35, 0.0  ;;  %v1837_v21 = vadd.f32 %v1836_v60, %v1668_v2  ;;  %v3615_v35 = vunpack.c.l.bf16 %v3810_v5 }
 0x37c   :  { %v3674_v47 = vpack.c.bf16 %v3061_v59, %v3060_v6  ;;  %v2303_v16 = vadd.f32 %v2239_v63, %v1837_v21  ;;  %v4508_v21 = vld [vmem:[#allocation31_spill] sm:$0xff] }
 0x37d   :  { %v2648_v23 = vpop.f32.mrf.mxu0 }
 0x37e   :  { %v2649_v51 = vadd.f32 %v4376_v27, %v2648_v23  ;;  %3821 = vst [vmem:[#allocation12 + $0x50] sm:$0xff] %v3674_v47   ;;  %v2243_v23 = vmul.f32 %v3615_v35, %v4168_v42 }
 0x37f   :  { %v1669_v18 = vpop.f32.mrf.mxu2 }
 0x380   :  { %v1838_v19 = vpop.f32.mrf.mxu3  ;;  %v2750_v22 = vmax.f32 %v2649_v51, 0.0  ;;  %v1670_v38 = vadd.f32 %v1669_v18, %v4504_v0  ;;  %v2244_v18 = vmul.f32 %v3616_v15, %v4168_v42 }
 0x381   :  { %v2935_v29 = vpop.f32.mrf.mxu1 }
 0x382   :  { %v1839_v45 = vadd.f32 %v1838_v19, %v1670_v38  ;;  %v2794_v53 = vpack.c.bf16 %v2750_v22, %v2749_v13  ;;  %v3062_v4 = vmax.f32 %v2935_v29, 0.0 }
 0x384   :  { %v2304_v55 = vadd.f32 %v2240_v54, %v1839_v45  ;;  %2974 = vmatmul.bf16.gmra.mxu1 %v2794_v53 }
 0x385   :  { %v2651_v28 = vpop.f32.mrf.mxu0 }
 0x386   :  { %v2470_v7 = vpack.c.bf16 %v2304_v55, %v2303_v16  ;;  %v2652_v48 = vadd.f32 %v4376_v27, %v2651_v28 }
 0x387   :  { %v1672_v1 = vpop.f32.mrf.mxu2 }
 0x388   :  { %v1841_v26 = vpop.f32.mrf.mxu3  ;;  %2690 = vmatmul.bf16.gmra.mxu0 %v2470_v7  ;;  %v1673_v49 = vadd.f32 %v1672_v1, %v4505_v31  ;;  %v2751_v34 = vmax.f32 %v2652_v48, 0.0  ;;  %v3811_v1 = vld [vmem:[#allocation7 + $0xf8] sm:$0xff]  }
 0x389   :  { %v2937_v43 = vpop.f32.mrf.mxu1  ;;  %v3620_v41 = vunpack.c.h.bf16 %v3811_v1 }
 0x38a   :  { %v3063_v57 = vmax.f32 %v2937_v43, 0.0  ;;  %v1842_v10 = vadd.f32 %v1841_v26, %v1673_v49  ;;  %v3619_v43 = vunpack.c.l.bf16 %v3811_v1 }
 0x38c   :  { %v3679_v32 = vpack.c.bf16 %v3063_v57, %v3062_v4  ;;  %v2305_v30 = vadd.f32 %v2241_v25, %v1842_v10  ;;  %v2246_v25 = vmul.f32 %v3620_v41, %v4168_v42 }
 0x38d   :  { %v2653_v9 = vpop.f32.mrf.mxu0 }
 0x38e   :  { %v2654_v11 = vadd.f32 %v4376_v27, %v2653_v9  ;;  %3822 = vst [vmem:[#allocation12 + $0x58] sm:$0xff] %v3679_v32   ;;  %v2245_v9 = vmul.f32 %v3619_v43, %v4168_v42 }
 0x38f   :  { %v1674_v52 = vpop.f32.mrf.mxu2 }
 0x390   :  { %v1843_v20 = vpop.f32.mrf.mxu3  ;;  %v2752_v58 = vmax.f32 %v2654_v11, 0.0  ;;  %v1675_v14 = vadd.f32 %v1674_v52, %v4506_v33 }
 0x391   :  { %v2940_v36 = vpop.f32.mrf.mxu1 }
 0x392   :  { %v2795_v3 = vpack.c.bf16 %v2752_v58, %v2751_v34  ;;  %v1844_v46 = vadd.f32 %v1843_v20, %v1675_v14  ;;  %v3064_v12 = vmax.f32 %v2940_v36, 0.0  ;;  %v4510_v34 = vld [vmem:[#allocation33_spill] sm:$0xff] }
 0x394   :  { %v2306_v17 = vadd.f32 %v2242_v24, %v1844_v46  ;;  %2979 = vmatmul.bf16.gmra.mxu1 %v2795_v3 }
 0x395   :  { %v2656_v61 = vpop.f32.mrf.mxu0 }
 0x396   :  { %v2471_v44 = vpack.c.bf16 %v2306_v17, %v2305_v30  ;;  %v2657_v59 = vadd.f32 %v4376_v27, %v2656_v61 }
 0x397   :  { %v1677_v62 = vpop.f32.mrf.mxu2 }
 0x398   :  { %v1846_v8 = vpop.f32.mrf.mxu3  ;;  %2695 = vmatmul.bf16.gmra.mxu0 %v2471_v44  ;;  %v1678_v50 = vadd.f32 %v1677_v62, %v4507_v39  ;;  %v2753_v19 = vmax.f32 %v2657_v59, 0.0 }
 0x399   :  { %v2942_v60 = vpop.f32.mrf.mxu1 }
 0x39a   :  { %v3065_v6 = vmax.f32 %v2942_v60, 0.0  ;;  %v1847_v54 = vadd.f32 %v1846_v8, %v1678_v50 }
 0x39c   :  { %v3684_v37 = vpack.c.bf16 %v3065_v6, %v3064_v12  ;;  %v2307_v29 = vadd.f32 %v2243_v23, %v1847_v54 }
 0x39d   :  { %v2658_v2 = vpop.f32.mrf.mxu0 }
 0x39e   :  { %v2659_v47 = vadd.f32 %v4376_v27, %v2658_v2  ;;  %3823 = vst [vmem:[#allocation12 + $0x60] sm:$0xff] %v3684_v37  }
 0x39f   :  { %v1679_v51 = vpop.f32.mrf.mxu2 }
 0x3a0   :  { %v1848_v63 = vpop.f32.mrf.mxu3  ;;  %v2754_v13 = vmax.f32 %v2659_v47, 0.0  ;;  %v1680_v22 = vadd.f32 %v1679_v51, %v4508_v21 }
 0x3a1   :  { %v2945_v45 = vpop.f32.mrf.mxu1 }
 0x3a2   :  { %v2796_v0 = vpack.c.bf16 %v2754_v13, %v2753_v19  ;;  %v1849_v38 = vadd.f32 %v1848_v63, %v1680_v22  ;;  %v3066_v56 = vmax.f32 %v2945_v45, 0.0 }
 0x3a4   :  { %v2308_v53 = vadd.f32 %v2244_v18, %v1849_v38  ;;  %2984 = vmatmul.bf16.gmra.mxu1 %v2796_v0 }
 0x3a5   :  { %v2661_v16 = vpop.f32.mrf.mxu0 }
 0x3a6   :  { %v2472_v55 = vpack.c.bf16 %v2308_v53, %v2307_v29  ;;  %v2662_v57 = vadd.f32 %v4376_v27, %v2661_v16 }
 0x3a7   :  { %v1682_v28 = vpop.f32.mrf.mxu2 }
 0x3a8   :  { %v1851_v7 = vpop.f32.mrf.mxu3  ;;  %2700 = vmatmul.bf16.gmra.mxu0 %v2472_v55  ;;  %v1683_v48 = vadd.f32 %v1682_v28, %v4509_v40  ;;  %v2755_v52 = vmax.f32 %v2662_v57, 0.0 }
 0x3a9   :  { %v2947_v26 = vpop.f32.mrf.mxu1 }
 0x3aa   :  { %v3067_v4 = vmax.f32 %v2947_v26, 0.0  ;;  %v1852_v20 = vadd.f32 %v1851_v7, %v1683_v48 }
 0x3ac   :  { %v3689_v31 = vpack.c.bf16 %v3067_v4, %v3066_v56  ;;  %v2309_v46 = vadd.f32 %v2245_v9, %v1852_v20 }
 0x3ad   :  { %v2663_v49 = vpop.f32.mrf.mxu0 }
 0x3ae   :  { %v2664_v32 = vadd.f32 %v4376_v27, %v2663_v49  ;;  %3824 = vst [vmem:[#allocation12 + $0x68] sm:$0xff] %v3689_v31  }
 0x3af   :  { %v1684_v11 = vpop.f32.mrf.mxu2 }
 0x3b0   :  { %v2756_v24 = vmax.f32 %v2664_v32, 0.0  ;;  %v1685_v10 = vadd.f32 %v1684_v11, %v4510_v34  ;;  %v1853_v58 = vpop.f32.mrf.mxu3 }
 0x3b1   :  { %v2950_v3 = vpop.f32.mrf.mxu1 }
 0x3b2   :  { %v2797_v33 = vpack.c.bf16 %v2756_v24, %v2755_v52  ;;  %v1854_v14 = vadd.f32 %v1853_v58, %v1685_v10  ;;  %v3068_v44 = vmax.f32 %v2950_v3, 0.0 }
 0x3b4   :  { %v2310_v36 = vadd.f32 %v2246_v25, %v1854_v14  ;;  %2989 = vmatmul.bf16.gmra.mxu1 %v2797_v33 }
 0x3b5   :  { %v2666_v30 = vpop.f32.mrf.mxu0 }
 0x3b6   :  { %v2473_v17 = vpack.c.bf16 %v2310_v36, %v2309_v46  ;;  %v2667_v42 = vadd.f32 %v4376_v27, %v2666_v30 }
 0x3b8   :  { %2705 = vmatmul.bf16.gmra.mxu0 %v2473_v17  ;;  %v2757_v12 = vmax.f32 %v2667_v42, 0.0 }
 0x3b9   :  { %v2952_v61 = vpop.f32.mrf.mxu1 }
 0x3ba   :  { %v3069_v62 = vmax.f32 %v2952_v61, 0.0 }
 0x3bc   :  { %v3694_v8 = vpack.c.bf16 %v3069_v62, %v3068_v44 }
 0x3bd   :  { %v2668_v5 = vpop.f32.mrf.mxu0 }
 0x3be   :  { %v2669_v60 = vadd.f32 %v4376_v27, %v2668_v5  ;;  %3825 = vst [vmem:[#allocation12 + $0x70] sm:$0xff] %v3694_v8  }
 0x3c0   :  { %v2758_v35 = vmax.f32 %v2669_v60, 0.0 }
 0x3c1   :  { %v2955_v15 = vpop.f32.mrf.mxu1 }
 0x3c2   :  { %v2798_v6 = vpack.c.bf16 %v2758_v35, %v2757_v12  ;;  %v3070_v50 = vmax.f32 %v2955_v15, 0.0 }
 0x3c4   :  { %2994 = vmatmul.bf16.gmra.mxu1 %v2798_v6 }
 0x3c5   :  { %v2671_v59 = vpop.f32.mrf.mxu0 }
 0x3c6   :  { %v2672_v2 = vadd.f32 %v4376_v27, %v2671_v59 }
 0x3c8   :  { %v2759_v63 = vmax.f32 %v2672_v2, 0.0 }
 0x3c9   :  { %v2957_v39 = vpop.f32.mrf.mxu1 }
 0x3ca   :  { %v3071_v37 = vmax.f32 %v2957_v39, 0.0 }
 0x3cc   :  { %v3699_v47 = vpack.c.bf16 %v3071_v37, %v3070_v50 }
 0x3cd   :  { %v2673_v23 = vpop.f32.mrf.mxu0 }
 0x3ce   :  { %v2674_v51 = vadd.f32 %v4376_v27, %v2673_v23  ;;  %3826 = vst [vmem:[#allocation12 + $0x78] sm:$0xff] %v3699_v47  }
 0x3d0   :  { %v2760_v18 = vmax.f32 %v2674_v51, 0.0 }
 0x3d1   :  { %v2960_v54 = vpop.f32.mrf.mxu1 }
 0x3d2   :  { %v2799_v19 = vpack.c.bf16 %v2760_v18, %v2759_v63  ;;  %v3072_v22 = vmax.f32 %v2960_v54, 0.0 }
 0x3d4   :  { %2999 = vmatmul.bf16.gmra.mxu1 %v2799_v19 }
 0x3d5   :  { %v2676_v13 = vpop.f32.mrf.mxu0 }
 0x3d6   :  { %v2677_v38 = vadd.f32 %v4376_v27, %v2676_v13 }
 0x3d8   :  { %v2761_v16 = vmax.f32 %v2677_v38, 0.0 }
 0x3d9   :  { %v2962_v21 = vpop.f32.mrf.mxu1 }
 0x3da   :  { %v3073_v0 = vmax.f32 %v2962_v21, 0.0 }
 0x3dc   :  { %v3704_v45 = vpack.c.bf16 %v3073_v0, %v3072_v22 }
 0x3dd   :  { %v2678_v29 = vpop.f32.mrf.mxu0 }
 0x3de   :  { %v2679_v53 = vadd.f32 %v4376_v27, %v2678_v29  ;;  %3827 = vst [vmem:[#allocation12 + $0x80] sm:$0xff] %v3704_v45  }
 0x3e0   :  { %v2762_v55 = vmax.f32 %v2679_v53, 0.0 }
 0x3e1   :  { %v2965_v7 = vpop.f32.mrf.mxu1 }
 0x3e2   :  { %v2800_v28 = vpack.c.bf16 %v2762_v55, %v2761_v16  ;;  %v3074_v56 = vmax.f32 %v2965_v7, 0.0 }
 0x3e4   :  { %3004 = vmatmul.bf16.gmra.mxu1 %v2800_v28 }
 0x3e5   :  { %v2681_v1 = vpop.f32.mrf.mxu0 }
 0x3e6   :  { %v2682_v4 = vadd.f32 %v4376_v27, %v2681_v1 }
 0x3e8   :  { %v2763_v48 = vmax.f32 %v2682_v4, 0.0 }
 0x3e9   :  { %v2967_v26 = vpop.f32.mrf.mxu1 }
 0x3ea   :  { %v3075_v43 = vmax.f32 %v2967_v26, 0.0 }
 0x3ec   :  { %v3709_v41 = vpack.c.bf16 %v3075_v43, %v3074_v56 }
 0x3ed   :  { %v2683_v57 = vpop.f32.mrf.mxu0 }
 0x3ee   :  { %v2684_v40 = vadd.f32 %v4376_v27, %v2683_v57  ;;  %3828 = vst [vmem:[#allocation12 + $0x88] sm:$0xff] %v3709_v41  }
 0x3f0   :  { %v2764_v31 = vmax.f32 %v2684_v40, 0.0 }
 0x3f1   :  { %v2970_v32 = vpop.f32.mrf.mxu1 }
 0x3f2   :  { %v2801_v49 = vpack.c.bf16 %v2764_v31, %v2763_v48  ;;  %v3076_v25 = vmax.f32 %v2970_v32, 0.0 }
 0x3f4   :  { %3009 = vmatmul.bf16.gmra.mxu1 %v2801_v49 }
 0x3f5   :  { %v2686_v9 = vpop.f32.mrf.mxu0 }
 0x3f6   :  { %v2687_v20 = vadd.f32 %v4376_v27, %v2686_v9 }
 0x3f8   :  { %v2765_v58 = vmax.f32 %v2687_v20, 0.0 }
 0x3f9   :  { %v2972_v11 = vpop.f32.mrf.mxu1 }
 0x3fa   :  { %v3077_v52 = vmax.f32 %v2972_v11, 0.0 }
 0x3fc   :  { %v3714_v24 = vpack.c.bf16 %v3077_v52, %v3076_v25 }
 0x3fd   :  { %v2688_v34 = vpop.f32.mrf.mxu0 }
 0x3fe   :  { %v2689_v10 = vadd.f32 %v4376_v27, %v2688_v34  ;;  %3829 = vst [vmem:[#allocation12 + $0x90] sm:$0xff] %v3714_v24  }
 0x400   :  { %v2766_v33 = vmax.f32 %v2689_v10, 0.0 }
 0x401   :  { %v2975_v3 = vpop.f32.mrf.mxu1 }
 0x402   :  { %v2802_v14 = vpack.c.bf16 %v2766_v33, %v2765_v58  ;;  %v3078_v30 = vmax.f32 %v2975_v3, 0.0 }
 0x404   :  { %3014 = vmatmul.bf16.gmra.mxu1 %v2802_v14 }
 0x405   :  { %v2691_v46 = vpop.f32.mrf.mxu0 }
 0x406   :  { %v2692_v61 = vadd.f32 %v4376_v27, %v2691_v46 }
 0x408   :  { %v2767_v8 = vmax.f32 %v2692_v61, 0.0 }
 0x409   :  { %v2977_v36 = vpop.f32.mrf.mxu1 }
 0x40a   :  { %v3079_v17 = vmax.f32 %v2977_v36, 0.0 }
 0x40c   :  { %v3719_v44 = vpack.c.bf16 %v3079_v17, %v3078_v30 }
 0x40d   :  { %v2693_v62 = vpop.f32.mrf.mxu0 }
 0x40e   :  { %v2694_v42 = vadd.f32 %v4376_v27, %v2693_v62  ;;  %3830 = vst [vmem:[#allocation12 + $0x98] sm:$0xff] %v3719_v44  }
 0x410   :  { %v2768_v5 = vmax.f32 %v2694_v42, 0.0 }
 0x411   :  { %v2980_v12 = vpop.f32.mrf.mxu1 }
 0x412   :  { %v2803_v60 = vpack.c.bf16 %v2768_v5, %v2767_v8  ;;  %v3080_v15 = vmax.f32 %v2980_v12, 0.0 }
 0x414   :  { %3019 = vmatmul.bf16.gmra.mxu1 %v2803_v60 }
 0x415   :  { %v2696_v35 = vpop.f32.mrf.mxu0 }
 0x416   :  { %v2697_v39 = vadd.f32 %v4376_v27, %v2696_v35 }
 0x418   :  { %v2769_v47 = vmax.f32 %v2697_v39, 0.0 }
 0x419   :  { %v2982_v6 = vpop.f32.mrf.mxu1 }
 0x41a   :  { %v3081_v59 = vmax.f32 %v2982_v6, 0.0 }
 0x41c   :  { %v3724_v50 = vpack.c.bf16 %v3081_v59, %v3080_v15 }
 0x41d   :  { %v2698_v37 = vpop.f32.mrf.mxu0 }
 0x41e   :  { %v2699_v2 = vadd.f32 %v4376_v27, %v2698_v37  ;;  %3831 = vst [vmem:[#allocation12 + $0xa0] sm:$0xff] %v3724_v50  }
 0x420   :  { %v2770_v23 = vmax.f32 %v2699_v2, 0.0 }
 0x421   :  { %v2985_v63 = vpop.f32.mrf.mxu1 }
 0x422   :  { %v2804_v51 = vpack.c.bf16 %v2770_v23, %v2769_v47  ;;  %v3082_v54 = vmax.f32 %v2985_v63, 0.0 }
 0x424   :  { %3024 = vmatmul.bf16.gmra.mxu1 %v2804_v51 }
 0x425   :  { %v2701_v18 = vpop.f32.mrf.mxu0 }
 0x426   :  { %v2702_v21 = vadd.f32 %v4376_v27, %v2701_v18 }
 0x428   :  { %v2771_v45 = vmax.f32 %v2702_v21, 0.0 }
 0x429   :  { %v2987_v19 = vpop.f32.mrf.mxu1 }
 0x42a   :  { %v3083_v13 = vmax.f32 %v2987_v19, 0.0 }
 0x42c   :  { %v3729_v22 = vpack.c.bf16 %v3083_v13, %v3082_v54 }
 0x42d   :  { %v2703_v0 = vpop.f32.mrf.mxu0 }
 0x42e   :  { %v2704_v38 = vadd.f32 %v4376_v27, %v2703_v0  ;;  %3832 = vst [vmem:[#allocation12 + $0xa8] sm:$0xff] %v3729_v22  }
 0x430   :  { %v2772_v29 = vmax.f32 %v2704_v38, 0.0 }
 0x431   :  { %v2990_v16 = vpop.f32.mrf.mxu1 }
 0x432   :  { %v2805_v53 = vpack.c.bf16 %v2772_v29, %v2771_v45  ;;  %v3084_v7 = vmax.f32 %v2990_v16, 0.0 }
 0x434   :  { %3029 = vmatmul.bf16.gmra.mxu1 %v2805_v53 }
 0x435   :  { %v2706_v55 = vpop.f32.mrf.mxu0 }
 0x436   :  { %v2707_v26 = vadd.f32 %v4376_v27, %v2706_v55 }
 0x438   :  { %v2773_v41 = vmax.f32 %v2707_v26, 0.0 }
 0x439   :  { %v2992_v28 = vpop.f32.mrf.mxu1 }
 0x43a   :  { %v3085_v1 = vmax.f32 %v2992_v28, 0.0 }
 0x43c   :  { %v3734_v56 = vpack.c.bf16 %v3085_v1, %v3084_v7 }
 0x43d   :  { %v2708_v43 = vpop.f32.mrf.mxu0 }
 0x43e   :  { %v2709_v4 = vadd.f32 %v4376_v27, %v2708_v43  ;;  %3833 = vst [vmem:[#allocation12 + $0xb0] sm:$0xff] %v3734_v56  }
 0x440   :  { %v2774_v57 = vmax.f32 %v2709_v4, 0.0 }
 0x441   :  { %v2995_v48 = vpop.f32.mrf.mxu1 }
 0x442   :  { %v2806_v40 = vpack.c.bf16 %v2774_v57, %v2773_v41  ;;  %v3086_v49 = vmax.f32 %v2995_v48, 0.0 }
 0x444   :  { %3034 = vmatmul.bf16.gmra.mxu1 %v2806_v40 }
 0x449   :  { %v2997_v31 = vpop.f32.mrf.mxu1 }
 0x44a   :  { %v3087_v32 = vmax.f32 %v2997_v31, 0.0 }
 0x44c   :  { %v3739_v9 = vpack.c.bf16 %v3087_v32, %v3086_v49 }
 0x44e   :  { %3834 = vst [vmem:[#allocation12 + $0xb8] sm:$0xff] %v3739_v9  }
 0x451   :  { %v3000_v11 = vpop.f32.mrf.mxu1 }
 0x452   :  { %v3088_v52 = vmax.f32 %v3000_v11, 0.0 }
 0x459   :  { %v3002_v25 = vpop.f32.mrf.mxu1 }
 0x45a   :  { %v3089_v20 = vmax.f32 %v3002_v25, 0.0 }
 0x45c   :  { %v3744_v24 = vpack.c.bf16 %v3089_v20, %v3088_v52 }
 0x45e   :  { %3835 = vst [vmem:[#allocation12 + $0xc0] sm:$0xff] %v3744_v24  }
 0x461   :  { %v3005_v34 = vpop.f32.mrf.mxu1 }
 0x462   :  { %v3090_v27 = vmax.f32 %v3005_v34, 0.0 }
 0x469   :  { %v3007_v10 = vpop.f32.mrf.mxu1 }
 0x46a   :  { %v3091_v58 = vmax.f32 %v3007_v10, 0.0 }
 0x46c   :  { %v3749_v33 = vpack.c.bf16 %v3091_v58, %v3090_v27 }
 0x46e   :  { %3836 = vst [vmem:[#allocation12 + $0xc8] sm:$0xff] %v3749_v33  }
 0x471   :  { %v3010_v14 = vpop.f32.mrf.mxu1 }
 0x472   :  { %v3092_v46 = vmax.f32 %v3010_v14, 0.0 }
 0x479   :  { %v3012_v3 = vpop.f32.mrf.mxu1 }
 0x47a   :  { %v3093_v36 = vmax.f32 %v3012_v3, 0.0 }
 0x47c   :  { %v3754_v30 = vpack.c.bf16 %v3093_v36, %v3092_v46 }
 0x47e   :  { %3837 = vst [vmem:[#allocation12 + $0xd0] sm:$0xff] %v3754_v30  }
 0x481   :  { %v3015_v17 = vpop.f32.mrf.mxu1 }
 0x482   :  { %v3094_v44 = vmax.f32 %v3015_v17, 0.0 }
 0x489   :  { %v3017_v61 = vpop.f32.mrf.mxu1 }
 0x48a   :  { %v3095_v62 = vmax.f32 %v3017_v61, 0.0 }
 0x48c   :  { %v3759_v42 = vpack.c.bf16 %v3095_v62, %v3094_v44 }
 0x48e   :  { %3838 = vst [vmem:[#allocation12 + $0xd8] sm:$0xff] %v3759_v42  }
 0x491   :  { %v3020_v8 = vpop.f32.mrf.mxu1 }
 0x492   :  { %v3096_v60 = vmax.f32 %v3020_v8, 0.0 }
 0x499   :  { %v3022_v5 = vpop.f32.mrf.mxu1 }
 0x49a   :  { %v3097_v12 = vmax.f32 %v3022_v5, 0.0 }
 0x49c   :  { %v3764_v35 = vpack.c.bf16 %v3097_v12, %v3096_v60 }
 0x49e   :  { %3839 = vst [vmem:[#allocation12 + $0xe0] sm:$0xff] %v3764_v35  }
 0x4a1   :  { %v3025_v6 = vpop.f32.mrf.mxu1 }
 0x4a2   :  { %v3098_v59 = vmax.f32 %v3025_v6, 0.0 }
 0x4a9   :  { %v3027_v15 = vpop.f32.mrf.mxu1 }
 0x4aa   :  { %v3099_v39 = vmax.f32 %v3027_v15, 0.0 }
 0x4ac   :  { %v3769_v50 = vpack.c.bf16 %v3099_v39, %v3098_v59 }
 0x4ae   :  { %3840 = vst [vmem:[#allocation12 + $0xe8] sm:$0xff] %v3769_v50  }
 0x4b1   :  { %v3030_v37 = vpop.f32.mrf.mxu1 }
 0x4b2   :  { %v3100_v47 = vmax.f32 %v3030_v37, 0.0 }
 0x4b9   :  { %v3032_v2 = vpop.f32.mrf.mxu1 }
 0x4ba   :  { %v3101_v23 = vmax.f32 %v3032_v2, 0.0 }
 0x4bc   :  { %v3774_v51 = vpack.c.bf16 %v3101_v23, %v3100_v47 }
 0x4be   :  { %3841 = vst [vmem:[#allocation12 + $0xf0] sm:$0xff] %v3774_v51  }
 0x4c1   :  { %v3035_v63 = vpop.f32.mrf.mxu1 }
 0x4c2   :  { %v3102_v19 = vmax.f32 %v3035_v63, 0.0 }
 0x4c9   :  { %v3037_v18 = vpop.f32.mrf.mxu1 }
 0x4ca   :  { %v3103_v54 = vmax.f32 %v3037_v18, 0.0 }
 0x4cc   :  { %v3779_v13 = vpack.c.bf16 %v3103_v54, %v3102_v19 }
 0x4ce   :  { %3842 = vst [vmem:[#allocation12 + $0xf8] sm:$0xff] %v3779_v13  }
 0x4cf   :  { %3244 = dma.vmem_to_hbm [thread:$0]  %s3237_s23, 4096, %s3239_s26, [#allocation6], %s3999_s29, %s3999_s29, %s4000_s30  }
 0x4d0   :  { %3996 = dma.done.wait [#allocation6], 4096  }
 0x4d1   :  { %3997 = vsyncadd [#allocation6], 4294963200 }
 0x4d2   :  { %3249 = vsyncpa [#allocation5], 1 }
 0x4d3   :  { %3250 = vsyncpa [#allocation8], 1 }
 0x4d4   :  { %3251 = vsyncpa [#allocation11], 1 }
 0x4d5   :  { %3252 = vsyncpa [#allocation6], 1 }

</bundles_post_ra>
